<compile_context>
chip_gen: v7x
topology: tpu7x:2x2x1
jax: 0.10.0
libtpu: 0.0.40
codegen_flags: <defaults>
</compile_context>

<pallas_src>
import math

import jax
import jax.numpy as jnp
import numpy as np
from jax.experimental import pallas as pl
from jax.experimental.pallas import tpu as pltpu


def _round_up(x, m):
    return ((x + m - 1) // m) * m


def _vmem_budget(byte_items):
    """Scoped-VMEM limit from the actual tile footprint (+25% and 2 MiB slack),
    floored at 24 MiB and capped at 56 MiB (under v7x's 64 MiB per-TC VMEM)."""
    need = int(sum(byte_items) * 1.25) + (2 << 20)
    return int(min(max(need, 24 << 20), 56 << 20))


# ------------------------------- kernels --------------------------------------

def _encoder_kernel(x_ref,
                    w1_ref, b1_ref,
                    w2_ref, b2_ref,
                    w3_ref, b3_ref,
                    h_ref):
    """eeg_encoder + first fmri_generator layer; h stored in bf16."""
    h = jnp.dot(x_ref[...].astype(jnp.bfloat16), w1_ref[...],
                preferred_element_type=jnp.float32)
    h = jnp.maximum(h + b1_ref[...], 0.0)                       # ReLU (f32)
    h = jnp.dot(h.astype(jnp.bfloat16), w2_ref[...],
                preferred_element_type=jnp.float32)
    h = jnp.maximum(h + b2_ref[...], 0.0)                       # ReLU (f32)
    h = jnp.dot(h.astype(jnp.bfloat16), w3_ref[...],
                preferred_element_type=jnp.float32)
    h = jnp.maximum(h + b3_ref[...], 0.0)                       # ReLU (f32)
    h_ref[...] = h.astype(jnp.bfloat16)


def _projection_kernel(h_ref, w4_ref, b4_ref, out_ref):
    """Final projection + Tanh; h is already bf16 (direct MXU LHS)."""
    z = jnp.dot(h_ref[...], w4_ref[...], preferred_element_type=jnp.float32)
    out_ref[...] = jnp.tanh(z + b4_ref[...])                    # Tanh (f32)


# ------------------------------- wrapper --------------------------------------

def ntvit_forward(eeg_data, params, fmri_size, *, batch_tile=None, n_tile=None):
    """eeg_data: (B, eeg_channels) float32. Returns (B, *fmri_size) float32."""
    (w1, b1), (w2, b2), (w3, b3), (w4, b4) = params
    B, C = eeg_data.shape
    H3 = w3.shape[1]                       # 1024
    fmri_dim = int(math.prod(fmri_size))
    assert w4.shape == (H3, fmri_dim)

    # --- batch tile: never split batch just to create grid steps (single TC on
    # v5e/v6e; on v7x parallelism comes from the projection's N axis).  Multiple
    # of 16 for bf16 sublane packing; cap at an MXU-friendly 256.
    if batch_tile is None:
        batch_tile = 256 if B >= 256 else _round_up(max(B, 16), 16)
    batch_tile = max(16, _round_up(batch_tile, 16))
    B_pad = _round_up(B, batch_tile)

    # --- N tile: always lane-dense (>=256-aligned when possible), sized from a
    # VMEM budget so double-buffered W4 + output tiles stay well under v7x VMEM.
    n_pad_min = _round_up(fmri_dim, 256)
    if n_tile is None:
        per_lane = 2 * H3 * 2 + 2 * batch_tile * 4 + 2 * 4   # W4 + out + b4 (dbl-buf)
        n_tile = max(256, min((40 << 20) // per_lane, 4096, n_pad_min))
        n_tile = (n_tile // 256) * 256
    n_tile = min(_round_up(n_tile, 128), n_pad_min)
    N_pad = _round_up(fmri_dim, n_tile)

    # --- padding to tile multiples ------------------------------------------
    x = eeg_data if B_pad == B else jnp.pad(eeg_data, ((0, B_pad - B), (0, 0)))
    w4p = w4 if N_pad == fmri_dim else jnp.pad(w4, ((0, 0), (0, N_pad - fmri_dim)))
    b4p = b4 if N_pad == fmri_dim else jnp.pad(b4, ((0, 0), (0, N_pad - fmri_dim)))

    # ---- pass 1: encoder (x -> h, bf16) --------------------------------------
    enc_vmem = _vmem_budget([
        2 * batch_tile * C * 4,                                 # x tile (f32)
        2 * batch_tile * H3 * 2,                                # h out tile (bf16)
        2 * (w1.size + w2.size + w3.size) * 2,                  # weights (bf16)
        2 * (b1.size + b2.size + b3.size) * 4,                  # biases (f32)
        3 * batch_tile * H3 * 4,                                # f32 temporaries
    ])
    h = pl.pallas_call(
        _encoder_kernel,
        out_shape=jax.ShapeDtypeStruct((B_pad, H3), jnp.bfloat16),
        grid_spec=pltpu.PrefetchScalarGridSpec(
            num_scalar_prefetch=0,
            grid=(B_pad // batch_tile,),
            in_specs=[
                pl.BlockSpec((batch_tile, C), lambda i: (i, 0)),
                pl.BlockSpec(w1.shape, lambda i: (0, 0)),
                pl.BlockSpec(b1.shape, lambda i: (0, 0)),
                pl.BlockSpec(w2.shape, lambda i: (0, 0)),
                pl.BlockSpec(b2.shape, lambda i: (0, 0)),
                pl.BlockSpec(w3.shape, lambda i: (0, 0)),
                pl.BlockSpec(b3.shape, lambda i: (0, 0)),
            ],
            out_specs=pl.BlockSpec((batch_tile, H3), lambda i: (i, 0)),
        ),
        compiler_params=pltpu.CompilerParams(
            dimension_semantics=("parallel",),
            vmem_limit_bytes=enc_vmem,
        ),
    )(x, w1, b1, w2, b2, w3, b3)

    # ---- pass 2: projection (h -> tanh(h @ W4 + b4)), N outer & parallel -----
    # W4 block index depends only on the outer N axis -> each W4 tile is DMA'd
    # once total; on v7x the parallel N axis shards W4 reads across both cores.
    proj_vmem = _vmem_budget([
        2 * batch_tile * H3 * 2,                                # h tile (bf16)
        2 * H3 * n_tile * 2,                                    # W4 tile (bf16)
        2 * n_tile * 4,                                         # b4 tile (f32)
        2 * batch_tile * n_tile * 4,                            # out tile (f32)
        batch_tile * n_tile * 4,                                # f32 accumulator
    ])
    out2d = pl.pallas_call(
        _projection_kernel,
        out_shape=jax.ShapeDtypeStruct((B_pad, N_pad), jnp.float32),
        grid_spec=pltpu.PrefetchScalarGridSpec(
            num_scalar_prefetch=0,
            grid=(N_pad // n_tile, B_pad // batch_tile),
            in_specs=[
                pl.BlockSpec((batch_tile, H3), lambda n, b: (b, 0)),
                pl.BlockSpec((H3, n_tile), lambda n, b: (0, n)),
                pl.BlockSpec((1, n_tile), lambda n, b: (0, n)),
            ],
            out_specs=pl.BlockSpec((batch_tile, n_tile), lambda n, b: (b, n)),
        ),
        compiler_params=pltpu.CompilerParams(
            dimension_semantics=("parallel", "arbitrary"),
            vmem_limit_bytes=proj_vmem,
        ),
    )(h, w4p, b4p)

    if B_pad != B or N_pad != fmri_dim:
        out2d = out2d[:B, :fmri_dim]
    return out2d.reshape((-1,) + tuple(fmri_size))


# ------------------------------ init / reference ------------------------------

def init_params(key, eeg_channels, fmri_dim):
    """Deterministic init mimicking nn.Linear's U(-1/sqrt(in), 1/sqrt(in)).

    Weights are stored (in, out) in bfloat16 (MXU operand dtype); biases stay
    (1, out) float32 (bias / activation math is f32 in the kernels)."""
    dims = [(eeg_channels, 512), (512, 768), (768, 1024), (1024, fmri_dim)]
    params = []
    for fan_in, fan_out in dims:
        key, kw, kb = jax.random.split(key, 3)
        bound = 1.0 / math.sqrt(fan_in)
        w = jax.random.uniform(kw, (fan_in, fan_out), jnp.float32, -bound, bound)
        b = jax.random.uniform(kb, (1, fan_out), jnp.float32, -bound, bound)
        params.append((w.astype(jnp.bfloat16), b))
    return params


def _reference(eeg_data, params):
    (w1, b1), (w2, b2), (w3, b3), (w4, b4) = params
    f32 = lambda a: a.astype(jnp.float32)
    h = jnp.maximum(eeg_data @ f32(w1) + b1, 0.0)
    h = jnp.maximum(h @ f32(w2) + b2, 0.0)
    h = jnp.maximum(h @ f32(w3) + b3, 0.0)
    return jnp.tanh(h @ f32(w4) + b4)


if __name__ == "__main__":
    # Small, module-consistent shapes.  batch=24 is not a multiple of the batch
    # tile (exercises padding); fmri_size=(16,16,4) -> fmri_dim=1024, and
    # n_tile=512 exercises the N-tiled, N-parallel final projection.
    eeg_channels = 128
    fmri_size = (16, 16, 4)
    batch = 24

    key = jax.random.PRNGKey(0)
    key, kx = jax.random.split(key)
    eeg_data = jax.random.normal(kx, (batch, eeg_channels), jnp.float32)

    params = init_params(key, eeg_channels, int(math.prod(fmri_size)))

    out = ntvit_forward(eeg_data, params, fmri_size, n_tile=512)
    out = jax.block_until_ready(out)

    assert out.shape == (batch,) + fmri_size, out.shape

    ref = _reference(eeg_data, params).reshape((-1,) + fmri_size)
    np.testing.assert_allclose(np.asarray(out), np.asarray(ref), rtol=5e-2, atol=2e-2)

    print("KERNEL_OK")
</pallas_src>

<mosaic_0001>
module attributes {stable_mosaic.version = 11 : i64} {
  func.func @_encoder_kernel(%arg0: i32, %arg1: memref<32x128xf32, #tpu.memory_space<vmem>>, %arg2: memref<128x512xbf16, #tpu.memory_space<vmem>>, %arg3: memref<1x512xf32, #tpu.memory_space<vmem>>, %arg4: memref<512x768xbf16, #tpu.memory_space<vmem>>, %arg5: memref<1x768xf32, #tpu.memory_space<vmem>>, %arg6: memref<768x1024xbf16, #tpu.memory_space<vmem>>, %arg7: memref<1x1024xf32, #tpu.memory_space<vmem>>, %arg8: memref<32x1024xbf16, #tpu.memory_space<vmem>>) attributes {dimension_semantics = [#tpu.dimension_semantics<parallel>], iteration_bounds = array<i64: 1>, scalar_prefetch = 0 : i64, scratch_operands = 0 : i64, tpu.core_type = #tpu.core_type<tc>, window_params = [{transform_indices = @transform_0, window_bounds = array<i64: 32, 128>}, {pipeline_mode = #tpu.pipeline_mode<synchronous>, transform_indices = @transform_1, window_bounds = array<i64: 128, 512>}, {pipeline_mode = #tpu.pipeline_mode<synchronous>, transform_indices = @transform_2, window_bounds = array<i64: 1, 512>}, {pipeline_mode = #tpu.pipeline_mode<synchronous>, transform_indices = @transform_3, window_bounds = array<i64: 512, 768>}, {pipeline_mode = #tpu.pipeline_mode<synchronous>, transform_indices = @transform_4, window_bounds = array<i64: 1, 768>}, {pipeline_mode = #tpu.pipeline_mode<synchronous>, transform_indices = @transform_5, window_bounds = array<i64: 768, 1024>}, {pipeline_mode = #tpu.pipeline_mode<synchronous>, transform_indices = @transform_6, window_bounds = array<i64: 1, 1024>}, {transform_indices = @transform_7, window_bounds = array<i64: 32, 1024>}]} {
    %c0 = arith.constant 0 : index
    %c0_0 = arith.constant 0 : index
    %0 = vector.load %arg1[%c0, %c0_0] : memref<32x128xf32, #tpu.memory_space<vmem>>, vector<32x128xf32>
    %1 = arith.truncf %0 : vector<32x128xf32> to vector<32x128xbf16>
    %c0_1 = arith.constant 0 : index
    %c0_2 = arith.constant 0 : index
    %2 = vector.load %arg2[%c0_1, %c0_2] : memref<128x512xbf16, #tpu.memory_space<vmem>>, vector<128x512xbf16>
    %cst = arith.constant dense<0.000000e+00> : vector<32x512xf32>
    %3 = tpu.matmul %1, %2, %cst {dimension_numbers = #tpu.dot_dimension_numbers<[1], [0], [0], [1], [0, 0, 1, 1], [], []>} : vector<32x128xbf16>, vector<128x512xbf16>, vector<32x512xf32> -> vector<32x512xf32>
    %c0_3 = arith.constant 0 : index
    %c0_4 = arith.constant 0 : index
    %4 = vector.load %arg3[%c0_3, %c0_4] : memref<1x512xf32, #tpu.memory_space<vmem>>, vector<1x512xf32>
    %5 = vector.broadcast %4 : vector<1x512xf32> to vector<32x512xf32>
    %6 = arith.addf %3, %5 : vector<32x512xf32>
    %cst_5 = arith.constant 0.000000e+00 : f32
    %7 = vector.broadcast %cst_5 : f32 to vector<32x512xf32>
    %8 = arith.maximumf %6, %7 : vector<32x512xf32>
    %9 = arith.truncf %8 : vector<32x512xf32> to vector<32x512xbf16>
    %c0_6 = arith.constant 0 : index
    %c0_7 = arith.constant 0 : index
    %10 = vector.load %arg4[%c0_6, %c0_7] : memref<512x768xbf16, #tpu.memory_space<vmem>>, vector<512x768xbf16>
    %cst_8 = arith.constant dense<0.000000e+00> : vector<32x768xf32>
    %11 = tpu.matmul %9, %10, %cst_8 {dimension_numbers = #tpu.dot_dimension_numbers<[1], [0], [0], [1], [0, 0, 1, 1], [], []>} : vector<32x512xbf16>, vector<512x768xbf16>, vector<32x768xf32> -> vector<32x768xf32>
    %c0_9 = arith.constant 0 : index
    %c0_10 = arith.constant 0 : index
    %12 = vector.load %arg5[%c0_9, %c0_10] : memref<1x768xf32, #tpu.memory_space<vmem>>, vector<1x768xf32>
    %13 = vector.broadcast %12 : vector<1x768xf32> to vector<32x768xf32>
    %14 = arith.addf %11, %13 : vector<32x768xf32>
    %cst_11 = arith.constant 0.000000e+00 : f32
    %15 = vector.broadcast %cst_11 : f32 to vector<32x768xf32>
    %16 = arith.maximumf %14, %15 : vector<32x768xf32>
    %17 = arith.truncf %16 : vector<32x768xf32> to vector<32x768xbf16>
    %c0_12 = arith.constant 0 : index
    %c0_13 = arith.constant 0 : index
    %18 = vector.load %arg6[%c0_12, %c0_13] : memref<768x1024xbf16, #tpu.memory_space<vmem>>, vector<768x1024xbf16>
    %cst_14 = arith.constant dense<0.000000e+00> : vector<32x1024xf32>
    %19 = tpu.matmul %17, %18, %cst_14 {dimension_numbers = #tpu.dot_dimension_numbers<[1], [0], [0], [1], [0, 0, 1, 1], [], []>} : vector<32x768xbf16>, vector<768x1024xbf16>, vector<32x1024xf32> -> vector<32x1024xf32>
    %c0_15 = arith.constant 0 : index
    %c0_16 = arith.constant 0 : index
    %20 = vector.load %arg7[%c0_15, %c0_16] : memref<1x1024xf32, #tpu.memory_space<vmem>>, vector<1x1024xf32>
    %21 = vector.broadcast %20 : vector<1x1024xf32> to vector<32x1024xf32>
    %22 = arith.addf %19, %21 : vector<32x1024xf32>
    %cst_17 = arith.constant 0.000000e+00 : f32
    %23 = vector.broadcast %cst_17 : f32 to vector<32x1024xf32>
    %24 = arith.maximumf %22, %23 : vector<32x1024xf32>
    %25 = arith.truncf %24 : vector<32x1024xf32> to vector<32x1024xbf16>
    %c0_18 = arith.constant 0 : index
    %c0_19 = arith.constant 0 : index
    %26 = vector.load %arg8[%c0_18, %c0_19] : memref<32x1024xbf16, #tpu.memory_space<vmem>>, vector<32x1024xbf16>
    tpu.vector_store %arg8[%c0_18, %c0_19], %25 {strides = array<i32>} : memref<32x1024xbf16, #tpu.memory_space<vmem>>, vector<32x1024xbf16>,
    return
  }
  func.func @transform_0(%arg0: i32) -> (i32, i32) {
    %c0_i32 = arith.constant 0 : i32
    %c0_i32_0 = arith.constant 0 : i32
    return %arg0, %c0_i32 : i32, i32
  }
  func.func @transform_1(%arg0: i32) -> (i32, i32) {
    %c0_i32 = arith.constant 0 : i32
    %c0_i32_0 = arith.constant 0 : i32
    %c0_i32_1 = arith.constant 0 : i32
    return %c0_i32, %c0_i32_0 : i32, i32
  }
  func.func @transform_2(%arg0: i32) -> (i32, i32) {
    %c0_i32 = arith.constant 0 : i32
    %c0_i32_0 = arith.constant 0 : i32
    %c0_i32_1 = arith.constant 0 : i32
    return %c0_i32, %c0_i32_0 : i32, i32
  }
  func.func @transform_3(%arg0: i32) -> (i32, i32) {
    %c0_i32 = arith.constant 0 : i32
    %c0_i32_0 = arith.constant 0 : i32
    %c0_i32_1 = arith.constant 0 : i32
    return %c0_i32, %c0_i32_0 : i32, i32
  }
  func.func @transform_4(%arg0: i32) -> (i32, i32) {
    %c0_i32 = arith.constant 0 : i32
    %c0_i32_0 = arith.constant 0 : i32
    %c0_i32_1 = arith.constant 0 : i32
    return %c0_i32, %c0_i32_0 : i32, i32
  }
  func.func @transform_5(%arg0: i32) -> (i32, i32) {
    %c0_i32 = arith.constant 0 : i32
    %c0_i32_0 = arith.constant 0 : i32
    %c0_i32_1 = arith.constant 0 : i32
    return %c0_i32, %c0_i32_0 : i32, i32
  }
  func.func @transform_6(%arg0: i32) -> (i32, i32) {
    %c0_i32 = arith.constant 0 : i32
    %c0_i32_0 = arith.constant 0 : i32
    %c0_i32_1 = arith.constant 0 : i32
    return %c0_i32, %c0_i32_0 : i32, i32
  }
  func.func @transform_7(%arg0: i32) -> (i32, i32) {
    %c0_i32 = arith.constant 0 : i32
    %c0_i32_0 = arith.constant 0 : i32
    return %arg0, %c0_i32 : i32, i32
  }
}

</mosaic_0001>

<bundles_post_ra>
// kernel: tpu_custom_call.1
= control target key start
LH: loop header
LB: loop body
LE: loop exit
PB: predicated region body
PF: predicated region fallthrough
CT: control target
= control target key end

     0   :  { %12 = vsyncpa [#allocation3], 0  ;;  %s6852_s0 = inlined_call_operand.hbm [shape: f32[32,128], index: 0, kind: input, shape index: {}]   ;;  %s6853_s1 = inlined_call_operand.hbm [shape: bf16[128,512], index: 1, kind: input, shape index: {}]   ;;  %s6854_s2 = inlined_call_operand.hbm [shape: f32[1,512], index: 2, kind: input, shape index: {}]   ;;  %s6855_s3 = inlined_call_operand.hbm [shape: bf16[512,768], index: 3, kind: input, shape index: {}]   ;;  %s6856_s4 = inlined_call_operand.hbm [shape: f32[1,768], index: 4, kind: input, shape index: {}]   ;;  %s6857_s5 = inlined_call_operand.hbm [shape: bf16[768,1024], index: 5, kind: input, shape index: {}]   ;;  %s6858_s6 = inlined_call_operand.hbm [shape: f32[1,1024], index: 6, kind: input, shape index: {}]   ;;  %s6859_s7 = inlined_call_operand.hbm [shape: bf16[32,1024], index: 7, kind: output, shape index: {}]  }
   0x1   :  { %13 = vsyncpa [#allocation6], 0 }
   0x2   :  { %14 = vsyncpa [#allocation9], 0 }
   0x3   :  { %15 = vsyncpa [#allocation12], 0 }
   0x4   :  { %16 = vsyncpa [#allocation4], 0  ;;  %s6474_s24 = smov [#allocation5]   ;;  %s6288_s28 = scalar_lea.hbm %s6853_s1, 4096 }
   0x5   :  { %s34_s25 = sshll.u32 %s6474_s24, 4  ;;  %p6289_p0 = scmp.ne.s32.totalorder %s6853_s1, %s6288_s28  ;;  %s35_s25 = int_to_ptr.vmem [resolvable:$true] %s34_s25 }
   0x6   :  { %p6292_p1 = scmp.lt.u32.totalorder %s6288_s28, %s6853_s1 }
   0x8   :  { %p6294_p2 = pnand %p6292_p1, %p6289_p0 }
   0xa   :  { %6297 = shalt.err (!%p6294_p2)
}
   0xb   :  { %s6298_s10 = scalar_lea.vmem %s35_s25, 4096  ;;  %p6303_p4 = scmp.lt.s32.totalorder %s35_s25, %s35_s25 }
   0xc   :  { %p6299_p3 = scmp.ne.s32.totalorder %s35_s25, %s6298_s10  ;;  %p6304_p5 = scmp.lt.s32.totalorder %s6298_s10, %s6298_s10 }
   0xe   :  { %p6305_p6 = por %p6304_p5, %p6303_p4 }
  0x10   :  { %p6306_p7 = pnand %p6305_p6, %p6299_p3 }
  0x12   :  { %6309 = shalt.err (!%p6306_p7)
}
  0x13   :  { %s6475_s11 = smov 256   ;;  %s6476_s12 = smov 16  }
  0x14   :  { %40 = dma.hbm_to_vmem [thread:$0]  %s6853_s1, 4096, %s35_s25, [#allocation6], %s6475_s11, %s6475_s11, %s6476_s12  }
  0x15   :  { %s6477_s15 = smov [#allocation8]   ;;  %s6310_s19 = scalar_lea.hbm %s6855_s3, 24576 }
  0x16   :  { %s56_s16 = sshll.u32 %s6477_s15, 4  ;;  %p6311_p8 = scmp.ne.s32.totalorder %s6855_s3, %s6310_s19  ;;  %s57_s16 = int_to_ptr.vmem [resolvable:$true] %s56_s16 }
  0x17   :  { %p6314_p9 = scmp.lt.u32.totalorder %s6310_s19, %s6855_s3 }
  0x19   :  { %p6316_p10 = pnand %p6314_p9, %p6311_p8 }
  0x1b   :  { %6319 = shalt.err (!%p6316_p10)
}
  0x1c   :  { %s6320_s24 = scalar_lea.vmem %s57_s16, 24576  ;;  %p6325_p12 = scmp.lt.s32.totalorder %s57_s16, %s57_s16 }
  0x1d   :  { %p6321_p11 = scmp.ne.s32.totalorder %s57_s16, %s6320_s24  ;;  %p6326_p13 = scmp.lt.s32.totalorder %s6320_s24, %s6320_s24 }
  0x1f   :  { %p6327_p0 = por %p6326_p13, %p6325_p12 }
  0x21   :  { %p6328_p1 = pnand %p6327_p0, %p6321_p11 }
  0x23   :  { %6331 = shalt.err (!%p6328_p1)
}
  0x24   :  { %s6478_s1 = smov 384   ;;  %s6479_s25 = smov 24  }
  0x25   :  { %62 = dma.hbm_to_vmem [thread:$0]  %s6855_s3, 24576, %s57_s16, [#allocation9], %s6478_s1, %s6478_s1, %s6479_s25  }
  0x26   :  { %s6480_s28 = smov [#allocation11]   ;;  %s6332_s9 = scalar_lea.hbm %s6857_s5, 49152 }
  0x27   :  { %s78_s29 = sshll.u32 %s6480_s28, 4  ;;  %p6333_p2 = scmp.ne.s32.totalorder %s6857_s5, %s6332_s9  ;;  %s79_s29 = int_to_ptr.vmem [resolvable:$true] %s78_s29 }
  0x28   :  { %p6336_p3 = scmp.lt.u32.totalorder %s6332_s9, %s6857_s5 }
  0x2a   :  { %p6338_p4 = pnand %p6336_p3, %p6333_p2 }
  0x2c   :  { %6341 = shalt.err (!%p6338_p4)
}
  0x2d   :  { %s6342_s14 = scalar_lea.vmem %s79_s29, 49152  ;;  %p6347_p6 = scmp.lt.s32.totalorder %s79_s29, %s79_s29 }
  0x2e   :  { %p6343_p5 = scmp.ne.s32.totalorder %s79_s29, %s6342_s14  ;;  %p6348_p7 = scmp.lt.s32.totalorder %s6342_s14, %s6342_s14 }
  0x30   :  { %p6349_p8 = por %p6348_p7, %p6347_p6 }
  0x32   :  { %p6350_p9 = pnand %p6349_p8, %p6343_p5 }
  0x34   :  { %6353 = shalt.err (!%p6350_p9)
}
  0x35   :  { %s6481_s3 = smov 512   ;;  %s6482_s15 = smov 32  }
  0x36   :  { %84 = dma.hbm_to_vmem [thread:$0]  %s6857_s5, 49152, %s79_s29, [#allocation12], %s6481_s3, %s6481_s3, %s6482_s15  }
  0x37   :  { %s6483_s18 = smov [#allocation2]   ;;  %s6354_s22 = scalar_lea.hbm %s6852_s0, 512 }
  0x38   :  { %s22_s19 = sshll.u32 %s6483_s18, 4  ;;  %p6355_p10 = scmp.ne.s32.totalorder %s6852_s0, %s6354_s22  ;;  %s23_s19 = int_to_ptr.vmem [resolvable:$true] %s22_s19 }
  0x39   :  { %p6358_p11 = scmp.lt.u32.totalorder %s6354_s22, %s6852_s0 }
  0x3b   :  { %p6360_p12 = pnand %p6358_p11, %p6355_p10 }
  0x3d   :  { %6363 = shalt.err (!%p6360_p12)
}
  0x3e   :  { %s6364_s26 = scalar_lea.vmem %s23_s19, 512  ;;  %p6369_p0 = scmp.lt.s32.totalorder %s23_s19, %s23_s19 }
  0x3f   :  { %p6365_p13 = scmp.ne.s32.totalorder %s23_s19, %s6364_s26  ;;  %p6370_p1 = scmp.lt.s32.totalorder %s6364_s26, %s6364_s26 }
  0x41   :  { %p6371_p2 = por %p6370_p1, %p6369_p0 }
  0x43   :  { %p6372_p3 = pnand %p6371_p2, %p6365_p13 }
  0x45   :  { %6375 = shalt.err (!%p6372_p3)
}
  0x46   :  { %s6484_s5 = smov 128   ;;  %s6485_s27 = smov 8  }
  0x47   :  { %28 = dma.hbm_to_vmem [thread:$0]  %s6852_s0, 512, %s23_s19, [#allocation3], %s6484_s5, %s6484_s5, %s6485_s27  }
  0x48   :  { %s6486_s30 = smov [#allocation7]   ;;  %s6487_s9 = smov [#allocation10]  }
  0x49   :  { %s47_s8 = sshll.u32 %s6486_s30, 4  ;;  %s69_s10 = sshll.u32 %s6487_s9, 4  ;;  %s48_s8 = int_to_ptr.vmem [resolvable:$true] %s47_s8  ;;  %s70_s10 = int_to_ptr.vmem [resolvable:$true] %s69_s10 }
  0x4a   :  { %s6376_s13 = scalar_lea.hbm %s6854_s2, 64 }
  0x4b   :  { %p6377_p4 = scmp.ne.s32.totalorder %s6854_s2, %s6376_s13  ;;  %p6380_p5 = scmp.lt.u32.totalorder %s6376_s13, %s6854_s2 }
  0x4d   :  { %p6382_p6 = pnand %p6380_p5, %p6377_p4 }
  0x4f   :  { %6385 = shalt.err (!%p6382_p6)
}
  0x50   :  { %s6386_s0 = scalar_lea.vmem %s48_s8, 64  ;;  %p6391_p8 = scmp.lt.s32.totalorder %s48_s8, %s48_s8 }
  0x51   :  { %p6387_p7 = scmp.ne.s32.totalorder %s48_s8, %s6386_s0  ;;  %p6392_p9 = scmp.lt.s32.totalorder %s6386_s0, %s6386_s0 }
  0x53   :  { %p6393_p10 = por %p6392_p9, %p6391_p8 }
  0x55   :  { %p6394_p11 = pnand %p6393_p10, %p6387_p7 }
  0x57   :  { %6397 = shalt.err (!%p6394_p11)
}
  0x58   :  { %50 = dma.hbm_to_vmem [thread:$0]  %s6854_s2, 64, %s48_s8, [#allocation6]  }
  0x59   :  { %s6398_s23 = scalar_lea.hbm %s6856_s4, 96 }
  0x5a   :  { %p6399_p12 = scmp.ne.s32.totalorder %s6856_s4, %s6398_s23  ;;  %p6402_p13 = scmp.lt.u32.totalorder %s6398_s23, %s6856_s4 }
  0x5c   :  { %p6404_p0 = pnand %p6402_p13, %p6399_p12 }
  0x5e   :  { %6407 = shalt.err (!%p6404_p0)
}
  0x5f   :  { %s6408_s5 = scalar_lea.vmem %s70_s10, 96  ;;  %p6413_p2 = scmp.lt.s32.totalorder %s70_s10, %s70_s10 }
  0x60   :  { %p6409_p1 = scmp.ne.s32.totalorder %s70_s10, %s6408_s5  ;;  %p6414_p3 = scmp.lt.s32.totalorder %s6408_s5, %s6408_s5 }
  0x62   :  { %p6415_p4 = por %p6414_p3, %p6413_p2 }
  0x64   :  { %p6416_p5 = pnand %p6415_p4, %p6409_p1 }
  0x66   :  { %6419 = shalt.err (!%p6416_p5)
}
  0x67   :  { %72 = dma.hbm_to_vmem [thread:$0]  %s6856_s4, 96, %s70_s10, [#allocation9]  }
  0x68   :  { %s6488_s28 = smov [#allocation13]   ;;  %s6420_s9 = scalar_lea.hbm %s6858_s6, 128 }
  0x69   :  { %s91_s29 = sshll.u32 %s6488_s28, 4  ;;  %p6421_p6 = scmp.ne.s32.totalorder %s6858_s6, %s6420_s9  ;;  %s92_s29 = int_to_ptr.vmem [resolvable:$true] %s91_s29 }
  0x6a   :  { %p6424_p7 = scmp.lt.u32.totalorder %s6420_s9, %s6858_s6 }
  0x6c   :  { %p6426_p8 = pnand %p6424_p7, %p6421_p6 }
  0x6e   :  { %6429 = shalt.err (!%p6426_p8)
}
  0x6f   :  { %s6430_s16 = scalar_lea.vmem %s92_s29, 128  ;;  %p6435_p10 = scmp.lt.s32.totalorder %s92_s29, %s92_s29 }
  0x70   :  { %p6431_p9 = scmp.ne.s32.totalorder %s92_s29, %s6430_s16  ;;  %p6436_p11 = scmp.lt.s32.totalorder %s6430_s16, %s6430_s16 }
  0x72   :  { %p6437_p12 = por %p6436_p11, %p6435_p10 }
  0x74   :  { %p6438_p13 = pnand %p6437_p12, %p6431_p9 }
  0x76   :  { %6441 = shalt.err (!%p6438_p13)
}
  0x77   :  { %94 = dma.hbm_to_vmem [thread:$0]  %s6858_s6, 128, %s92_s29, [#allocation12]  }
  0x78   :  { %6464 = dma.done.wait [#allocation3], 512  }
  0x79   :  { %6465 = vsyncadd [#allocation3], 4294966784 }
  0x7a   :  { %6466 = dma.done.wait [#allocation6], 4160  }
  0x7b   :  { %6467 = vsyncadd [#allocation6], 4294963136 }
  0x7c   :  { %6468 = dma.done.wait [#allocation9], 24672  }
  0x7d   :  { %6469 = vsyncadd [#allocation9], 4294942624 }
  0x7e   :  { %6470 = dma.done.wait [#allocation12], 49280  }
  0x7f   :  { %6471 = vsyncadd [#allocation12], 4294918016  ;;  %v6489_v0 = vmov 0   ;;  %v5952_v1 = vld [vmem:[#allocation5 + $0x4] ss:$16 sps:$4 sm:$0xff]   ;;  %v118_v34 = vld [vmem:[#allocation2 + $0x8] sm:$0xff] }
  0x80   :  { %369 = vmatprep.mubr.bf16.mxu0 %v6489_v0  ;;  %422 = vmatprep.mubr.bf16.mxu1 %v6489_v0  ;;  %v5954_v2 = vld [vmem:[#allocation5 + $0xc] ss:$16 sps:$4 sm:$0xff]   ;;  %v5956_v3 = vld [vmem:[#allocation5] ss:$16 sps:$4 sm:$0xff]   ;;  %v5957_v4 = vld [vmem:[#allocation5 + $0x8] ss:$16 sps:$4 sm:$0xff]  }
  0x81   :  { %337 = vmatprep.subr.bf16.mxu0 %v5952_v1  ;;  %390 = vmatprep.subr.bf16.mxu1 %v5954_v2  ;;  %v5958_v5 = vld [vmem:[#allocation5 + $0x24] ss:$16 sps:$4 sm:$0xff]   ;;  %v5960_v6 = vld [vmem:[#allocation5 + $0x2c] ss:$16 sps:$4 sm:$0xff]   ;;  %v5962_v7 = vld [vmem:[#allocation5 + $0x20] ss:$16 sps:$4 sm:$0xff]  }
  0x82   :  { %338 = vmatpush1.bf16.msra.mxu0 %v5956_v3  ;;  %391 = vmatpush1.bf16.msra.mxu1 %v5957_v4  ;;  %v5963_v8 = vld [vmem:[#allocation5 + $0x28] ss:$16 sps:$4 sm:$0xff]   ;;  %v5964_v9 = vld [vmem:[#allocation5 + $0x44] ss:$16 sps:$4 sm:$0xff]   ;;  %v5966_v10 = vld [vmem:[#allocation5 + $0x4c] ss:$16 sps:$4 sm:$0xff]  }
  0x83   :  { %339 = vmatprep.subr.bf16.mxu0 %v5958_v5  ;;  %392 = vmatprep.subr.bf16.mxu1 %v5960_v6  ;;  %v5968_v11 = vld [vmem:[#allocation5 + $0x40] ss:$16 sps:$4 sm:$0xff]   ;;  %v5969_v12 = vld [vmem:[#allocation5 + $0x48] ss:$16 sps:$4 sm:$0xff]   ;;  %v5970_v13 = vld [vmem:[#allocation5 + $0x64] ss:$16 sps:$4 sm:$0xff]  }
  0x84   :  { %v5972_v14 = vld [vmem:[#allocation5 + $0x6c] ss:$16 sps:$4 sm:$0xff]   ;;  %v5974_v15 = vld [vmem:[#allocation5 + $0x60] ss:$16 sps:$4 sm:$0xff]   ;;  %v5975_v16 = vld [vmem:[#allocation5 + $0x68] ss:$16 sps:$4 sm:$0xff]  }
  0x85   :  { %v5976_v17 = vld [vmem:[#allocation5 + $0x84] ss:$16 sps:$4 sm:$0xff]   ;;  %v5978_v18 = vld [vmem:[#allocation5 + $0x8c] ss:$16 sps:$4 sm:$0xff]   ;;  %v5980_v19 = vld [vmem:[#allocation5 + $0x80] ss:$16 sps:$4 sm:$0xff]  }
  0x86   :  { %340 = vmatpush1.bf16.msra.mxu0 %v5962_v7  ;;  %393 = vmatpush1.bf16.msra.mxu1 %v5963_v8  ;;  %v5981_v20 = vld [vmem:[#allocation5 + $0x88] ss:$16 sps:$4 sm:$0xff]   ;;  %v5982_v21 = vld [vmem:[#allocation5 + $0xa4] ss:$16 sps:$4 sm:$0xff]   ;;  %v5984_v22 = vld [vmem:[#allocation5 + $0xac] ss:$16 sps:$4 sm:$0xff]  }
  0x87   :  { %341 = vmatprep.subr.bf16.mxu0 %v5964_v9  ;;  %394 = vmatprep.subr.bf16.mxu1 %v5966_v10  ;;  %v5986_v23 = vld [vmem:[#allocation5 + $0xa0] ss:$16 sps:$4 sm:$0xff]   ;;  %v5987_v24 = vld [vmem:[#allocation5 + $0xa8] ss:$16 sps:$4 sm:$0xff]   ;;  %v5988_v25 = vld [vmem:[#allocation5 + $0xc4] ss:$16 sps:$4 sm:$0xff]  }
  0x88   :  { %v5990_v26 = vld [vmem:[#allocation5 + $0xcc] ss:$16 sps:$4 sm:$0xff]   ;;  %v5992_v27 = vld [vmem:[#allocation5 + $0xc0] ss:$16 sps:$4 sm:$0xff]   ;;  %v5993_v28 = vld [vmem:[#allocation5 + $0xc8] ss:$16 sps:$4 sm:$0xff]  }
  0x89   :  { %v5994_v29 = vld [vmem:[#allocation5 + $0xe4] ss:$16 sps:$4 sm:$0xff]   ;;  %v5996_v30 = vld [vmem:[#allocation5 + $0xec] ss:$16 sps:$4 sm:$0xff]   ;;  %v5998_v31 = vld [vmem:[#allocation5 + $0xe0] ss:$16 sps:$4 sm:$0xff]  }
  0x8a   :  { %342 = vmatpush1.bf16.msra.mxu0 %v5968_v11  ;;  %395 = vmatpush1.bf16.msra.mxu1 %v5969_v12  ;;  %v5999_v32 = vld [vmem:[#allocation5 + $0xe8] ss:$16 sps:$4 sm:$0xff]   ;;  %v117_v33 = vld [vmem:[#allocation2] sm:$0xff]  ;;  %v119_v42 = vld [vmem:[#allocation2 + $0x10] sm:$0xff]  ;;  %s6490_s6 = smov [#allocation14]  }
  0x8b   :  { %343 = vmatprep.subr.bf16.mxu0 %v5970_v13  ;;  %396 = vmatprep.subr.bf16.mxu1 %v5972_v14  ;;  %v6002_v35 = vld [vmem:[#allocation8 + $0x4] ss:$24 sps:$4 sm:$0xff]   ;;  %v121_v37 = vpack.c.bf16 %v118_v34, %v117_v33  ;;  %v6000_v38 = vld [vmem:[#allocation8] ss:$24 sps:$4 sm:$0xff]   ;;  %v6008_v40 = vld [vmem:[#allocation8 + $0x34] ss:$24 sps:$4 sm:$0xff]  }
  0x8c   :  { %v6005_v36 = vld [vmem:[#allocation8 + $0x304] ss:$24 sps:$4 sm:$0xff]   ;;  %v6003_v39 = vld [vmem:[#allocation8 + $0x300] ss:$24 sps:$4 sm:$0xff]   ;;  %v6011_v41 = vld [vmem:[#allocation8 + $0x334] ss:$24 sps:$4 sm:$0xff]  }
  0x8d   :  { %v120_v43 = vld [vmem:[#allocation2 + $0x18] sm:$0xff]  ;;  %v6006_v44 = vld [vmem:[#allocation8 + $0x30] ss:$24 sps:$4 sm:$0xff]   ;;  %v6014_v46 = vld [vmem:[#allocation8 + $0x64] ss:$24 sps:$4 sm:$0xff]   ;;  %s5136_s17 = sshll.u32 %s6490_s6, 4  ;;  %s5137_s17 = int_to_ptr.vmem [resolvable:$true] %s5136_s17 }
  0x8e   :  { %344 = vmatpush1.bf16.msra.mxu0 %v5974_v15  ;;  %397 = vmatpush1.bf16.msra.mxu1 %v5975_v16  ;;  %v6009_v45 = vld [vmem:[#allocation8 + $0x330] ss:$24 sps:$4 sm:$0xff]   ;;  %v6017_v47 = vld [vmem:[#allocation8 + $0x364] ss:$24 sps:$4 sm:$0xff]   ;;  %v122_v48 = vpack.c.bf16 %v120_v43, %v119_v42  ;;  %v6012_v49 = vld [vmem:[#allocation8 + $0x60] ss:$24 sps:$4 sm:$0xff]   ;;  %p6447_p1 = scmp.lt.s32.totalorder %s5137_s17, %s5137_s17 }
  0x8f   :  { %345 = vmatprep.subr.bf16.mxu0 %v5976_v17  ;;  %398 = vmatprep.subr.bf16.mxu1 %v5978_v18  ;;  %v6015_v50 = vld [vmem:[#allocation8 + $0x360] ss:$24 sps:$4 sm:$0xff]   ;;  %v6020_v51 = vld [vmem:[#allocation8 + $0x94] ss:$24 sps:$4 sm:$0xff]   ;;  %v6018_v53 = vld [vmem:[#allocation8 + $0x90] ss:$24 sps:$4 sm:$0xff]  }
  0x90   :  { %v6023_v52 = vld [vmem:[#allocation8 + $0x394] ss:$24 sps:$4 sm:$0xff]   ;;  %v6021_v54 = vld [vmem:[#allocation8 + $0x390] ss:$24 sps:$4 sm:$0xff]   ;;  %v6026_v55 = vld [vmem:[#allocation8 + $0xc4] ss:$24 sps:$4 sm:$0xff]  }
  0x91   :  { %v6029_v56 = vld [vmem:[#allocation8 + $0x3c4] ss:$24 sps:$4 sm:$0xff]   ;;  %v6024_v57 = vld [vmem:[#allocation8 + $0xc0] ss:$24 sps:$4 sm:$0xff]   ;;  %v6032_v59 = vld [vmem:[#allocation8 + $0xf4] ss:$24 sps:$4 sm:$0xff]  }
  0x92   :  { %346 = vmatpush1.bf16.msra.mxu0 %v5980_v19  ;;  %399 = vmatpush1.bf16.msra.mxu1 %v5981_v20  ;;  %v6027_v58 = vld [vmem:[#allocation8 + $0x3c0] ss:$24 sps:$4 sm:$0xff]   ;;  %v6035_v60 = vld [vmem:[#allocation8 + $0x3f4] ss:$24 sps:$4 sm:$0xff]   ;;  %v6030_v61 = vld [vmem:[#allocation8 + $0xf0] ss:$24 sps:$4 sm:$0xff]  }
  0x93   :  { %347 = vmatprep.subr.bf16.mxu0 %v5982_v21  ;;  %400 = vmatprep.subr.bf16.mxu1 %v5984_v22  ;;  %v6033_v62 = vld [vmem:[#allocation8 + $0x3f0] ss:$24 sps:$4 sm:$0xff]   ;;  %v6038_v63 = vld [vmem:[#allocation8 + $0x124] ss:$24 sps:$4 sm:$0xff]   ;;  %v6036_v1 = vld [vmem:[#allocation8 + $0x120] ss:$24 sps:$4 sm:$0xff]  }
  0x94   :  { %v6039_v2 = vld [vmem:[#allocation8 + $0x420] ss:$24 sps:$4 sm:$0xff]   ;;  %v6044_v3 = vld [vmem:[#allocation8 + $0x154] ss:$24 sps:$4 sm:$0xff]   ;;  %v6042_v5 = vld [vmem:[#allocation8 + $0x150] ss:$24 sps:$4 sm:$0xff]  }
  0x95   :  { %v6047_v4 = vld [vmem:[#allocation8 + $0x454] ss:$24 sps:$4 sm:$0xff]   ;;  %v6045_v6 = vld [vmem:[#allocation8 + $0x450] ss:$24 sps:$4 sm:$0xff]   ;;  %v6050_v7 = vld [vmem:[#allocation8 + $0x184] ss:$24 sps:$4 sm:$0xff]  }
  0x96   :  { %348 = vmatpush1.bf16.msra.mxu0 %v5986_v23  ;;  %401 = vmatpush1.bf16.msra.mxu1 %v5987_v24  ;;  %v6053_v8 = vld [vmem:[#allocation8 + $0x484] ss:$24 sps:$4 sm:$0xff]   ;;  %v6048_v9 = vld [vmem:[#allocation8 + $0x180] ss:$24 sps:$4 sm:$0xff]   ;;  %v6056_v11 = vld [vmem:[#allocation8 + $0x1b4] ss:$24 sps:$4 sm:$0xff]  }
  0x97   :  { %349 = vmatprep.subr.bf16.mxu0 %v5988_v25  ;;  %402 = vmatprep.subr.bf16.mxu1 %v5990_v26  ;;  %v6051_v10 = vld [vmem:[#allocation8 + $0x480] ss:$24 sps:$4 sm:$0xff]   ;;  %v6059_v12 = vld [vmem:[#allocation8 + $0x4b4] ss:$24 sps:$4 sm:$0xff]   ;;  %v6054_v13 = vld [vmem:[#allocation8 + $0x1b0] ss:$24 sps:$4 sm:$0xff]  }
  0x98   :  { %v6057_v14 = vld [vmem:[#allocation8 + $0x4b0] ss:$24 sps:$4 sm:$0xff]   ;;  %v6062_v15 = vld [vmem:[#allocation8 + $0x1e4] ss:$24 sps:$4 sm:$0xff]   ;;  %v6060_v17 = vld [vmem:[#allocation8 + $0x1e0] ss:$24 sps:$4 sm:$0xff]  }
  0x99   :  { %v6065_v16 = vld [vmem:[#allocation8 + $0x4e4] ss:$24 sps:$4 sm:$0xff]   ;;  %v6063_v18 = vld [vmem:[#allocation8 + $0x4e0] ss:$24 sps:$4 sm:$0xff]   ;;  %v6068_v19 = vld [vmem:[#allocation8 + $0x214] ss:$24 sps:$4 sm:$0xff]  }
  0x9a   :  { %350 = vmatpush1.bf16.msra.mxu0 %v5992_v27  ;;  %403 = vmatpush1.bf16.msra.mxu1 %v5993_v28  ;;  %v6071_v20 = vld [vmem:[#allocation8 + $0x514] ss:$24 sps:$4 sm:$0xff]   ;;  %v6066_v21 = vld [vmem:[#allocation8 + $0x210] ss:$24 sps:$4 sm:$0xff]   ;;  %v6074_v23 = vld [vmem:[#allocation8 + $0x244] ss:$24 sps:$4 sm:$0xff]  }
  0x9b   :  { %351 = vmatprep.subr.bf16.mxu0 %v5994_v29  ;;  %404 = vmatprep.subr.bf16.mxu1 %v5996_v30  ;;  %v6069_v22 = vld [vmem:[#allocation8 + $0x510] ss:$24 sps:$4 sm:$0xff]   ;;  %v6077_v24 = vld [vmem:[#allocation8 + $0x544] ss:$24 sps:$4 sm:$0xff]   ;;  %v6072_v25 = vld [vmem:[#allocation8 + $0x240] ss:$24 sps:$4 sm:$0xff]  }
  0x9c   :  { %v6075_v26 = vld [vmem:[#allocation8 + $0x540] ss:$24 sps:$4 sm:$0xff]   ;;  %v6080_v27 = vld [vmem:[#allocation8 + $0x274] ss:$24 sps:$4 sm:$0xff]   ;;  %v6078_v29 = vld [vmem:[#allocation8 + $0x270] ss:$24 sps:$4 sm:$0xff]  }
  0x9d   :  { %v6083_v28 = vld [vmem:[#allocation8 + $0x574] ss:$24 sps:$4 sm:$0xff]   ;;  %v6081_v30 = vld [vmem:[#allocation8 + $0x570] ss:$24 sps:$4 sm:$0xff]   ;;  %v6084_v33 = vld [vmem:[#allocation8 + $0x2a0] ss:$24 sps:$4 sm:$0xff]  }
  0x9e   :  { %352 = vmatpush1.bf16.msra.mxu0 %v5998_v31  ;;  %405 = vmatpush1.bf16.msra.mxu1 %v5999_v32  ;;  %v6086_v31 = vld [vmem:[#allocation8 + $0x2a4] ss:$24 sps:$4 sm:$0xff]   ;;  %v6087_v34 = vld [vmem:[#allocation8 + $0x5a0] ss:$24 sps:$4 sm:$0xff]   ;;  %s6442_s18 = scalar_lea.vmem %s5137_s17, 2048 }
  0x9f   :  { %1651 = vmatprep.subr.bf16.mxu1 %v6002_v35  ;;  %1704 = vmatprep.subr.bf16.mxu0 %v6005_v36  ;;  %v6089_v32 = vld [vmem:[#allocation8 + $0x5a4] ss:$24 sps:$4 sm:$0xff]   ;;  %v6092_v35 = vld [vmem:[#allocation8 + $0x2d4] ss:$24 sps:$4 sm:$0xff]   ;;  %p6443_p0 = scmp.ne.s32.totalorder %s5137_s17, %s6442_s18  ;;  %p6448_p2 = scmp.lt.s32.totalorder %s6442_s18, %s6442_s18 }
  0xa0   :  { %v6095_v36 = vld [vmem:[#allocation8 + $0x5d4] ss:$24 sps:$4 sm:$0xff]  }
  0xa1   :  { %370 = vmatmul.mubr.bf16.vlgmr.msra.gmra.mrb[0].mxu0 %v121_v37  ;;  %423 = vmatmul.mubr.bf16.vlgmr.msra.gmra.mrb[0].mxu1 %v121_v37  ;;  %v6090_v37 = vld [vmem:[#allocation8 + $0x2d0] ss:$24 sps:$4 sm:$0xff]   ;;  %p6449_p3 = por %p6448_p2, %p6447_p1 }
  0xa2   :  { %379 = vmatprep.mubr.bf16.mxu0 %v6489_v0  ;;  %432 = vmatprep.mubr.bf16.mxu1 %v6489_v0  ;;  %v6041_v0 = vld [vmem:[#allocation8 + $0x424] ss:$24 sps:$4 sm:$0xff]  }
  0xa3   :  { %1652 = vmatpush1.bf16.msra.mxu1 %v6000_v38  ;;  %1705 = vmatpush1.bf16.msra.mxu0 %v6003_v39  ;;  %v6093_v38 = vld [vmem:[#allocation8 + $0x5d0] ss:$24 sps:$4 sm:$0xff]   ;;  %v6098_v39 = vld [vmem:[#allocation8 + $0xc] ss:$24 sps:$4 sm:$0xff]   ;;  %p6450_p4 = pnand %p6449_p3, %p6443_p0 }
  0xa4   :  { %1653 = vmatprep.subr.bf16.mxu1 %v6008_v40  ;;  %1706 = vmatprep.subr.bf16.mxu0 %v6011_v41  ;;  %v6101_v40 = vld [vmem:[#allocation8 + $0x14] ss:$24 sps:$4 sm:$0xff]   ;;  %v157_v41 = vlaneseq }
  0xa6   :  { %v6622_v42 = vshrl.u32 %v157_v41, 7  ;;  %v6105_v41 = vld [vmem:[#allocation8 + $0x40] ss:$24 sps:$4 sm:$0xff]  }
  0xa7   :  { %1654 = vmatpush1.bf16.msra.mxu1 %v6006_v44  ;;  %1707 = vmatpush1.bf16.msra.mxu0 %v6009_v45  ;;  %v155_v45 = vld [vmem:[#allocation7] sm:$0xf] }
  0xa8   :  { %1655 = vmatprep.subr.bf16.mxu1 %v6014_v46  ;;  %1708 = vmatprep.subr.bf16.mxu0 %v6017_v47  ;;  %v6625_v43 = vsub.s32 0, %v6622_v42  ;;  %v6628_v44 = vsub.s32 2, %v6622_v42  ;;  %v6631_v46 = vsub.s32 1, %v6622_v42  ;;  %v6634_v47 = vsub.s32 3, %v6622_v42 }
  0xa9   :  { %380 = vmatmul.mubr.bf16.gmra.mrb[4].mxu0 %v122_v48  ;;  %433 = vmatmul.mubr.bf16.gmra.mrb[4].mxu1 %v122_v48 }
  0xaa   :  { %v160_v48 = vrot.slane %v155_v45, %v6625_v43 }
  0xab   :  { %1656 = vmatpush1.bf16.msra.mxu1 %v6012_v49  ;;  %1709 = vmatpush1.bf16.msra.mxu0 %v6015_v50  ;;  %v168_v49 = vrot.slane %v155_v45, %v6628_v44  ;;  %v164_v50 = vrot.slane %v155_v45, %v6631_v46 }
  0xac   :  { %1657 = vmatprep.subr.bf16.mxu1 %v6020_v51  ;;  %1710 = vmatprep.subr.bf16.mxu0 %v6023_v52  ;;  %v172_v51 = vrot.slane %v155_v45, %v6634_v47 }
  0xaf   :  { %1658 = vmatpush1.bf16.msra.mxu1 %v6018_v53  ;;  %1711 = vmatpush1.bf16.msra.mxu0 %v6021_v54 }
  0xb0   :  { %1659 = vmatprep.subr.bf16.mxu1 %v6026_v55  ;;  %1712 = vmatprep.subr.bf16.mxu0 %v6029_v56 }
  0xb3   :  { %1660 = vmatpush1.bf16.msra.mxu1 %v6024_v57  ;;  %1713 = vmatpush1.bf16.msra.mxu0 %v6027_v58 }
  0xb4   :  { %1661 = vmatprep.subr.bf16.mxu1 %v6032_v59  ;;  %1714 = vmatprep.subr.bf16.mxu0 %v6035_v60 }
  0xb7   :  { %1662 = vmatpush1.bf16.msra.mxu1 %v6030_v61  ;;  %1715 = vmatpush1.bf16.msra.mxu0 %v6033_v62 }
  0xb8   :  { %1663 = vmatprep.subr.bf16.mxu1 %v6038_v63  ;;  %1716 = vmatprep.subr.bf16.mxu0 %v6041_v0 }
  0xbb   :  { %1664 = vmatpush1.bf16.msra.mxu1 %v6036_v1  ;;  %1717 = vmatpush1.bf16.msra.mxu0 %v6039_v2 }
  0xbc   :  { %1665 = vmatprep.subr.bf16.mxu1 %v6044_v3  ;;  %1718 = vmatprep.subr.bf16.mxu0 %v6047_v4 }
  0xbf   :  { %1666 = vmatpush1.bf16.msra.mxu1 %v6042_v5  ;;  %1719 = vmatpush1.bf16.msra.mxu0 %v6045_v6 }
  0xc0   :  { %1667 = vmatprep.subr.bf16.mxu1 %v6050_v7  ;;  %1720 = vmatprep.subr.bf16.mxu0 %v6053_v8 }
  0xc3   :  { %1668 = vmatpush1.bf16.msra.mxu1 %v6048_v9  ;;  %1721 = vmatpush1.bf16.msra.mxu0 %v6051_v10 }
  0xc4   :  { %1669 = vmatprep.subr.bf16.mxu1 %v6056_v11  ;;  %1722 = vmatprep.subr.bf16.mxu0 %v6059_v12 }
  0xc7   :  { %1670 = vmatpush1.bf16.msra.mxu1 %v6054_v13  ;;  %1723 = vmatpush1.bf16.msra.mxu0 %v6057_v14 }
  0xc8   :  { %1671 = vmatprep.subr.bf16.mxu1 %v6062_v15  ;;  %1724 = vmatprep.subr.bf16.mxu0 %v6065_v16 }
  0xcb   :  { %1672 = vmatpush1.bf16.msra.mxu1 %v6060_v17  ;;  %1725 = vmatpush1.bf16.msra.mxu0 %v6063_v18  ;;  %v6096_v18 = vld [vmem:[#allocation8 + $0x8] ss:$24 sps:$4 sm:$0xff]  }
  0xcc   :  { %1673 = vmatprep.subr.bf16.mxu1 %v6068_v19  ;;  %1726 = vmatprep.subr.bf16.mxu0 %v6071_v20  ;;  %v6099_v19 = vld [vmem:[#allocation8 + $0x10] ss:$24 sps:$4 sm:$0xff]  }
  0xcf   :  { %1674 = vmatpush1.bf16.msra.mxu1 %v6066_v21  ;;  %1727 = vmatpush1.bf16.msra.mxu0 %v6069_v22 }
  0xd0   :  { %1675 = vmatprep.subr.bf16.mxu1 %v6074_v23  ;;  %1728 = vmatprep.subr.bf16.mxu0 %v6077_v24  ;;  %v6104_v24 = vld [vmem:[#allocation8 + $0x3c] ss:$24 sps:$4 sm:$0xff]  }
  0xd3   :  { %1676 = vmatpush1.bf16.msra.mxu1 %v6072_v25  ;;  %1729 = vmatpush1.bf16.msra.mxu0 %v6075_v26  ;;  %v6107_v25 = vld [vmem:[#allocation8 + $0x44] ss:$24 sps:$4 sm:$0xff]  }
  0xd4   :  { %1677 = vmatprep.subr.bf16.mxu1 %v6080_v27  ;;  %1730 = vmatprep.subr.bf16.mxu0 %v6083_v28 }
  0xd7   :  { %1678 = vmatpush1.bf16.msra.mxu1 %v6078_v29  ;;  %1731 = vmatpush1.bf16.msra.mxu0 %v6081_v30 }
  0xd8   :  { %1679 = vmatprep.subr.bf16.mxu1 %v6086_v31  ;;  %1732 = vmatprep.subr.bf16.mxu0 %v6089_v32 }
  0xdb   :  { %1680 = vmatpush1.bf16.msra.mxu1 %v6084_v33  ;;  %1733 = vmatpush1.bf16.msra.mxu0 %v6087_v34 }
  0xdc   :  { %1681 = vmatprep.subr.bf16.mxu1 %v6092_v35  ;;  %1734 = vmatprep.subr.bf16.mxu0 %v6095_v36 }
  0xdf   :  { %1682 = vmatpush1.bf16.msra.mxu1 %v6090_v37  ;;  %1735 = vmatpush1.bf16.msra.mxu0 %v6093_v38 }
  0xe0   :  { %1757 = vmatprep.subr.bf16.mxu1 %v6098_v39  ;;  %1863 = vmatprep.subr.bf16.mxu0 %v6101_v40  ;;  %v6102_v40 = vld [vmem:[#allocation8 + $0x38] ss:$24 sps:$4 sm:$0xff]  }
 0x174   :  { %v371_v52 = vpop.f32.mrb[0].mxu0  ;;  %v424_v53 = vpop.f32.mrb[0].mxu1 }
 0x175   :  { %v372_v54 = vadd.f32 %v371_v52, %v160_v48  ;;  %v425_v55 = vadd.f32 %v424_v53, %v168_v49  ;;  %v373_v56 = vpop.f32.mrb[1].mxu0  ;;  %v426_v57 = vpop.f32.mrb[1].mxu1 }
 0x176   :  { %v374_v58 = vadd.f32 %v373_v56, %v164_v50  ;;  %v427_v59 = vadd.f32 %v426_v57, %v172_v51  ;;  %v375_v60 = vpop.f32.mrb[2].mxu0  ;;  %v428_v61 = vpop.f32.mrb[2].mxu1 }
 0x177   :  { %v445_v62 = vmax.f32 %v425_v55, 0.0  ;;  %v376_v63 = vadd.f32 %v375_v60, %v160_v48  ;;  %v429_v0 = vadd.f32 %v428_v61, %v168_v49  ;;  %v377_v1 = vpop.f32.mrb[3].mxu0  ;;  %v430_v2 = vpop.f32.mrb[3].mxu1  ;;  %v443_v6 = vmax.f32 %v372_v54, 0.0  ;;  %v6119_v60 = vld [vmem:[#allocation8 + $0xa4] ss:$24 sps:$4 sm:$0xff]  }
 0x178   :  { %v446_v3 = vmax.f32 %v427_v59, 0.0  ;;  %v378_v4 = vadd.f32 %v377_v1, %v164_v50  ;;  %v431_v5 = vadd.f32 %v430_v2, %v172_v51  ;;  %v444_v9 = vmax.f32 %v374_v58, 0.0  ;;  %v6111_v58 = vld [vmem:[#allocation8 + $0x70] ss:$24 sps:$4 sm:$0xff]   ;;  %v6116_v59 = vld [vmem:[#allocation8 + $0x9c] ss:$24 sps:$4 sm:$0xff]  }
 0x179   :  { %v447_v7 = vmax.f32 %v376_v63, 0.0  ;;  %v449_v8 = vmax.f32 %v429_v0, 0.0  ;;  %v6114_v61 = vld [vmem:[#allocation8 + $0x98] ss:$24 sps:$4 sm:$0xff]   ;;  %v6122_v63 = vld [vmem:[#allocation8 + $0xcc] ss:$24 sps:$4 sm:$0xff]  }
 0x17a   :  { %v448_v10 = vmax.f32 %v378_v4, 0.0  ;;  %v450_v11 = vmax.f32 %v431_v5, 0.0  ;;  %v6125_v0 = vld [vmem:[#allocation8 + $0xd4] ss:$24 sps:$4 sm:$0xff]   ;;  %v6120_v1 = vld [vmem:[#allocation8 + $0xc8] ss:$24 sps:$4 sm:$0xff]  }
 0x17b   :  { %v6640_v12 = vpack.c.bf16 %v447_v7, %v443_v6  ;;  %v6642_v13 = vpack.c.bf16 %v449_v8, %v445_v62  ;;  %v6117_v62 = vld [vmem:[#allocation8 + $0xa0] ss:$24 sps:$4 sm:$0xff]   ;;  %v6123_v2 = vld [vmem:[#allocation8 + $0xd0] ss:$24 sps:$4 sm:$0xff]   ;;  %v6131_v4 = vld [vmem:[#allocation8 + $0x104] ss:$24 sps:$4 sm:$0xff]  }
 0x17c   :  { %v460_v14 = vpack.c.bf16 %v448_v10, %v444_v9  ;;  %v6644_v15 = vpack.c.bf16 %v450_v11, %v446_v3  ;;  %v381_v16 = vpop.f32.mrb[4].mxu0  ;;  %v434_v17 = vpop.f32.mrb[4].mxu1  ;;  %v6128_v3 = vld [vmem:[#allocation8 + $0xfc] ss:$24 sps:$4 sm:$0xff]   ;;  %v6126_v5 = vld [vmem:[#allocation8 + $0xf8] ss:$24 sps:$4 sm:$0xff]  }
 0x17d   :  { %v382_v20 = vadd.f32 %v381_v16, %v160_v48  ;;  %v435_v21 = vadd.f32 %v434_v17, %v168_v49  ;;  %v383_v22 = vpop.f32.mrb[5].mxu0  ;;  %v436_v23 = vpop.f32.mrb[5].mxu1  ;;  %v6129_v6 = vld [vmem:[#allocation8 + $0x100] ss:$24 sps:$4 sm:$0xff]   ;;  %v6134_v7 = vld [vmem:[#allocation8 + $0x12c] ss:$24 sps:$4 sm:$0xff]  }
 0x17e   :  { %v384_v26 = vadd.f32 %v383_v22, %v164_v50  ;;  %v437_v27 = vadd.f32 %v436_v23, %v172_v51  ;;  %v385_v28 = vpop.f32.mrb[6].mxu0  ;;  %v438_v29 = vpop.f32.mrb[6].mxu1  ;;  %1683 = vmatprep.mubr.bf16.mxu1 %v460_v14  ;;  %1736 = vmatprep.mubr.bf16.mxu0 %v6644_v15  ;;  %v6137_v8 = vld [vmem:[#allocation8 + $0x134] ss:$24 sps:$4 sm:$0xff]   ;;  %v6132_v9 = vld [vmem:[#allocation8 + $0x128] ss:$24 sps:$4 sm:$0xff]  }
 0x17f   :  { %v451_v30 = vmax.f32 %v382_v20, 0.0  ;;  %v453_v31 = vmax.f32 %v435_v21, 0.0  ;;  %v386_v32 = vadd.f32 %v385_v28, %v160_v48  ;;  %v439_v33 = vadd.f32 %v438_v29, %v168_v49  ;;  %v387_v34 = vpop.f32.mrb[7].mxu0  ;;  %v440_v35 = vpop.f32.mrb[7].mxu1  ;;  %1684 = vmatmul.mubr.bf16.vlgmr.msra.gmra.mrb[8].mxu1 %v6640_v12  ;;  %1737 = vmatmul.mubr.bf16.vlgmr.msra.gmra.mrb[8].mxu0 %v6642_v13  ;;  %v6110_v48 = vld [vmem:[#allocation8 + $0x6c] ss:$24 sps:$4 sm:$0xff]  }
 0x180   :  { %v452_v36 = vmax.f32 %v384_v26, 0.0  ;;  %v454_v37 = vmax.f32 %v437_v27, 0.0  ;;  %v388_v38 = vadd.f32 %v387_v34, %v164_v50  ;;  %v441_v39 = vadd.f32 %v440_v35, %v172_v51  ;;  %1758 = vmatpush1.bf16.msra.mxu1 %v6096_v18  ;;  %1864 = vmatpush1.bf16.msra.mxu0 %v6099_v19  ;;  %v6113_v49 = vld [vmem:[#allocation8 + $0x74] ss:$24 sps:$4 sm:$0xff]   ;;  %v6108_v51 = vld [vmem:[#allocation8 + $0x68] ss:$24 sps:$4 sm:$0xff]  }
 0x181   :  { %v455_v45 = vmax.f32 %v386_v32, 0.0  ;;  %v457_v52 = vmax.f32 %v439_v33, 0.0  ;;  %1759 = vmatprep.subr.bf16.mxu1 %v6104_v24  ;;  %1865 = vmatprep.subr.bf16.mxu0 %v6107_v25  ;;  %v6135_v10 = vld [vmem:[#allocation8 + $0x130] ss:$24 sps:$4 sm:$0xff]   ;;  %v6140_v11 = vld [vmem:[#allocation8 + $0x15c] ss:$24 sps:$4 sm:$0xff]  }
 0x182   :  { %v456_v53 = vmax.f32 %v388_v38, 0.0  ;;  %v458_v54 = vmax.f32 %v441_v39, 0.0  ;;  %v6138_v16 = vld [vmem:[#allocation8 + $0x158] ss:$24 sps:$4 sm:$0xff]   ;;  %v6146_v18 = vld [vmem:[#allocation8 + $0x18c] ss:$24 sps:$4 sm:$0xff]  }
 0x183   :  { %v6649_v55 = vpack.c.bf16 %v455_v45, %v451_v30  ;;  %v6651_v56 = vpack.c.bf16 %v457_v52, %v453_v31  ;;  %v6141_v17 = vld [vmem:[#allocation8 + $0x160] ss:$24 sps:$4 sm:$0xff]   ;;  %v6149_v19 = vld [vmem:[#allocation8 + $0x194] ss:$24 sps:$4 sm:$0xff]   ;;  %v6147_v21 = vld [vmem:[#allocation8 + $0x190] ss:$24 sps:$4 sm:$0xff]  }
 0x184   :  { %v6653_v57 = vpack.c.bf16 %v456_v53, %v452_v36  ;;  %v6655_v50 = vpack.c.bf16 %v458_v54, %v454_v37  ;;  %1760 = vmatpush1.bf16.msra.mxu1 %v6102_v40  ;;  %1866 = vmatpush1.bf16.msra.mxu0 %v6105_v41  ;;  %v6144_v20 = vld [vmem:[#allocation8 + $0x188] ss:$24 sps:$4 sm:$0xff]   ;;  %v6152_v22 = vld [vmem:[#allocation8 + $0x1bc] ss:$24 sps:$4 sm:$0xff]   ;;  %v6150_v24 = vld [vmem:[#allocation8 + $0x1b8] ss:$24 sps:$4 sm:$0xff]  }
 0x185   :  { %1761 = vmatprep.subr.bf16.mxu1 %v6110_v48  ;;  %1867 = vmatprep.subr.bf16.mxu0 %v6113_v49  ;;  %v6155_v23 = vld [vmem:[#allocation8 + $0x1c4] ss:$24 sps:$4 sm:$0xff]   ;;  %v6153_v25 = vld [vmem:[#allocation8 + $0x1c0] ss:$24 sps:$4 sm:$0xff]   ;;  %v6161_v27 = vld [vmem:[#allocation8 + $0x1f4] ss:$24 sps:$4 sm:$0xff]  }
 0x186   :  { %1693 = vmatprep.mubr.bf16.mxu1 %v6653_v57  ;;  %1746 = vmatprep.mubr.bf16.mxu0 %v6655_v50  ;;  %v6158_v26 = vld [vmem:[#allocation8 + $0x1ec] ss:$24 sps:$4 sm:$0xff]   ;;  %v6156_v28 = vld [vmem:[#allocation8 + $0x1e8] ss:$24 sps:$4 sm:$0xff]   ;;  %v6164_v30 = vld [vmem:[#allocation8 + $0x21c] ss:$24 sps:$4 sm:$0xff]  }
 0x187   :  { %1694 = vmatmul.mubr.bf16.gmra.mrb[12].mxu1 %v6649_v55  ;;  %1747 = vmatmul.mubr.bf16.gmra.mrb[12].mxu0 %v6651_v56  ;;  %v6159_v29 = vld [vmem:[#allocation8 + $0x1f0] ss:$24 sps:$4 sm:$0xff]   ;;  %v6167_v31 = vld [vmem:[#allocation8 + $0x224] ss:$24 sps:$4 sm:$0xff]   ;;  %v6165_v33 = vld [vmem:[#allocation8 + $0x220] ss:$24 sps:$4 sm:$0xff]  }
 0x188   :  { %1762 = vmatpush1.bf16.msra.mxu1 %v6108_v51  ;;  %1868 = vmatpush1.bf16.msra.mxu0 %v6111_v58  ;;  %v6162_v32 = vld [vmem:[#allocation8 + $0x218] ss:$24 sps:$4 sm:$0xff]   ;;  %v6170_v34 = vld [vmem:[#allocation8 + $0x24c] ss:$24 sps:$4 sm:$0xff]   ;;  %v6168_v36 = vld [vmem:[#allocation8 + $0x248] ss:$24 sps:$4 sm:$0xff]  }
 0x189   :  { %1789 = vmatprep.mubr.bf16.mxu1 %v460_v14  ;;  %1895 = vmatprep.mubr.bf16.mxu0 %v460_v14  ;;  %v6143_v14 = vld [vmem:[#allocation8 + $0x164] ss:$24 sps:$4 sm:$0xff]   ;;  %v6173_v35 = vld [vmem:[#allocation8 + $0x254] ss:$24 sps:$4 sm:$0xff]   ;;  %v6171_v37 = vld [vmem:[#allocation8 + $0x250] ss:$24 sps:$4 sm:$0xff]  }
 0x18a   :  { %1763 = vmatprep.subr.bf16.mxu1 %v6116_v59  ;;  %1869 = vmatprep.subr.bf16.mxu0 %v6119_v60  ;;  %v6176_v38 = vld [vmem:[#allocation8 + $0x27c] ss:$24 sps:$4 sm:$0xff]   ;;  %v6174_v40 = vld [vmem:[#allocation8 + $0x278] ss:$24 sps:$4 sm:$0xff]   ;;  %v6182_v45 = vld [vmem:[#allocation8 + $0x2ac] ss:$24 sps:$4 sm:$0xff]  }
 0x18b   :  { %v6179_v39 = vld [vmem:[#allocation8 + $0x284] ss:$24 sps:$4 sm:$0xff]   ;;  %v6177_v41 = vld [vmem:[#allocation8 + $0x280] ss:$24 sps:$4 sm:$0xff]   ;;  %v6185_v52 = vld [vmem:[#allocation8 + $0x2b4] ss:$24 sps:$4 sm:$0xff]  }
 0x18c   :  { %1764 = vmatpush1.bf16.msra.mxu1 %v6114_v61  ;;  %1870 = vmatpush1.bf16.msra.mxu0 %v6117_v62  ;;  %v6180_v48 = vld [vmem:[#allocation8 + $0x2a8] ss:$24 sps:$4 sm:$0xff]   ;;  %v6188_v53 = vld [vmem:[#allocation8 + $0x2dc] ss:$24 sps:$4 sm:$0xff]   ;;  %v6186_v51 = vld [vmem:[#allocation8 + $0x2d8] ss:$24 sps:$4 sm:$0xff]  }
 0x18d   :  { %1765 = vmatprep.subr.bf16.mxu1 %v6122_v63  ;;  %1871 = vmatprep.subr.bf16.mxu0 %v6125_v0  ;;  %v6183_v49 = vld [vmem:[#allocation8 + $0x2b0] ss:$24 sps:$4 sm:$0xff]   ;;  %v6191_v54 = vld [vmem:[#allocation8 + $0x2e4] ss:$24 sps:$4 sm:$0xff]   ;;  %v6189_v58 = vld [vmem:[#allocation8 + $0x2e0] ss:$24 sps:$4 sm:$0xff]  }
 0x18e   :  { %v6194_v59 = vld [vmem:[#allocation8 + $0x30c] ss:$24 sps:$4 sm:$0xff]   ;;  %v6192_v61 = vld [vmem:[#allocation8 + $0x308] ss:$24 sps:$4 sm:$0xff]   ;;  %v6200_v63 = vld [vmem:[#allocation8 + $0x33c] ss:$24 sps:$4 sm:$0xff]  }
 0x18f   :  { %v6197_v60 = vld [vmem:[#allocation8 + $0x314] ss:$24 sps:$4 sm:$0xff]   ;;  %v6195_v62 = vld [vmem:[#allocation8 + $0x310] ss:$24 sps:$4 sm:$0xff]   ;;  %v6203_v0 = vld [vmem:[#allocation8 + $0x344] ss:$24 sps:$4 sm:$0xff]  }
 0x190   :  { %1766 = vmatpush1.bf16.msra.mxu1 %v6120_v1  ;;  %1872 = vmatpush1.bf16.msra.mxu0 %v6123_v2  ;;  %v6198_v1 = vld [vmem:[#allocation8 + $0x338] ss:$24 sps:$4 sm:$0xff]  }
 0x191   :  { %1767 = vmatprep.subr.bf16.mxu1 %v6128_v3  ;;  %1873 = vmatprep.subr.bf16.mxu0 %v6131_v4  ;;  %v6201_v2 = vld [vmem:[#allocation8 + $0x340] ss:$24 sps:$4 sm:$0xff]   ;;  %v6206_v3 = vld [vmem:[#allocation8 + $0x36c] ss:$24 sps:$4 sm:$0xff]  }
 0x192   :  { %v6209_v4 = vld [vmem:[#allocation8 + $0x374] ss:$24 sps:$4 sm:$0xff]  }
 0x194   :  { %1768 = vmatpush1.bf16.msra.mxu1 %v6126_v5  ;;  %1874 = vmatpush1.bf16.msra.mxu0 %v6129_v6  ;;  %v6204_v5 = vld [vmem:[#allocation8 + $0x368] ss:$24 sps:$4 sm:$0xff]  }
 0x195   :  { %1769 = vmatprep.subr.bf16.mxu1 %v6134_v7  ;;  %1875 = vmatprep.subr.bf16.mxu0 %v6137_v8  ;;  %v6207_v6 = vld [vmem:[#allocation8 + $0x370] ss:$24 sps:$4 sm:$0xff]   ;;  %v6212_v7 = vld [vmem:[#allocation8 + $0x39c] ss:$24 sps:$4 sm:$0xff]   ;;  %v6213_v8 = vld [vmem:[#allocation8 + $0x3a0] ss:$24 sps:$4 sm:$0xff]  }
 0x198   :  { %1770 = vmatpush1.bf16.msra.mxu1 %v6132_v9  ;;  %1876 = vmatpush1.bf16.msra.mxu0 %v6135_v10  ;;  %v6218_v9 = vld [vmem:[#allocation8 + $0x3cc] ss:$24 sps:$4 sm:$0xff]  }
 0x199   :  { %1771 = vmatprep.subr.bf16.mxu1 %v6140_v11  ;;  %1877 = vmatprep.subr.bf16.mxu0 %v6143_v14  ;;  %v6221_v10 = vld [vmem:[#allocation8 + $0x3d4] ss:$24 sps:$4 sm:$0xff]   ;;  %v6216_v11 = vld [vmem:[#allocation8 + $0x3c8] ss:$24 sps:$4 sm:$0xff]  }
 0x19a   :  { %v6219_v14 = vld [vmem:[#allocation8 + $0x3d0] ss:$24 sps:$4 sm:$0xff]  }
 0x19c   :  { %1772 = vmatpush1.bf16.msra.mxu1 %v6138_v16  ;;  %1878 = vmatpush1.bf16.msra.mxu0 %v6141_v17  ;;  %v6224_v16 = vld [vmem:[#allocation8 + $0x3fc] ss:$24 sps:$4 sm:$0xff]   ;;  %v6222_v17 = vld [vmem:[#allocation8 + $0x3f8] ss:$24 sps:$4 sm:$0xff]  }
 0x19d   :  { %1773 = vmatprep.subr.bf16.mxu1 %v6146_v18  ;;  %1879 = vmatprep.subr.bf16.mxu0 %v6149_v19  ;;  %v6225_v18 = vld [vmem:[#allocation8 + $0x400] ss:$24 sps:$4 sm:$0xff]   ;;  %v6230_v19 = vld [vmem:[#allocation8 + $0x42c] ss:$24 sps:$4 sm:$0xff]  }
 0x1a0   :  { %1774 = vmatpush1.bf16.msra.mxu1 %v6144_v20  ;;  %1880 = vmatpush1.bf16.msra.mxu0 %v6147_v21  ;;  %v6228_v20 = vld [vmem:[#allocation8 + $0x428] ss:$24 sps:$4 sm:$0xff]  }
 0x1a1   :  { %1775 = vmatprep.subr.bf16.mxu1 %v6152_v22  ;;  %1881 = vmatprep.subr.bf16.mxu0 %v6155_v23  ;;  %v6231_v21 = vld [vmem:[#allocation8 + $0x430] ss:$24 sps:$4 sm:$0xff]   ;;  %v6236_v22 = vld [vmem:[#allocation8 + $0x45c] ss:$24 sps:$4 sm:$0xff]  }
 0x1a2   :  { %v6239_v23 = vld [vmem:[#allocation8 + $0x464] ss:$24 sps:$4 sm:$0xff]  }
 0x1a4   :  { %1776 = vmatpush1.bf16.msra.mxu1 %v6150_v24  ;;  %1882 = vmatpush1.bf16.msra.mxu0 %v6153_v25  ;;  %v6234_v24 = vld [vmem:[#allocation8 + $0x458] ss:$24 sps:$4 sm:$0xff]  }
 0x1a5   :  { %1777 = vmatprep.subr.bf16.mxu1 %v6158_v26  ;;  %1883 = vmatprep.subr.bf16.mxu0 %v6161_v27  ;;  %v6237_v25 = vld [vmem:[#allocation8 + $0x460] ss:$24 sps:$4 sm:$0xff]   ;;  %v6242_v26 = vld [vmem:[#allocation8 + $0x48c] ss:$24 sps:$4 sm:$0xff]  }
 0x1a6   :  { %v6245_v27 = vld [vmem:[#allocation8 + $0x494] ss:$24 sps:$4 sm:$0xff]  }
 0x1a8   :  { %1778 = vmatpush1.bf16.msra.mxu1 %v6156_v28  ;;  %1884 = vmatpush1.bf16.msra.mxu0 %v6159_v29  ;;  %v6240_v28 = vld [vmem:[#allocation8 + $0x488] ss:$24 sps:$4 sm:$0xff]  }
 0x1a9   :  { %1779 = vmatprep.subr.bf16.mxu1 %v6164_v30  ;;  %1885 = vmatprep.subr.bf16.mxu0 %v6167_v31  ;;  %v6243_v29 = vld [vmem:[#allocation8 + $0x490] ss:$24 sps:$4 sm:$0xff]   ;;  %v6248_v30 = vld [vmem:[#allocation8 + $0x4bc] ss:$24 sps:$4 sm:$0xff]  }
 0x1aa   :  { %v6251_v31 = vld [vmem:[#allocation8 + $0x4c4] ss:$24 sps:$4 sm:$0xff]  }
 0x1ac   :  { %1780 = vmatpush1.bf16.msra.mxu1 %v6162_v32  ;;  %1886 = vmatpush1.bf16.msra.mxu0 %v6165_v33  ;;  %v6246_v32 = vld [vmem:[#allocation8 + $0x4b8] ss:$24 sps:$4 sm:$0xff]  }
 0x1ad   :  { %1781 = vmatprep.subr.bf16.mxu1 %v6170_v34  ;;  %1887 = vmatprep.subr.bf16.mxu0 %v6173_v35  ;;  %v6249_v33 = vld [vmem:[#allocation8 + $0x4c0] ss:$24 sps:$4 sm:$0xff]   ;;  %v6254_v34 = vld [vmem:[#allocation8 + $0x4ec] ss:$24 sps:$4 sm:$0xff]  }
 0x1ae   :  { %v6257_v35 = vld [vmem:[#allocation8 + $0x4f4] ss:$24 sps:$4 sm:$0xff]  }
 0x1b0   :  { %1782 = vmatpush1.bf16.msra.mxu1 %v6168_v36  ;;  %1888 = vmatpush1.bf16.msra.mxu0 %v6171_v37  ;;  %v6252_v36 = vld [vmem:[#allocation8 + $0x4e8] ss:$24 sps:$4 sm:$0xff]  }
 0x1b1   :  { %1783 = vmatprep.subr.bf16.mxu1 %v6176_v38  ;;  %1889 = vmatprep.subr.bf16.mxu0 %v6179_v39  ;;  %v6255_v37 = vld [vmem:[#allocation8 + $0x4f0] ss:$24 sps:$4 sm:$0xff]   ;;  %v6260_v38 = vld [vmem:[#allocation8 + $0x51c] ss:$24 sps:$4 sm:$0xff]  }
 0x1b2   :  { %v6263_v39 = vld [vmem:[#allocation8 + $0x524] ss:$24 sps:$4 sm:$0xff]  }
 0x1b4   :  { %1784 = vmatpush1.bf16.msra.mxu1 %v6174_v40  ;;  %1890 = vmatpush1.bf16.msra.mxu0 %v6177_v41  ;;  %v6258_v40 = vld [vmem:[#allocation8 + $0x518] ss:$24 sps:$4 sm:$0xff]  }
 0x1b5   :  { %1785 = vmatprep.subr.bf16.mxu1 %v6182_v45  ;;  %1891 = vmatprep.subr.bf16.mxu0 %v6185_v52  ;;  %v6261_v41 = vld [vmem:[#allocation8 + $0x520] ss:$24 sps:$4 sm:$0xff]   ;;  %v6266_v45 = vld [vmem:[#allocation8 + $0x54c] ss:$24 sps:$4 sm:$0xff]  }
 0x1b6   :  { %v6269_v52 = vld [vmem:[#allocation8 + $0x554] ss:$24 sps:$4 sm:$0xff]  }
 0x1b8   :  { %1786 = vmatpush1.bf16.msra.mxu1 %v6180_v48  ;;  %1892 = vmatpush1.bf16.msra.mxu0 %v6183_v49  ;;  %v6264_v48 = vld [vmem:[#allocation8 + $0x548] ss:$24 sps:$4 sm:$0xff]  }
 0x1b9   :  { %1787 = vmatprep.subr.bf16.mxu1 %v6188_v53  ;;  %1893 = vmatprep.subr.bf16.mxu0 %v6191_v54  ;;  %v6267_v49 = vld [vmem:[#allocation8 + $0x550] ss:$24 sps:$4 sm:$0xff]   ;;  %v6272_v53 = vld [vmem:[#allocation8 + $0x57c] ss:$24 sps:$4 sm:$0xff]  }
 0x1ba   :  { %v6275_v54 = vld [vmem:[#allocation8 + $0x584] ss:$24 sps:$4 sm:$0xff]  }
 0x1bc   :  { %1788 = vmatpush1.bf16.msra.mxu1 %v6186_v51  ;;  %1894 = vmatpush1.bf16.msra.mxu0 %v6189_v58  ;;  %v6270_v51 = vld [vmem:[#allocation8 + $0x578] ss:$24 sps:$4 sm:$0xff]  }
 0x1bd   :  { %1810 = vmatprep.subr.bf16.mxu1 %v6194_v59  ;;  %1916 = vmatprep.subr.bf16.mxu0 %v6197_v60  ;;  %v6273_v58 = vld [vmem:[#allocation8 + $0x580] ss:$24 sps:$4 sm:$0xff]   ;;  %v6278_v59 = vld [vmem:[#allocation8 + $0x5ac] ss:$24 sps:$4 sm:$0xff]  }
 0x1be   :  { %v6281_v60 = vld [vmem:[#allocation8 + $0x5b4] ss:$24 sps:$4 sm:$0xff]  }
 0x1bf   :  { %1790 = vmatmul.mubr.bf16.vlgmr.msra.gmra.mrb[16].mxu1 %v6640_v12  ;;  %1896 = vmatmul.mubr.bf16.vlgmr.msra.gmra.mrb[16].mxu0 %v6640_v12  ;;  %v6215_v12 = vld [vmem:[#allocation8 + $0x3a4] ss:$24 sps:$4 sm:$0xff]  }
 0x1c0   :  { %1799 = vmatprep.mubr.bf16.mxu1 %v6653_v57  ;;  %1811 = vmatpush1.bf16.msra.mxu1 %v6192_v61  ;;  %v6276_v61 = vld [vmem:[#allocation8 + $0x5a8] ss:$24 sps:$4 sm:$0xff]  }
 0x1c1   :  { %1905 = vmatprep.mubr.bf16.mxu0 %v6653_v57  ;;  %1917 = vmatpush1.bf16.msra.mxu0 %v6195_v62  ;;  %v6210_v57 = vld [vmem:[#allocation8 + $0x398] ss:$24 sps:$4 sm:$0xff]  }
 0x1c2   :  { %1812 = vmatprep.subr.bf16.mxu1 %v6200_v63  ;;  %1918 = vmatprep.subr.bf16.mxu0 %v6203_v0  ;;  %v6279_v62 = vld [vmem:[#allocation8 + $0x5b0] ss:$24 sps:$4 sm:$0xff]   ;;  %v6284_v63 = vld [vmem:[#allocation8 + $0x5dc] ss:$24 sps:$4 sm:$0xff]  }
 0x1c3   :  { %v6287_v0 = vld [vmem:[#allocation8 + $0x5e4] ss:$24 sps:$4 sm:$0xff]  }
 0x1c4   :  { %1813 = vmatpush1.bf16.msra.mxu1 %v6198_v1  ;;  %v2005_v1 = vld [vmem:[#allocation11] sm:$0xff] }
 0x1c5   :  { %1919 = vmatpush1.bf16.msra.mxu0 %v6201_v2  ;;  %1814 = vmatprep.subr.bf16.mxu1 %v6206_v3  ;;  %v2009_v2 = vld [vmem:[#allocation11 + $0x20] sm:$0xff]  ;;  %v2006_v3 = vld [vmem:[#allocation11 + $0x8] sm:$0xff] }
 0x1c6   :  { %1920 = vmatprep.subr.bf16.mxu0 %v6209_v4  ;;  %v2010_v4 = vld [vmem:[#allocation11 + $0x28] sm:$0xff] }
 0x1c7   :  { %1800 = vmatmul.mubr.bf16.gmra.mrb[20].mxu1 %v6649_v55  ;;  %1906 = vmatmul.mubr.bf16.gmra.mrb[20].mxu0 %v6649_v55  ;;  %v6227_v55 = vld [vmem:[#allocation8 + $0x404] ss:$24 sps:$4 sm:$0xff]  }
 0x1c8   :  { %1815 = vmatpush1.bf16.msra.mxu1 %v6204_v5  ;;  %1842 = vmatprep.mubr.bf16.mxu1 %v6644_v15  ;;  %v6282_v5 = vld [vmem:[#allocation8 + $0x5d8] ss:$24 sps:$4 sm:$0xff]  }
 0x1c9   :  { %1921 = vmatpush1.bf16.msra.mxu0 %v6207_v6  ;;  %1948 = vmatprep.mubr.bf16.mxu0 %v6644_v15  ;;  %v6233_v15 = vld [vmem:[#allocation8 + $0x434] ss:$24 sps:$4 sm:$0xff]   ;;  %v6285_v6 = vld [vmem:[#allocation8 + $0x5e0] ss:$24 sps:$4 sm:$0xff]  }
 0x1ca   :  { %1816 = vmatprep.subr.bf16.mxu1 %v6212_v7  ;;  %1922 = vmatprep.subr.bf16.mxu0 %v6215_v12  ;;  %v5376_v7 = vcombine.high %v2005_v1, %v2009_v2  ;;  %v5378_v12 = vcombine.high %v2006_v3, %v2010_v4 }
 0x1cc   :  { %1817 = vmatpush1.bf16.msra.mxu1 %v6210_v57  ;;  %v2013_v57 = vld [vmem:[#allocation11 + $0x40] sm:$0xff] }
 0x1cd   :  { %1923 = vmatpush1.bf16.msra.mxu0 %v6213_v8  ;;  %1818 = vmatprep.subr.bf16.mxu1 %v6218_v9  ;;  %v2017_v8 = vld [vmem:[#allocation11 + $0x60] sm:$0xff]  ;;  %v2014_v9 = vld [vmem:[#allocation11 + $0x48] sm:$0xff] }
 0x1ce   :  { %1924 = vmatprep.subr.bf16.mxu0 %v6221_v10  ;;  %v2018_v10 = vld [vmem:[#allocation11 + $0x68] sm:$0xff] }
 0x1d0   :  { %1819 = vmatpush1.bf16.msra.mxu1 %v6216_v11  ;;  %v5375_v11 = vcombine.low %v2005_v1, %v2009_v2  ;;  %v2066_v1 = vld [vmem:[#allocation11 + $0x1e8] sm:$0xff] }
 0x1d1   :  { %1925 = vmatpush1.bf16.msra.mxu0 %v6219_v14  ;;  %1820 = vmatprep.subr.bf16.mxu1 %v6224_v16  ;;  %v5377_v14 = vcombine.low %v2006_v3, %v2010_v4  ;;  %v5384_v16 = vcombine.high %v2013_v57, %v2017_v8 }
 0x1d2   :  { %1926 = vmatprep.subr.bf16.mxu0 %v6227_v55  ;;  %v5386_v55 = vcombine.high %v2014_v9, %v2018_v10 }
 0x1d4   :  { %1821 = vmatpush1.bf16.msra.mxu1 %v6222_v17  ;;  %v2021_v17 = vld [vmem:[#allocation11 + $0x80] sm:$0xff] }
 0x1d5   :  { %1927 = vmatpush1.bf16.msra.mxu0 %v6225_v18  ;;  %1822 = vmatprep.subr.bf16.mxu1 %v6230_v19  ;;  %v2025_v18 = vld [vmem:[#allocation11 + $0xa0] sm:$0xff]  ;;  %v2022_v19 = vld [vmem:[#allocation11 + $0x88] sm:$0xff] }
 0x1d6   :  { %1928 = vmatprep.subr.bf16.mxu0 %v6233_v15  ;;  %v2026_v15 = vld [vmem:[#allocation11 + $0xa8] sm:$0xff] }
 0x1d8   :  { %1823 = vmatpush1.bf16.msra.mxu1 %v6228_v20  ;;  %v5383_v20 = vcombine.low %v2013_v57, %v2017_v8  ;;  %v2074_v57 = vld [vmem:[#allocation11 + $0x228] sm:$0xff] }
 0x1d9   :  { %1929 = vmatpush1.bf16.msra.mxu0 %v6231_v21  ;;  %1824 = vmatprep.subr.bf16.mxu1 %v6236_v22  ;;  %v5385_v21 = vcombine.low %v2014_v9, %v2018_v10  ;;  %v5392_v22 = vcombine.high %v2021_v17, %v2025_v18 }
 0x1da   :  { %1930 = vmatprep.subr.bf16.mxu0 %v6239_v23  ;;  %v5394_v23 = vcombine.high %v2022_v19, %v2026_v15 }
 0x1dc   :  { %1825 = vmatpush1.bf16.msra.mxu1 %v6234_v24  ;;  %v2029_v24 = vld [vmem:[#allocation11 + $0xc0] sm:$0xff] }
 0x1dd   :  { %1931 = vmatpush1.bf16.msra.mxu0 %v6237_v25  ;;  %1826 = vmatprep.subr.bf16.mxu1 %v6242_v26  ;;  %v2033_v25 = vld [vmem:[#allocation11 + $0xe0] sm:$0xff]  ;;  %v2030_v26 = vld [vmem:[#allocation11 + $0xc8] sm:$0xff] }
 0x1de   :  { %1932 = vmatprep.subr.bf16.mxu0 %v6245_v27  ;;  %v2034_v27 = vld [vmem:[#allocation11 + $0xe8] sm:$0xff] }
 0x1e0   :  { %1827 = vmatpush1.bf16.msra.mxu1 %v6240_v28  ;;  %v5393_v28 = vcombine.low %v2022_v19, %v2026_v15 }
 0x1e1   :  { %1933 = vmatpush1.bf16.msra.mxu0 %v6243_v29  ;;  %1828 = vmatprep.subr.bf16.mxu1 %v6248_v30  ;;  %v5400_v29 = vcombine.high %v2029_v24, %v2033_v25  ;;  %v2037_v30 = vld [vmem:[#allocation11 + $0x100] sm:$0xff] }
 0x1e2   :  { %1934 = vmatprep.subr.bf16.mxu0 %v6251_v31  ;;  %v2041_v31 = vld [vmem:[#allocation11 + $0x120] sm:$0xff] }
 0x1e4   :  { %1829 = vmatpush1.bf16.msra.mxu1 %v6246_v32  ;;  %v2038_v32 = vld [vmem:[#allocation11 + $0x108] sm:$0xff] }
 0x1e5   :  { %1935 = vmatpush1.bf16.msra.mxu0 %v6249_v33  ;;  %1830 = vmatprep.subr.bf16.mxu1 %v6254_v34  ;;  %v2042_v33 = vld [vmem:[#allocation11 + $0x128] sm:$0xff]  ;;  %v5399_v34 = vcombine.low %v2029_v24, %v2033_v25 }
 0x1e6   :  { %1936 = vmatprep.subr.bf16.mxu0 %v6257_v35  ;;  %v5401_v35 = vcombine.low %v2030_v26, %v2034_v27  ;;  %v2090_v24 = vld [vmem:[#allocation11 + $0x2a8] sm:$0xff] }
 0x1e8   :  { %1831 = vmatpush1.bf16.msra.mxu1 %v6252_v36  ;;  %v5408_v36 = vcombine.high %v2037_v30, %v2041_v31 }
 0x1e9   :  { %1937 = vmatpush1.bf16.msra.mxu0 %v6255_v37  ;;  %1832 = vmatprep.subr.bf16.mxu1 %v6260_v38  ;;  %v5410_v37 = vcombine.high %v2038_v32, %v2042_v33  ;;  %v2045_v38 = vld [vmem:[#allocation11 + $0x140] sm:$0xff] }
 0x1ea   :  { %1938 = vmatprep.subr.bf16.mxu0 %v6263_v39  ;;  %v2049_v39 = vld [vmem:[#allocation11 + $0x160] sm:$0xff] }
 0x1ec   :  { %1833 = vmatpush1.bf16.msra.mxu1 %v6258_v40  ;;  %v2046_v40 = vld [vmem:[#allocation11 + $0x148] sm:$0xff] }
 0x1ed   :  { %1939 = vmatpush1.bf16.msra.mxu0 %v6261_v41  ;;  %1834 = vmatprep.subr.bf16.mxu1 %v6266_v45  ;;  %v2050_v41 = vld [vmem:[#allocation11 + $0x168] sm:$0xff]  ;;  %v5407_v45 = vcombine.low %v2037_v30, %v2041_v31 }
 0x1ee   :  { %1940 = vmatprep.subr.bf16.mxu0 %v6269_v52  ;;  %v5409_v52 = vcombine.low %v2038_v32, %v2042_v33  ;;  %v2098_v30 = vld [vmem:[#allocation11 + $0x2e8] sm:$0xff] }
 0x1f0   :  { %1835 = vmatpush1.bf16.msra.mxu1 %v6264_v48  ;;  %v5418_v48 = vcombine.high %v2046_v40, %v2050_v41 }
 0x1f1   :  { %1941 = vmatpush1.bf16.msra.mxu0 %v6267_v49  ;;  %1836 = vmatprep.subr.bf16.mxu1 %v6272_v53  ;;  %v2053_v49 = vld [vmem:[#allocation11 + $0x180] sm:$0xff] }
 0x1f2   :  { %1942 = vmatprep.subr.bf16.mxu0 %v6275_v54  ;;  %v2057_v53 = vld [vmem:[#allocation11 + $0x1a0] sm:$0xff]  ;;  %v2054_v54 = vld [vmem:[#allocation11 + $0x188] sm:$0xff] }
 0x1f3   :  { %v5423_v2 = vcombine.low %v2053_v49, %v2057_v53 }
 0x1f4   :  { %1837 = vmatpush1.bf16.msra.mxu1 %v6270_v51  ;;  %v2058_v51 = vld [vmem:[#allocation11 + $0x1a8] sm:$0xff] }
 0x1f5   :  { %1943 = vmatpush1.bf16.msra.mxu0 %v6273_v58  ;;  %1838 = vmatprep.subr.bf16.mxu1 %v6278_v59  ;;  %v5415_v58 = vcombine.low %v2045_v38, %v2049_v39  ;;  %v5417_v59 = vcombine.low %v2046_v40, %v2050_v41  ;;  %v5425_v3 = vcombine.low %v2054_v54, %v2058_v51 }
 0x1f6   :  { %1944 = vmatprep.subr.bf16.mxu0 %v6281_v60  ;;  %v5424_v60 = vcombine.high %v2053_v49, %v2057_v53  ;;  %v2114_v49 = vld [vmem:[#allocation11 + $0x368] sm:$0xff] }
 0x1f8   :  { %1839 = vmatpush1.bf16.msra.mxu1 %v6276_v61  ;;  %v5426_v61 = vcombine.high %v2054_v54, %v2058_v51 }
 0x1f9   :  { %1945 = vmatpush1.bf16.msra.mxu0 %v6279_v62  ;;  %1840 = vmatprep.subr.bf16.mxu1 %v6284_v63  ;;  %v2061_v62 = vld [vmem:[#allocation11 + $0x1c0] sm:$0xff] }
 0x1fa   :  { %1946 = vmatprep.subr.bf16.mxu0 %v6287_v0  ;;  %v2065_v63 = vld [vmem:[#allocation11 + $0x1e0] sm:$0xff]  ;;  %v2062_v0 = vld [vmem:[#allocation11 + $0x1c8] sm:$0xff] }
 0x1fb   :  { %v5432_v4 = vcombine.high %v2061_v62, %v2065_v63  ;;  %v5431_v8 = vcombine.low %v2061_v62, %v2065_v63  ;;  %v5433_v9 = vcombine.low %v2062_v0, %v2066_v1  ;;  %v2122_v62 = vld [vmem:[#allocation11 + $0x3a8] sm:$0xff] }
 0x1fc   :  { %1841 = vmatpush1.bf16.msra.mxu1 %v6282_v5  ;;  %v5434_v5 = vcombine.high %v2062_v0, %v2066_v1 }
 0x1fd   :  { %1947 = vmatpush1.bf16.msra.mxu0 %v6285_v6  ;;  %4351 = vmatprep.subr.bf16.mxu1 %v5376_v7  ;;  %v2069_v6 = vld [vmem:[#allocation11 + $0x200] sm:$0xff] }
 0x1fe   :  { %4510 = vmatprep.subr.bf16.mxu0 %v5378_v12  ;;  %v2073_v7 = vld [vmem:[#allocation11 + $0x220] sm:$0xff]  ;;  %v2070_v12 = vld [vmem:[#allocation11 + $0x208] sm:$0xff] }
 0x1ff   :  { %1843 = vmatmul.mubr.bf16.vlgmr.msra.gmra.mrb[16].mxu1 %v6642_v13  ;;  %v5440_v10 = vcombine.high %v2069_v6, %v2073_v7  ;;  %v5441_v19 = vcombine.low %v2070_v12, %v2074_v57 }
 0x200   :  { %1949 = vmatmul.mubr.bf16.vlgmr.msra.gmra.mrb[16].mxu0 %v6642_v13  ;;  %1852 = vmatprep.mubr.bf16.mxu1 %v6655_v50  ;;  %v5391_v13 = vcombine.low %v2021_v17, %v2025_v18  ;;  %v2082_v17 = vld [vmem:[#allocation11 + $0x268] sm:$0xff]  ;;  %v5439_v18 = vcombine.low %v2069_v6, %v2073_v7 }
 0x201   :  { %1958 = vmatprep.mubr.bf16.mxu0 %v6655_v50  ;;  %4352 = vmatpush1.bf16.msra.mxu1 %v5375_v11  ;;  %v5402_v50 = vcombine.high %v2030_v26, %v2034_v27  ;;  %v5442_v11 = vcombine.high %v2070_v12, %v2074_v57  ;;  %v2130_v6 = vld [vmem:[#allocation11 + $0x3e8] sm:$0xff] }
 0x202   :  { %4511 = vmatpush1.bf16.msra.mxu0 %v5377_v14  ;;  %4353 = vmatprep.subr.bf16.mxu1 %v5384_v16  ;;  %v2077_v14 = vld [vmem:[#allocation11 + $0x240] sm:$0xff] }
 0x203   :  { %4512 = vmatprep.subr.bf16.mxu0 %v5386_v55  ;;  %v2081_v16 = vld [vmem:[#allocation11 + $0x260] sm:$0xff]  ;;  %v2078_v55 = vld [vmem:[#allocation11 + $0x248] sm:$0xff] }
 0x204   :  { %v5448_v15 = vcombine.high %v2077_v14, %v2081_v16  ;;  %v5447_v25 = vcombine.low %v2077_v14, %v2081_v16  ;;  %v5449_v26 = vcombine.low %v2078_v55, %v2082_v17  ;;  %v6681_v14 = vld [vmem:[#allocation11 + $0x428] sm:$0xff] }
 0x205   :  { %4354 = vmatpush1.bf16.msra.mxu1 %v5383_v20  ;;  %v5450_v20 = vcombine.high %v2078_v55, %v2082_v17 }
 0x206   :  { %4513 = vmatpush1.bf16.msra.mxu0 %v5385_v21  ;;  %4355 = vmatprep.subr.bf16.mxu1 %v5392_v22  ;;  %v2085_v21 = vld [vmem:[#allocation11 + $0x280] sm:$0xff] }
 0x207   :  { %1853 = vmatmul.mubr.bf16.gmra.mrb[20].mxu1 %v6651_v56  ;;  %4514 = vmatprep.subr.bf16.mxu0 %v5394_v23  ;;  %v2089_v22 = vld [vmem:[#allocation11 + $0x2a0] sm:$0xff]  ;;  %v2086_v23 = vld [vmem:[#allocation11 + $0x288] sm:$0xff] }
 0x208   :  { %1959 = vmatmul.mubr.bf16.gmra.mrb[20].mxu0 %v6651_v56  ;;  %v5416_v56 = vcombine.high %v2045_v38, %v2049_v39  ;;  %v5456_v27 = vcombine.high %v2085_v21, %v2089_v22  ;;  %v5455_v31 = vcombine.low %v2085_v21, %v2089_v22  ;;  %v5457_v32 = vcombine.low %v2086_v23, %v2090_v24  ;;  %v2106_v38 = vld [vmem:[#allocation11 + $0x328] sm:$0xff] }
 0x209   :  { %4356 = vmatpush1.bf16.msra.mxu1 %v5391_v13  ;;  %v5458_v13 = vcombine.high %v2086_v23, %v2090_v24 }
 0x20a   :  { %4515 = vmatpush1.bf16.msra.mxu0 %v5393_v28  ;;  %4357 = vmatprep.subr.bf16.mxu1 %v5400_v29  ;;  %v2093_v28 = vld [vmem:[#allocation11 + $0x2c0] sm:$0xff] }
 0x20b   :  { %4516 = vmatprep.subr.bf16.mxu0 %v5402_v50  ;;  %v2097_v29 = vld [vmem:[#allocation11 + $0x2e0] sm:$0xff]  ;;  %v2094_v50 = vld [vmem:[#allocation11 + $0x2c8] sm:$0xff] }
 0x20c   :  { %v5464_v33 = vcombine.high %v2093_v28, %v2097_v29  ;;  %v5463_v39 = vcombine.low %v2093_v28, %v2097_v29  ;;  %v5465_v40 = vcombine.low %v2094_v50, %v2098_v30 }
 0x20d   :  { %4358 = vmatpush1.bf16.msra.mxu1 %v5399_v34  ;;  %v5466_v34 = vcombine.high %v2094_v50, %v2098_v30 }
 0x20e   :  { %4517 = vmatpush1.bf16.msra.mxu0 %v5401_v35  ;;  %4359 = vmatprep.subr.bf16.mxu1 %v5408_v36  ;;  %v2101_v35 = vld [vmem:[#allocation11 + $0x300] sm:$0xff] }
 0x20f   :  { %4518 = vmatprep.subr.bf16.mxu0 %v5410_v37  ;;  %v2105_v36 = vld [vmem:[#allocation11 + $0x320] sm:$0xff]  ;;  %v2102_v37 = vld [vmem:[#allocation11 + $0x308] sm:$0xff] }
 0x210   :  { %v5472_v41 = vcombine.high %v2101_v35, %v2105_v36  ;;  %v5471_v53 = vcombine.low %v2101_v35, %v2105_v36  ;;  %v5473_v54 = vcombine.low %v2102_v37, %v2106_v38  ;;  %v2141_v35 = vld [vmem:[#allocation11 + $0x440] sm:$0xff] }
 0x211   :  { %4360 = vmatpush1.bf16.msra.mxu1 %v5407_v45  ;;  %v5474_v45 = vcombine.high %v2102_v37, %v2106_v38 }
 0x212   :  { %4519 = vmatpush1.bf16.msra.mxu0 %v5409_v52  ;;  %4361 = vmatprep.subr.bf16.mxu1 %v5416_v56  ;;  %v2109_v52 = vld [vmem:[#allocation11 + $0x340] sm:$0xff] }
 0x213   :  { %4520 = vmatprep.subr.bf16.mxu0 %v5418_v48  ;;  %v2113_v56 = vld [vmem:[#allocation11 + $0x360] sm:$0xff]  ;;  %v2110_v48 = vld [vmem:[#allocation11 + $0x348] sm:$0xff] }
 0x214   :  { %v5480_v51 = vcombine.high %v2109_v52, %v2113_v56  ;;  %v5479_v63 = vcombine.low %v2109_v52, %v2113_v56  ;;  %v5481_v0 = vcombine.low %v2110_v48, %v2114_v49 }
 0x215   :  { %4362 = vmatpush1.bf16.msra.mxu1 %v5415_v58  ;;  %v5482_v58 = vcombine.high %v2110_v48, %v2114_v49  ;;  %v6693_v48 = vld [vmem:[#allocation11 + $0x800] sm:$0xff] }
 0x216   :  { %4521 = vmatpush1.bf16.msra.mxu0 %v5417_v59  ;;  %4363 = vmatprep.subr.bf16.mxu1 %v5424_v60  ;;  %v2117_v59 = vld [vmem:[#allocation11 + $0x380] sm:$0xff] }
 0x217   :  { %4522 = vmatprep.subr.bf16.mxu0 %v5426_v61  ;;  %v2121_v60 = vld [vmem:[#allocation11 + $0x3a0] sm:$0xff]  ;;  %v2118_v61 = vld [vmem:[#allocation11 + $0x388] sm:$0xff] }
 0x218   :  { %v5488_v1 = vcombine.high %v2117_v59, %v2121_v60  ;;  %v5487_v7 = vcombine.low %v2117_v59, %v2121_v60  ;;  %v5489_v12 = vcombine.low %v2118_v61, %v2122_v62  ;;  %v6695_v49 = vld [vmem:[#allocation11 + $0x820] sm:$0xff] }
 0x219   :  { %4364 = vmatpush1.bf16.msra.mxu1 %v5423_v2  ;;  %v5490_v2 = vcombine.high %v2118_v61, %v2122_v62  ;;  %v6705_v62 = vld [vmem:[#allocation11 + $0x828] sm:$0xff] }
 0x21a   :  { %4523 = vmatpush1.bf16.msra.mxu0 %v5425_v3  ;;  %4365 = vmatprep.subr.bf16.mxu1 %v5432_v4  ;;  %v2125_v3 = vld [vmem:[#allocation11 + $0x3c0] sm:$0xff] }
 0x21b   :  { %4524 = vmatprep.subr.bf16.mxu0 %v5434_v5  ;;  %v2129_v4 = vld [vmem:[#allocation11 + $0x3e0] sm:$0xff]  ;;  %v2126_v5 = vld [vmem:[#allocation11 + $0x3c8] sm:$0xff] }
 0x21c   :  { %v5496_v57 = vcombine.high %v2125_v3, %v2129_v4  ;;  %v5495_v16 = vcombine.low %v2125_v3, %v2129_v4  ;;  %v5497_v55 = vcombine.low %v2126_v5, %v2130_v6  ;;  %v5631_v3 = vcombine.low %v6693_v48, %v6695_v49 }
 0x21d   :  { %4366 = vmatpush1.bf16.msra.mxu1 %v5431_v8  ;;  %v5498_v8 = vcombine.high %v2126_v5, %v2130_v6 }
 0x21e   :  { %4525 = vmatpush1.bf16.msra.mxu0 %v5433_v9  ;;  %4367 = vmatprep.subr.bf16.mxu1 %v5440_v10  ;;  %v6675_v9 = vld [vmem:[#allocation11 + $0x400] sm:$0xff] }
 0x21f   :  { %4526 = vmatprep.subr.bf16.mxu0 %v5442_v11  ;;  %v6677_v10 = vld [vmem:[#allocation11 + $0x420] sm:$0xff]  ;;  %v6679_v11 = vld [vmem:[#allocation11 + $0x408] sm:$0xff] }
 0x220   :  { %v5504_v17 = vcombine.high %v6675_v9, %v6677_v10  ;;  %v5503_v60 = vcombine.low %v6675_v9, %v6677_v10  ;;  %v5505_v61 = vcombine.low %v6679_v11, %v6681_v14  ;;  %v2149_v9 = vld [vmem:[#allocation11 + $0x480] sm:$0xff] }
 0x221   :  { %4368 = vmatpush1.bf16.msra.mxu1 %v5439_v18  ;;  %v5506_v18 = vcombine.high %v6679_v11, %v6681_v14  ;;  %v2153_v14 = vld [vmem:[#allocation11 + $0x4a0] sm:$0xff] }
 0x222   :  { %4527 = vmatpush1.bf16.msra.mxu0 %v5441_v19  ;;  %4369 = vmatprep.subr.bf16.mxu1 %v5448_v15  ;;  %v6687_v19 = vld [vmem:[#allocation10] sm:$0x3f] }
 0x223   :  { %4528 = vmatprep.subr.bf16.mxu0 %v5450_v20  ;;  %v664_v15 = vrot.slane %v6687_v19, %v6625_v43  ;;  %v668_v20 = vrot.slane %v6687_v19, %v6631_v46 }
 0x225   :  { %4370 = vmatpush1.bf16.msra.mxu1 %v5447_v25 }
 0x226   :  { %4529 = vmatpush1.bf16.msra.mxu0 %v5449_v26  ;;  %4371 = vmatprep.subr.bf16.mxu1 %v5456_v27 }
 0x227   :  { %4530 = vmatprep.subr.bf16.mxu0 %v5458_v13 }
 0x229   :  { %4372 = vmatpush1.bf16.msra.mxu1 %v5455_v31 }
 0x22a   :  { %4531 = vmatpush1.bf16.msra.mxu0 %v5457_v32  ;;  %4373 = vmatprep.subr.bf16.mxu1 %v5464_v33 }
 0x22b   :  { %4532 = vmatprep.subr.bf16.mxu0 %v5466_v34 }
 0x22d   :  { %4374 = vmatpush1.bf16.msra.mxu1 %v5463_v39  ;;  %v2145_v39 = vld [vmem:[#allocation11 + $0x460] sm:$0xff] }
 0x22e   :  { %4533 = vmatpush1.bf16.msra.mxu0 %v5465_v40  ;;  %4375 = vmatprep.subr.bf16.mxu1 %v5472_v41  ;;  %v2142_v40 = vld [vmem:[#allocation11 + $0x448] sm:$0xff] }
 0x22f   :  { %4534 = vmatprep.subr.bf16.mxu0 %v5474_v45  ;;  %v2146_v41 = vld [vmem:[#allocation11 + $0x468] sm:$0xff] }
 0x231   :  { %4376 = vmatpush1.bf16.msra.mxu1 %v5471_v53  ;;  %v6697_v53 = vld [vmem:[#allocation11 + $0x808] sm:$0xff] }
 0x232   :  { %4535 = vmatpush1.bf16.msra.mxu0 %v5473_v54  ;;  %4377 = vmatprep.subr.bf16.mxu1 %v5480_v51  ;;  %v5633_v4 = vcombine.low %v6697_v53, %v6705_v62 }
 0x233   :  { %4536 = vmatprep.subr.bf16.mxu0 %v5482_v58 }
 0x235   :  { %4378 = vmatpush1.bf16.msra.mxu1 %v5479_v63 }
 0x236   :  { %4537 = vmatpush1.bf16.msra.mxu0 %v5481_v0  ;;  %4379 = vmatprep.subr.bf16.mxu1 %v5488_v1 }
 0x237   :  { %4538 = vmatprep.subr.bf16.mxu0 %v5490_v2 }
 0x239   :  { %4380 = vmatpush1.bf16.msra.mxu1 %v5487_v7 }
 0x23a   :  { %4539 = vmatpush1.bf16.msra.mxu0 %v5489_v12  ;;  %4381 = vmatprep.subr.bf16.mxu1 %v5496_v57  ;;  %v5512_v57 = vcombine.high %v2141_v35, %v2145_v39 }
 0x23b   :  { %4540 = vmatprep.subr.bf16.mxu0 %v5498_v8  ;;  %v5514_v8 = vcombine.high %v2142_v40, %v2146_v41 }
 0x23d   :  { %4382 = vmatpush1.bf16.msra.mxu1 %v5495_v16  ;;  %v2150_v16 = vld [vmem:[#allocation11 + $0x488] sm:$0xff] }
 0x23e   :  { %4541 = vmatpush1.bf16.msra.mxu0 %v5497_v55  ;;  %4404 = vmatprep.subr.bf16.mxu1 %v5504_v17  ;;  %v2154_v55 = vld [vmem:[#allocation11 + $0x4a8] sm:$0xff] }
 0x23f   :  { %4563 = vmatprep.subr.bf16.mxu0 %v5506_v18 }
 0x252   :  { %v1685_v21 = vpop.f32.mrb[8].mxu1  ;;  %v1738_v22 = vpop.f32.mrb[8].mxu0 }
 0x253   :  { %v1686_v23 = vadd.f32 %v1685_v21, %v664_v15  ;;  %v1687_v24 = vpop.f32.mrb[9].mxu1  ;;  %v1740_v25 = vpop.f32.mrb[9].mxu0 }
 0x254   :  { %v1688_v26 = vadd.f32 %v1687_v24, %v668_v20  ;;  %v1689_v27 = vpop.f32.mrb[10].mxu1  ;;  %v1742_v13 = vpop.f32.mrb[10].mxu0 }
 0x255   :  { %v1690_v28 = vadd.f32 %v1689_v27, %v664_v15  ;;  %v1739_v29 = vadd.f32 %v1738_v22, %v1686_v23  ;;  %v1691_v50 = vpop.f32.mrb[11].mxu1  ;;  %v1744_v30 = vpop.f32.mrb[11].mxu0  ;;  %v5511_v22 = vcombine.low %v2141_v35, %v2145_v39  ;;  %v5513_v23 = vcombine.low %v2142_v40, %v2146_v41  ;;  %v2165_v35 = vld [vmem:[#allocation11 + $0x500] sm:$0xff] }
 0x256   :  { %v1692_v31 = vadd.f32 %v1691_v50, %v668_v20  ;;  %v1741_v32 = vadd.f32 %v1740_v25, %v1688_v26  ;;  %v5522_v25 = vcombine.high %v2150_v16, %v2154_v55  ;;  %v2157_v26 = vld [vmem:[#allocation11 + $0x4c0] sm:$0xff] }
 0x257   :  { %v1743_v33 = vadd.f32 %v1742_v13, %v1690_v28  ;;  %v1969_v36 = vmax.f32 %v1739_v29, 0.0  ;;  %v2161_v13 = vld [vmem:[#allocation11 + $0x4e0] sm:$0xff]  ;;  %v2158_v28 = vld [vmem:[#allocation11 + $0x4c8] sm:$0xff] }
 0x258   :  { %v1745_v34 = vadd.f32 %v1744_v30, %v1692_v31  ;;  %v1970_v37 = vmax.f32 %v1741_v32, 0.0  ;;  %v2162_v29 = vld [vmem:[#allocation11 + $0x4e8] sm:$0xff]  ;;  %v5519_v31 = vcombine.low %v2149_v9, %v2153_v14  ;;  %v5521_v32 = vcombine.low %v2150_v16, %v2154_v55 }
 0x259   :  { %v1975_v38 = vmax.f32 %v1743_v33, 0.0  ;;  %v5528_v33 = vcombine.high %v2157_v26, %v2161_v13  ;;  %v5527_v39 = vcombine.low %v2157_v26, %v2161_v13  ;;  %v5529_v40 = vcombine.low %v2158_v28, %v2162_v29  ;;  %v2209_v13 = vld [vmem:[#allocation11 + $0x660] sm:$0xff] }
 0x25a   :  { %v1976_v45 = vmax.f32 %v1745_v34, 0.0  ;;  %v1695_v52 = vpop.f32.mrb[12].mxu1  ;;  %v1748_v56 = vpop.f32.mrb[12].mxu0  ;;  %v5530_v34 = vcombine.high %v2158_v28, %v2162_v29  ;;  %v2206_v28 = vld [vmem:[#allocation11 + $0x648] sm:$0xff] }
 0x25b   :  { %v6699_v54 = vpack.c.bf16 %v1975_v38, %v1969_v36  ;;  %v1696_v51 = vadd.f32 %v1695_v52, %v664_v15  ;;  %v1697_v58 = vpop.f32.mrb[13].mxu1  ;;  %v1750_v59 = vpop.f32.mrb[13].mxu0  ;;  %v2169_v36 = vld [vmem:[#allocation11 + $0x520] sm:$0xff]  ;;  %v2170_v38 = vld [vmem:[#allocation11 + $0x528] sm:$0xff] }
 0x25c   :  { %v6707_v63 = vpack.c.bf16 %v1976_v45, %v1970_v37  ;;  %v1698_v0 = vadd.f32 %v1697_v58, %v668_v20  ;;  %v1699_v1 = vpop.f32.mrb[14].mxu1  ;;  %v1752_v2 = vpop.f32.mrb[14].mxu0  ;;  %v2166_v37 = vld [vmem:[#allocation11 + $0x508] sm:$0xff]  ;;  %v5536_v41 = vcombine.high %v2165_v35, %v2169_v36  ;;  %v2173_v52 = vld [vmem:[#allocation11 + $0x540] sm:$0xff] }
 0x25d   :  { %v1700_v5 = vadd.f32 %v1699_v1, %v664_v15  ;;  %v1749_v6 = vadd.f32 %v1748_v56, %v1696_v51  ;;  %v1701_v7 = vpop.f32.mrb[15].mxu1  ;;  %v1754_v12 = vpop.f32.mrb[15].mxu0  ;;  %v5538_v45 = vcombine.high %v2166_v37, %v2170_v38  ;;  %v2177_v56 = vld [vmem:[#allocation11 + $0x560] sm:$0xff]  ;;  %v2174_v51 = vld [vmem:[#allocation11 + $0x548] sm:$0xff] }
 0x25e   :  { %4383 = vmatprep.mubr.bf16.mxu1 %v6707_v63  ;;  %4542 = vmatprep.mubr.bf16.mxu0 %v6707_v63  ;;  %v1702_v10 = vadd.f32 %v1701_v7, %v668_v20  ;;  %v1751_v11 = vadd.f32 %v1750_v59, %v1698_v0  ;;  %v5520_v20 = vcombine.high %v2149_v9, %v2153_v14  ;;  %v2178_v58 = vld [vmem:[#allocation11 + $0x568] sm:$0xff]  ;;  %v2181_v1 = vld [vmem:[#allocation11 + $0x580] sm:$0xff] }
 0x25f   :  { %4384 = vmatmul.mubr.bf16.vlgmr.msra.gmra.mrb[24].mxu1 %v6699_v54  ;;  %4543 = vmatmul.mubr.bf16.vlgmr.msra.gmra.mrb[24].mxu0 %v6699_v54  ;;  %v1981_v17 = vmax.f32 %v1749_v6, 0.0  ;;  %v1753_v18 = vadd.f32 %v1752_v2, %v1700_v5  ;;  %v5535_v59 = vcombine.low %v2165_v35, %v2169_v36  ;;  %v5546_v0 = vcombine.high %v2174_v51, %v2178_v58  ;;  %v2185_v2 = vld [vmem:[#allocation11 + $0x5a0] sm:$0xff]  ;;  %v2182_v5 = vld [vmem:[#allocation11 + $0x588] sm:$0xff] }
 0x260   :  { %v1982_v15 = vmax.f32 %v1751_v11, 0.0  ;;  %v1755_v21 = vadd.f32 %v1754_v12, %v1702_v10  ;;  %4405 = vmatpush1.bf16.msra.mxu1 %v5503_v60  ;;  %4564 = vmatpush1.bf16.msra.mxu0 %v5505_v61  ;;  %v5537_v60 = vcombine.low %v2166_v37, %v2170_v38  ;;  %v5544_v61 = vcombine.high %v2173_v52, %v2177_v56  ;;  %v2186_v6 = vld [vmem:[#allocation11 + $0x5a8] sm:$0xff]  ;;  %v2189_v9 = vld [vmem:[#allocation11 + $0x5c0] sm:$0xff] }
 0x261   :  { %v1987_v24 = vmax.f32 %v1753_v18, 0.0  ;;  %4406 = vmatprep.subr.bf16.mxu1 %v5512_v57  ;;  %4565 = vmatprep.subr.bf16.mxu0 %v5514_v8  ;;  %v5543_v7 = vcombine.low %v2173_v52, %v2177_v56  ;;  %v5545_v12 = vcombine.low %v2174_v51, %v2178_v58  ;;  %v5552_v57 = vcombine.high %v2181_v1, %v2185_v2  ;;  %v2193_v10 = vld [vmem:[#allocation11 + $0x5e0] sm:$0xff]  ;;  %v2190_v11 = vld [vmem:[#allocation11 + $0x5c8] sm:$0xff] }
 0x262   :  { %v1988_v27 = vmax.f32 %v1755_v21, 0.0  ;;  %v5554_v8 = vcombine.high %v2182_v5, %v2186_v6  ;;  %v2194_v14 = vld [vmem:[#allocation11 + $0x5e8] sm:$0xff]  ;;  %v5551_v16 = vcombine.low %v2181_v1, %v2185_v2  ;;  %v5553_v55 = vcombine.low %v2182_v5, %v2186_v6  ;;  %v2201_v21 = vld [vmem:[#allocation11 + $0x620] sm:$0xff] }
 0x263   :  { %v6717_v50 = vpack.c.bf16 %v1987_v24, %v1981_v17  ;;  %v5560_v17 = vcombine.high %v2189_v9, %v2193_v10  ;;  %v5562_v18 = vcombine.high %v2190_v11, %v2194_v14  ;;  %v5559_v24 = vcombine.low %v2189_v9, %v2193_v10  ;;  %v2210_v29 = vld [vmem:[#allocation11 + $0x668] sm:$0xff]  ;;  %v2213_v35 = vld [vmem:[#allocation11 + $0x680] sm:$0xff] }
 0x264   :  { %v6719_v30 = vpack.c.bf16 %v1988_v27, %v1982_v15  ;;  %4407 = vmatpush1.bf16.msra.mxu1 %v5511_v22  ;;  %4566 = vmatpush1.bf16.msra.mxu0 %v5513_v23  ;;  %v2197_v15 = vld [vmem:[#allocation11 + $0x600] sm:$0xff]  ;;  %v2198_v22 = vld [vmem:[#allocation11 + $0x608] sm:$0xff] }
 0x265   :  { %4408 = vmatprep.subr.bf16.mxu1 %v5520_v20  ;;  %4567 = vmatprep.subr.bf16.mxu0 %v5522_v25  ;;  %v2202_v23 = vld [vmem:[#allocation11 + $0x628] sm:$0xff]  ;;  %v5561_v20 = vcombine.low %v2190_v11, %v2194_v14  ;;  %v5568_v25 = vcombine.high %v2197_v15, %v2201_v21  ;;  %v2205_v27 = vld [vmem:[#allocation11 + $0x640] sm:$0xff] }
 0x266   :  { %4393 = vmatprep.mubr.bf16.mxu1 %v6719_v30  ;;  %4552 = vmatprep.mubr.bf16.mxu0 %v6719_v30  ;;  %v5570_v26 = vcombine.high %v2198_v22, %v2202_v23  ;;  %v2217_v36 = vld [vmem:[#allocation11 + $0x6a0] sm:$0xff]  ;;  %v2214_v37 = vld [vmem:[#allocation11 + $0x688] sm:$0xff] }
 0x267   :  { %4394 = vmatmul.mubr.bf16.gmra.mrb[28].mxu1 %v6717_v50  ;;  %4553 = vmatmul.mubr.bf16.gmra.mrb[28].mxu0 %v6717_v50  ;;  %v2218_v38 = vld [vmem:[#allocation11 + $0x6a8] sm:$0xff]  ;;  %v2221_v52 = vld [vmem:[#allocation11 + $0x6c0] sm:$0xff] }
 0x268   :  { %4409 = vmatpush1.bf16.msra.mxu1 %v5519_v31  ;;  %4568 = vmatpush1.bf16.msra.mxu0 %v5521_v32  ;;  %v5567_v31 = vcombine.low %v2197_v15, %v2201_v21  ;;  %v5569_v32 = vcombine.low %v2198_v22, %v2202_v23  ;;  %v2225_v56 = vld [vmem:[#allocation11 + $0x6e0] sm:$0xff]  ;;  %v2222_v51 = vld [vmem:[#allocation11 + $0x6c8] sm:$0xff] }
 0x269   :  { %4410 = vmatprep.subr.bf16.mxu1 %v5528_v33  ;;  %4569 = vmatprep.subr.bf16.mxu0 %v5530_v34  ;;  %v5576_v33 = vcombine.high %v2205_v27, %v2209_v13  ;;  %v5578_v34 = vcombine.high %v2206_v28, %v2210_v29  ;;  %v2226_v58 = vld [vmem:[#allocation11 + $0x6e8] sm:$0xff]  ;;  %v2229_v1 = vld [vmem:[#allocation11 + $0x700] sm:$0xff] }
 0x26a   :  { %v2233_v2 = vld [vmem:[#allocation11 + $0x720] sm:$0xff]  ;;  %v2230_v5 = vld [vmem:[#allocation11 + $0x708] sm:$0xff] }
 0x26b   :  { %v2234_v6 = vld [vmem:[#allocation11 + $0x728] sm:$0xff]  ;;  %v2237_v9 = vld [vmem:[#allocation11 + $0x740] sm:$0xff] }
 0x26c   :  { %4411 = vmatpush1.bf16.msra.mxu1 %v5527_v39  ;;  %4570 = vmatpush1.bf16.msra.mxu0 %v5529_v40  ;;  %v5575_v39 = vcombine.low %v2205_v27, %v2209_v13  ;;  %v5577_v40 = vcombine.low %v2206_v28, %v2210_v29  ;;  %v2241_v10 = vld [vmem:[#allocation11 + $0x760] sm:$0xff]  ;;  %v2238_v11 = vld [vmem:[#allocation11 + $0x748] sm:$0xff] }
 0x26d   :  { %4412 = vmatprep.subr.bf16.mxu1 %v5536_v41  ;;  %4571 = vmatprep.subr.bf16.mxu0 %v5538_v45  ;;  %v5584_v41 = vcombine.high %v2213_v35, %v2217_v36  ;;  %v5586_v45 = vcombine.high %v2214_v37, %v2218_v38  ;;  %v2242_v14 = vld [vmem:[#allocation11 + $0x768] sm:$0xff]  ;;  %v2245_v15 = vld [vmem:[#allocation11 + $0x780] sm:$0xff] }
 0x26e   :  { %v2249_v21 = vld [vmem:[#allocation11 + $0x7a0] sm:$0xff]  ;;  %v2246_v22 = vld [vmem:[#allocation11 + $0x788] sm:$0xff] }
 0x26f   :  { %v2250_v23 = vld [vmem:[#allocation11 + $0x7a8] sm:$0xff]  ;;  %v2253_v27 = vld [vmem:[#allocation11 + $0x7c0] sm:$0xff] }
 0x270   :  { %4413 = vmatpush1.bf16.msra.mxu1 %v5535_v59  ;;  %4572 = vmatpush1.bf16.msra.mxu0 %v5537_v60  ;;  %v5583_v59 = vcombine.low %v2213_v35, %v2217_v36  ;;  %v5585_v60 = vcombine.low %v2214_v37, %v2218_v38  ;;  %v2257_v13 = vld [vmem:[#allocation11 + $0x7e0] sm:$0xff]  ;;  %v2254_v28 = vld [vmem:[#allocation11 + $0x7c8] sm:$0xff]  ;;  %v5632_v37 = vcombine.high %v6693_v48, %v6695_v49 }
 0x271   :  { %4414 = vmatprep.subr.bf16.mxu1 %v5544_v61  ;;  %4573 = vmatprep.subr.bf16.mxu0 %v5546_v0  ;;  %v5592_v61 = vcombine.high %v2221_v52, %v2225_v56  ;;  %v5594_v0 = vcombine.high %v2222_v51, %v2226_v58  ;;  %v2258_v29 = vld [vmem:[#allocation11 + $0x7e8] sm:$0xff]  ;;  %v5623_v35 = vcombine.low %v2253_v27, %v2257_v13 }
 0x272   :  { %v5625_v36 = vcombine.low %v2254_v28, %v2258_v29  ;;  %v5634_v38 = vcombine.high %v6697_v53, %v6705_v62  ;;  %v2289_v53 = vld [vmem:[#allocation11 + $0x8e0] sm:$0xff]  ;;  %v2286_v62 = vld [vmem:[#allocation11 + $0x8c8] sm:$0xff] }
 0x274   :  { %4415 = vmatpush1.bf16.msra.mxu1 %v5543_v7  ;;  %4574 = vmatpush1.bf16.msra.mxu0 %v5545_v12  ;;  %v5591_v7 = vcombine.low %v2221_v52, %v2225_v56  ;;  %v5593_v12 = vcombine.low %v2222_v51, %v2226_v58  ;;  %v676_v52 = vrot.slane %v6687_v19, %v6634_v47 }
 0x275   :  { %4416 = vmatprep.subr.bf16.mxu1 %v5552_v57  ;;  %4575 = vmatprep.subr.bf16.mxu0 %v5554_v8  ;;  %v5600_v57 = vcombine.high %v2229_v1, %v2233_v2  ;;  %v5602_v8 = vcombine.high %v2230_v5, %v2234_v6 }
 0x278   :  { %4417 = vmatpush1.bf16.msra.mxu1 %v5551_v16  ;;  %4576 = vmatpush1.bf16.msra.mxu0 %v5553_v55  ;;  %v5599_v16 = vcombine.low %v2229_v1, %v2233_v2  ;;  %v5601_v55 = vcombine.low %v2230_v5, %v2234_v6 }
 0x279   :  { %4418 = vmatprep.subr.bf16.mxu1 %v5560_v17  ;;  %4577 = vmatprep.subr.bf16.mxu0 %v5562_v18  ;;  %v5608_v17 = vcombine.high %v2237_v9, %v2241_v10  ;;  %v5610_v18 = vcombine.high %v2238_v11, %v2242_v14 }
 0x27c   :  { %4419 = vmatpush1.bf16.msra.mxu1 %v5559_v24  ;;  %4578 = vmatpush1.bf16.msra.mxu0 %v5561_v20  ;;  %v5607_v24 = vcombine.low %v2237_v9, %v2241_v10  ;;  %v5609_v20 = vcombine.low %v2238_v11, %v2242_v14  ;;  %v6745_v14 = vld [vmem:[#allocation11 + $0x840] sm:$0xff] }
 0x27d   :  { %4420 = vmatprep.subr.bf16.mxu1 %v5568_v25  ;;  %4579 = vmatprep.subr.bf16.mxu0 %v5570_v26  ;;  %v5616_v25 = vcombine.high %v2245_v15, %v2249_v21  ;;  %v5618_v26 = vcombine.high %v2246_v22, %v2250_v23 }
 0x280   :  { %4421 = vmatpush1.bf16.msra.mxu1 %v5567_v31  ;;  %4580 = vmatpush1.bf16.msra.mxu0 %v5569_v32  ;;  %v5615_v31 = vcombine.low %v2245_v15, %v2249_v21  ;;  %v5617_v32 = vcombine.low %v2246_v22, %v2250_v23  ;;  %v2270_v21 = vld [vmem:[#allocation11 + $0x848] sm:$0xff] }
 0x281   :  { %4422 = vmatprep.subr.bf16.mxu1 %v5576_v33  ;;  %4581 = vmatprep.subr.bf16.mxu0 %v5578_v34  ;;  %v5624_v33 = vcombine.high %v2253_v27, %v2257_v13  ;;  %v5626_v34 = vcombine.high %v2254_v28, %v2258_v29  ;;  %v2274_v22 = vld [vmem:[#allocation11 + $0x868] sm:$0xff] }
 0x284   :  { %4423 = vmatpush1.bf16.msra.mxu1 %v5575_v39  ;;  %4582 = vmatpush1.bf16.msra.mxu0 %v5577_v40  ;;  %v679_v39 = vsub.s32 4, %v6622_v42  ;;  %v683_v40 = vsub.s32 5, %v6622_v42 }
 0x285   :  { %4424 = vmatprep.subr.bf16.mxu1 %v5584_v41  ;;  %4583 = vmatprep.subr.bf16.mxu0 %v5586_v45  ;;  %v672_v41 = vrot.slane %v6687_v19, %v6628_v44 }
 0x286   :  { %v680_v45 = vrot.slane %v6687_v19, %v679_v39  ;;  %v6741_v56 = vrot.slane %v6687_v19, %v683_v40 }
 0x288   :  { %4425 = vmatpush1.bf16.msra.mxu1 %v5583_v59  ;;  %4584 = vmatpush1.bf16.msra.mxu0 %v5585_v60 }
 0x289   :  { %4426 = vmatprep.subr.bf16.mxu1 %v5592_v61  ;;  %4585 = vmatprep.subr.bf16.mxu0 %v5594_v0 }
 0x28c   :  { %4427 = vmatpush1.bf16.msra.mxu1 %v5591_v7  ;;  %4586 = vmatpush1.bf16.msra.mxu0 %v5593_v12 }
 0x28d   :  { %4428 = vmatprep.subr.bf16.mxu1 %v5600_v57  ;;  %4587 = vmatprep.subr.bf16.mxu0 %v5602_v8 }
 0x290   :  { %4429 = vmatpush1.bf16.msra.mxu1 %v5599_v16  ;;  %4588 = vmatpush1.bf16.msra.mxu0 %v5601_v55  ;;  %v6747_v16 = vld [vmem:[#allocation11 + $0x860] sm:$0xff] }
 0x291   :  { %4430 = vmatprep.subr.bf16.mxu1 %v5608_v17  ;;  %4589 = vmatprep.subr.bf16.mxu0 %v5610_v18 }
 0x294   :  { %4431 = vmatpush1.bf16.msra.mxu1 %v5607_v24  ;;  %4590 = vmatpush1.bf16.msra.mxu0 %v5609_v20 }
 0x295   :  { %4432 = vmatprep.subr.bf16.mxu1 %v5616_v25  ;;  %4591 = vmatprep.subr.bf16.mxu0 %v5618_v26 }
 0x298   :  { %4433 = vmatpush1.bf16.msra.mxu1 %v5615_v31  ;;  %4592 = vmatpush1.bf16.msra.mxu0 %v5617_v32  ;;  %v5640_v32 = vcombine.high %v6745_v14, %v6747_v16 }
 0x299   :  { %4434 = vmatprep.subr.bf16.mxu1 %v5624_v33  ;;  %4593 = vmatprep.subr.bf16.mxu0 %v5626_v34  ;;  %v5642_v33 = vcombine.high %v2270_v21, %v2274_v22  ;;  %v2277_v34 = vld [vmem:[#allocation11 + $0x880] sm:$0xff] }
 0x29c   :  { %4435 = vmatpush1.bf16.msra.mxu1 %v5623_v35  ;;  %4594 = vmatpush1.bf16.msra.mxu0 %v5625_v36  ;;  %v2281_v35 = vld [vmem:[#allocation11 + $0x8a0] sm:$0xff] }
 0x29d   :  { %4457 = vmatprep.subr.bf16.mxu1 %v5632_v37  ;;  %4616 = vmatprep.subr.bf16.mxu0 %v5634_v38 }
 0x2d2   :  { %v1844_v51 = vpop.f32.mrb[16].mxu1 }
 0x2d3   :  { %v5807_v58 = vadd.f32 %v1844_v51, %v672_v41  ;;  %v1950_v59 = vpop.f32.mrb[16].mxu0  ;;  %v1846_v60 = vpop.f32.mrb[17].mxu1 }
 0x2d4   :  { %v5815_v61 = vadd.f32 %v1950_v59, %v680_v45  ;;  %v5808_v0 = vadd.f32 %v1846_v60, %v676_v52  ;;  %v1952_v1 = vpop.f32.mrb[17].mxu0  ;;  %v1848_v2 = vpop.f32.mrb[18].mxu1  ;;  %v2278_v59 = vld [vmem:[#allocation11 + $0x888] sm:$0xff] }
 0x2d5   :  { %v5816_v5 = vadd.f32 %v1952_v1, %v6741_v56  ;;  %v5809_v6 = vadd.f32 %v1848_v2, %v672_v41  ;;  %v1954_v7 = vpop.f32.mrb[18].mxu0  ;;  %v1850_v12 = vpop.f32.mrb[19].mxu1  ;;  %v1971_v10 = vmax.f32 %v5807_v58, 0.0  ;;  %v5639_v58 = vcombine.low %v6745_v14, %v6747_v16  ;;  %v2282_v60 = vld [vmem:[#allocation11 + $0x8a8] sm:$0xff]  ;;  %v2285_v14 = vld [vmem:[#allocation11 + $0x8c0] sm:$0xff] }
 0x2d6   :  { %v5817_v57 = vadd.f32 %v1954_v7, %v680_v45  ;;  %v5810_v8 = vadd.f32 %v1850_v12, %v676_v52  ;;  %v1956_v9 = vpop.f32.mrb[19].mxu0  ;;  %v1973_v55 = vmax.f32 %v5815_v61, 0.0  ;;  %v1972_v17 = vmax.f32 %v5808_v0, 0.0 }
 0x2d7   :  { %v1977_v11 = vmax.f32 %v5809_v6, 0.0  ;;  %v5818_v19 = vadd.f32 %v1956_v9, %v6741_v56  ;;  %v1974_v23 = vmax.f32 %v5816_v5, 0.0  ;;  %v5641_v5 = vcombine.low %v2270_v21, %v2274_v22 }
 0x2d8   :  { %v1979_v18 = vmax.f32 %v5817_v57, 0.0  ;;  %v1978_v15 = vmax.f32 %v5810_v8, 0.0  ;;  %v5648_v57 = vcombine.high %v2277_v34, %v2281_v35  ;;  %v5656_v21 = vcombine.high %v2285_v14, %v2289_v53 }
 0x2d9   :  { %v6749_v24 = vpack.c.bf16 %v1977_v11, %v1971_v10  ;;  %v1980_v20 = vmax.f32 %v5818_v19, 0.0  ;;  %v5650_v10 = vcombine.high %v2278_v59, %v2282_v60 }
 0x2da   :  { %v6751_v25 = vpack.c.bf16 %v1979_v18, %v1973_v55  ;;  %v6753_v26 = vpack.c.bf16 %v1978_v15, %v1972_v17  ;;  %v1854_v27 = vpop.f32.mrb[20].mxu1  ;;  %v2293_v15 = vld [vmem:[#allocation11 + $0x900] sm:$0xff] }
 0x2db   :  { %v6755_v13 = vpack.c.bf16 %v1980_v20, %v1974_v23  ;;  %v5811_v28 = vadd.f32 %v1854_v27, %v672_v41  ;;  %v1960_v29 = vpop.f32.mrb[20].mxu0  ;;  %v1856_v31 = vpop.f32.mrb[21].mxu1  ;;  %v2297_v23 = vld [vmem:[#allocation11 + $0x920] sm:$0xff]  ;;  %v2294_v20 = vld [vmem:[#allocation11 + $0x908] sm:$0xff] }
 0x2dc   :  { %v5819_v36 = vadd.f32 %v1960_v29, %v680_v45  ;;  %v5812_v37 = vadd.f32 %v1856_v31, %v676_v52  ;;  %v1962_v38 = vpop.f32.mrb[21].mxu0  ;;  %v1858_v51 = vpop.f32.mrb[22].mxu1  ;;  %4436 = vmatprep.mubr.bf16.mxu1 %v6753_v26  ;;  %4595 = vmatprep.mubr.bf16.mxu0 %v6753_v26  ;;  %v2298_v27 = vld [vmem:[#allocation11 + $0x928] sm:$0xff]  ;;  %v5664_v31 = vcombine.high %v2293_v15, %v2297_v23 }
 0x2dd   :  { %v5820_v61 = vadd.f32 %v1962_v38, %v6741_v56  ;;  %v5813_v0 = vadd.f32 %v1858_v51, %v672_v41  ;;  %v1964_v1 = vpop.f32.mrb[22].mxu0  ;;  %v1860_v2 = vpop.f32.mrb[23].mxu1  ;;  %4437 = vmatmul.mubr.bf16.vlgmr.msra.gmra.mrb[24].mxu1 %v6749_v24  ;;  %4596 = vmatmul.mubr.bf16.vlgmr.msra.gmra.mrb[24].mxu0 %v6749_v24  ;;  %v1983_v41 = vmax.f32 %v5811_v28, 0.0  ;;  %v5655_v28 = vcombine.low %v2285_v14, %v2289_v53  ;;  %v2330_v14 = vld [vmem:[#allocation11 + $0xa28] sm:$0xff] }
 0x2de   :  { %v5821_v6 = vadd.f32 %v1964_v1, %v680_v45  ;;  %v5814_v7 = vadd.f32 %v1860_v2, %v676_v52  ;;  %v1966_v12 = vpop.f32.mrb[23].mxu0  ;;  %4458 = vmatpush1.bf16.msra.mxu1 %v5631_v3  ;;  %4617 = vmatpush1.bf16.msra.mxu0 %v5633_v4  ;;  %v1985_v11 = vmax.f32 %v5819_v36, 0.0  ;;  %v1984_v45 = vmax.f32 %v5812_v37, 0.0  ;;  %v2290_v4 = vld [vmem:[#allocation11 + $0x8e8] sm:$0xff] }
 0x2df   :  { %v1989_v8 = vmax.f32 %v5813_v0, 0.0  ;;  %v5822_v9 = vadd.f32 %v1966_v12, %v6741_v56  ;;  %4459 = vmatprep.subr.bf16.mxu1 %v5640_v32  ;;  %4618 = vmatprep.subr.bf16.mxu0 %v5642_v33  ;;  %v1986_v16 = vmax.f32 %v5820_v61, 0.0  ;;  %v5647_v3 = vcombine.low %v2277_v34, %v2281_v35  ;;  %v2301_v33 = vld [vmem:[#allocation11 + $0x940] sm:$0xff]  ;;  %v2302_v35 = vld [vmem:[#allocation11 + $0x948] sm:$0xff] }
 0x2e0   :  { %v1991_v52 = vmax.f32 %v5821_v6, 0.0  ;;  %v1990_v19 = vmax.f32 %v5814_v7, 0.0  ;;  %v5649_v56 = vcombine.low %v2278_v59, %v2282_v60  ;;  %v5658_v22 = vcombine.high %v2286_v62, %v2290_v4  ;;  %v2305_v34 = vld [vmem:[#allocation11 + $0x960] sm:$0xff]  ;;  %v2306_v36 = vld [vmem:[#allocation11 + $0x968] sm:$0xff] }
 0x2e1   :  { %v6773_v48 = vpack.c.bf16 %v1989_v8, %v1983_v41  ;;  %v1992_v49 = vmax.f32 %v5822_v9, 0.0  ;;  %v5657_v29 = vcombine.low %v2286_v62, %v2290_v4  ;;  %v5666_v32 = vcombine.high %v2294_v20, %v2298_v27  ;;  %v2309_v59 = vld [vmem:[#allocation11 + $0x980] sm:$0xff]  ;;  %v2310_v61 = vld [vmem:[#allocation11 + $0x988] sm:$0xff] }
 0x2e2   :  { %v6775_v55 = vpack.c.bf16 %v1991_v52, %v1985_v11  ;;  %v6777_v17 = vpack.c.bf16 %v1990_v19, %v1984_v45  ;;  %4460 = vmatpush1.bf16.msra.mxu1 %v5639_v58  ;;  %4619 = vmatpush1.bf16.msra.mxu0 %v5641_v5  ;;  %v5663_v37 = vcombine.low %v2293_v15, %v2297_v23  ;;  %v2313_v60 = vld [vmem:[#allocation11 + $0x9a0] sm:$0xff]  ;;  %v2314_v0 = vld [vmem:[#allocation11 + $0x9a8] sm:$0xff] }
 0x2e3   :  { %v6779_v18 = vpack.c.bf16 %v1992_v49, %v1986_v16  ;;  %4461 = vmatprep.subr.bf16.mxu1 %v5648_v57  ;;  %4620 = vmatprep.subr.bf16.mxu0 %v5650_v10  ;;  %v5665_v38 = vcombine.low %v2294_v20, %v2298_v27  ;;  %v5672_v51 = vcombine.high %v2301_v33, %v2305_v34  ;;  %v2317_v7 = vld [vmem:[#allocation11 + $0x9c0] sm:$0xff]  ;;  %v2318_v57 = vld [vmem:[#allocation11 + $0x9c8] sm:$0xff] }
 0x2e4   :  { %4446 = vmatprep.mubr.bf16.mxu1 %v6777_v17  ;;  %4605 = vmatprep.mubr.bf16.mxu0 %v6777_v17  ;;  %v5674_v58 = vcombine.high %v2302_v35, %v2306_v36  ;;  %v5671_v1 = vcombine.low %v2301_v33, %v2305_v34  ;;  %v5673_v2 = vcombine.low %v2302_v35, %v2306_v36  ;;  %v2321_v12 = vld [vmem:[#allocation11 + $0x9e0] sm:$0xff]  ;;  %v2322_v41 = vld [vmem:[#allocation11 + $0x9e8] sm:$0xff] }
 0x2e5   :  { %4447 = vmatmul.mubr.bf16.gmra.mrb[28].mxu1 %v6773_v48  ;;  %4606 = vmatmul.mubr.bf16.gmra.mrb[28].mxu0 %v6773_v48  ;;  %v5680_v5 = vcombine.high %v2309_v59, %v2313_v60  ;;  %v5682_v6 = vcombine.high %v2310_v61, %v2314_v0  ;;  %v5679_v8 = vcombine.low %v2309_v59, %v2313_v60  ;;  %v2325_v45 = vld [vmem:[#allocation11 + $0xa00] sm:$0xff]  ;;  %v2326_v19 = vld [vmem:[#allocation11 + $0xa08] sm:$0xff] }
 0x2e6   :  { %4462 = vmatpush1.bf16.msra.mxu1 %v5647_v3  ;;  %4621 = vmatpush1.bf16.msra.mxu0 %v5649_v56  ;;  %v5681_v9 = vcombine.low %v2310_v61, %v2314_v0  ;;  %v5688_v10 = vcombine.high %v2317_v7, %v2321_v12  ;;  %v5690_v11 = vcombine.high %v2318_v57, %v2322_v41  ;;  %v2329_v52 = vld [vmem:[#allocation11 + $0xa20] sm:$0xff]  ;;  %v2334_v56 = vld [vmem:[#allocation11 + $0xa48] sm:$0xff] }
 0x2e7   :  { %4489 = vmatprep.mubr.bf16.mxu1 %v6755_v13  ;;  %4648 = vmatprep.mubr.bf16.mxu0 %v6755_v13  ;;  %v5687_v16 = vcombine.low %v2317_v7, %v2321_v12  ;;  %v5689_v49 = vcombine.low %v2318_v57, %v2322_v41  ;;  %v5696_v3 = vcombine.high %v2325_v45, %v2329_v52  ;;  %v2333_v62 = vld [vmem:[#allocation11 + $0xa40] sm:$0xff]  ;;  %v2338_v15 = vld [vmem:[#allocation11 + $0xa68] sm:$0xff] }
 0x2e8   :  { %4463 = vmatprep.subr.bf16.mxu1 %v5656_v21  ;;  %4622 = vmatprep.subr.bf16.mxu0 %v5658_v22  ;;  %v5698_v53 = vcombine.high %v2326_v19, %v2330_v14  ;;  %v2337_v4 = vld [vmem:[#allocation11 + $0xa60] sm:$0xff]  ;;  %v5695_v21 = vcombine.low %v2325_v45, %v2329_v52  ;;  %v5697_v22 = vcombine.low %v2326_v19, %v2330_v14 }
 0x2e9   :  { %v5704_v23 = vcombine.high %v2333_v62, %v2337_v4  ;;  %v5706_v20 = vcombine.high %v2334_v56, %v2338_v15  ;;  %v2341_v27 = vld [vmem:[#allocation11 + $0xa80] sm:$0xff]  ;;  %v5705_v33 = vcombine.low %v2334_v56, %v2338_v15 }
 0x2ea   :  { %4464 = vmatpush1.bf16.msra.mxu1 %v5655_v28  ;;  %4623 = vmatpush1.bf16.msra.mxu0 %v5657_v29  ;;  %v2345_v28 = vld [vmem:[#allocation11 + $0xaa0] sm:$0xff]  ;;  %v2342_v29 = vld [vmem:[#allocation11 + $0xa88] sm:$0xff] }
 0x2eb   :  { %4465 = vmatprep.subr.bf16.mxu1 %v5664_v31  ;;  %4624 = vmatprep.subr.bf16.mxu0 %v5666_v32  ;;  %v2346_v31 = vld [vmem:[#allocation11 + $0xaa8] sm:$0xff]  ;;  %v5703_v32 = vcombine.low %v2333_v62, %v2337_v4  ;;  %v5712_v34 = vcombine.high %v2341_v27, %v2345_v28  ;;  %v2349_v36 = vld [vmem:[#allocation11 + $0xac0] sm:$0xff] }
 0x2ec   :  { %v5714_v35 = vcombine.high %v2342_v29, %v2346_v31  ;;  %v5713_v59 = vcombine.low %v2342_v29, %v2346_v31  ;;  %v2357_v0 = vld [vmem:[#allocation11 + $0xb00] sm:$0xff]  ;;  %v2007_v31 = vld [vmem:[#allocation11 + $0x10] sm:$0xff] }
 0x2ed   :  { %v2365_v41 = vld [vmem:[#allocation11 + $0xb40] sm:$0xff] }
 0x2ee   :  { %4466 = vmatpush1.bf16.msra.mxu1 %v5663_v37  ;;  %4625 = vmatpush1.bf16.msra.mxu0 %v5665_v38  ;;  %v2353_v37 = vld [vmem:[#allocation11 + $0xae0] sm:$0xff]  ;;  %v2350_v38 = vld [vmem:[#allocation11 + $0xac8] sm:$0xff] }
 0x2ef   :  { %4467 = vmatprep.subr.bf16.mxu1 %v5672_v51  ;;  %4626 = vmatprep.subr.bf16.mxu0 %v5674_v58  ;;  %v2354_v51 = vld [vmem:[#allocation11 + $0xae8] sm:$0xff]  ;;  %v5711_v58 = vcombine.low %v2341_v27, %v2345_v28  ;;  %v5720_v60 = vcombine.high %v2349_v36, %v2353_v37  ;;  %v2373_v14 = vld [vmem:[#allocation11 + $0xb80] sm:$0xff] }
 0x2f0   :  { %v5722_v61 = vcombine.high %v2350_v38, %v2354_v51  ;;  %v5721_v7 = vcombine.low %v2350_v38, %v2354_v51  ;;  %v2381_v15 = vld [vmem:[#allocation11 + $0xbc0] sm:$0xff]  ;;  %v2015_v51 = vld [vmem:[#allocation11 + $0x50] sm:$0xff] }
 0x2f2   :  { %4468 = vmatpush1.bf16.msra.mxu1 %v5671_v1  ;;  %4627 = vmatpush1.bf16.msra.mxu0 %v5673_v2  ;;  %v2361_v1 = vld [vmem:[#allocation11 + $0xb20] sm:$0xff]  ;;  %v2358_v2 = vld [vmem:[#allocation11 + $0xb08] sm:$0xff] }
 0x2f3   :  { %4469 = vmatprep.subr.bf16.mxu1 %v5680_v5  ;;  %4628 = vmatprep.subr.bf16.mxu0 %v5682_v6  ;;  %v2362_v5 = vld [vmem:[#allocation11 + $0xb28] sm:$0xff]  ;;  %v5719_v6 = vcombine.low %v2349_v36, %v2353_v37  ;;  %v5728_v12 = vcombine.high %v2357_v0, %v2361_v1 }
 0x2f4   :  { %v5730_v57 = vcombine.high %v2358_v2, %v2362_v5  ;;  %v5729_v45 = vcombine.low %v2358_v2, %v2362_v5  ;;  %v2023_v5 = vld [vmem:[#allocation11 + $0x90] sm:$0xff] }
 0x2f6   :  { %4470 = vmatpush1.bf16.msra.mxu1 %v5679_v8  ;;  %4629 = vmatpush1.bf16.msra.mxu0 %v5681_v9  ;;  %v2369_v8 = vld [vmem:[#allocation11 + $0xb60] sm:$0xff]  ;;  %v2366_v9 = vld [vmem:[#allocation11 + $0xb48] sm:$0xff] }
 0x2f7   :  { %4471 = vmatprep.subr.bf16.mxu1 %v5688_v10  ;;  %4630 = vmatprep.subr.bf16.mxu0 %v5690_v11  ;;  %v2370_v10 = vld [vmem:[#allocation11 + $0xb68] sm:$0xff]  ;;  %v5727_v11 = vcombine.low %v2357_v0, %v2361_v1  ;;  %v5736_v52 = vcombine.high %v2365_v41, %v2369_v8 }
 0x2f8   :  { %v5738_v19 = vcombine.high %v2366_v9, %v2370_v10  ;;  %v5737_v62 = vcombine.low %v2366_v9, %v2370_v10  ;;  %v2031_v10 = vld [vmem:[#allocation11 + $0xd0] sm:$0xff] }
 0x2fa   :  { %4472 = vmatpush1.bf16.msra.mxu1 %v5687_v16  ;;  %4631 = vmatpush1.bf16.msra.mxu0 %v5689_v49  ;;  %v2377_v16 = vld [vmem:[#allocation11 + $0xba0] sm:$0xff]  ;;  %v2374_v49 = vld [vmem:[#allocation11 + $0xb88] sm:$0xff] }
 0x2fb   :  { %4473 = vmatprep.subr.bf16.mxu1 %v5696_v3  ;;  %4632 = vmatprep.subr.bf16.mxu0 %v5698_v53  ;;  %v2378_v3 = vld [vmem:[#allocation11 + $0xba8] sm:$0xff]  ;;  %v5735_v53 = vcombine.low %v2365_v41, %v2369_v8  ;;  %v5744_v4 = vcombine.high %v2373_v14, %v2377_v16 }
 0x2fc   :  { %v5746_v56 = vcombine.high %v2374_v49, %v2378_v3  ;;  %v5745_v27 = vcombine.low %v2374_v49, %v2378_v3  ;;  %v2039_v3 = vld [vmem:[#allocation11 + $0x110] sm:$0xff] }
 0x2fe   :  { %4474 = vmatpush1.bf16.msra.mxu1 %v5695_v21  ;;  %4633 = vmatpush1.bf16.msra.mxu0 %v5697_v22  ;;  %v2385_v21 = vld [vmem:[#allocation11 + $0xbe0] sm:$0xff]  ;;  %v2382_v22 = vld [vmem:[#allocation11 + $0xbc8] sm:$0xff] }
 0x2ff   :  { %4475 = vmatprep.subr.bf16.mxu1 %v5704_v23  ;;  %4634 = vmatprep.subr.bf16.mxu0 %v5706_v20  ;;  %v2386_v23 = vld [vmem:[#allocation11 + $0xbe8] sm:$0xff]  ;;  %v5743_v20 = vcombine.low %v2373_v14, %v2377_v16  ;;  %v5752_v28 = vcombine.high %v2381_v15, %v2385_v21 }
 0x300   :  { %v5754_v29 = vcombine.high %v2382_v22, %v2386_v23  ;;  %v5753_v36 = vcombine.low %v2382_v22, %v2386_v23  ;;  %v2047_v23 = vld [vmem:[#allocation11 + $0x150] sm:$0xff] }
 0x302   :  { %4476 = vmatpush1.bf16.msra.mxu1 %v5703_v32  ;;  %4635 = vmatpush1.bf16.msra.mxu0 %v5705_v33  ;;  %v2011_v32 = vld [vmem:[#allocation11 + $0x30] sm:$0xff]  ;;  %v2008_v33 = vld [vmem:[#allocation11 + $0x18] sm:$0xff] }
 0x303   :  { %4477 = vmatprep.subr.bf16.mxu1 %v5712_v34  ;;  %4636 = vmatprep.subr.bf16.mxu0 %v5714_v35  ;;  %v2012_v34 = vld [vmem:[#allocation11 + $0x38] sm:$0xff]  ;;  %v5751_v35 = vcombine.low %v2381_v15, %v2385_v21  ;;  %v5380_v37 = vcombine.high %v2007_v31, %v2011_v32 }
 0x304   :  { %v5382_v38 = vcombine.high %v2008_v33, %v2012_v34  ;;  %v5381_v0 = vcombine.low %v2008_v33, %v2012_v34  ;;  %v2055_v33 = vld [vmem:[#allocation11 + $0x190] sm:$0xff] }
 0x305   :  { %v2059_v34 = vld [vmem:[#allocation11 + $0x1b0] sm:$0xff] }
 0x306   :  { %4478 = vmatpush1.bf16.msra.mxu1 %v5711_v58  ;;  %4637 = vmatpush1.bf16.msra.mxu0 %v5713_v59  ;;  %v2019_v58 = vld [vmem:[#allocation11 + $0x70] sm:$0xff]  ;;  %v2016_v59 = vld [vmem:[#allocation11 + $0x58] sm:$0xff] }
 0x307   :  { %4479 = vmatprep.subr.bf16.mxu1 %v5720_v60  ;;  %4638 = vmatprep.subr.bf16.mxu0 %v5722_v61  ;;  %v2020_v60 = vld [vmem:[#allocation11 + $0x78] sm:$0xff]  ;;  %v5379_v61 = vcombine.low %v2007_v31, %v2011_v32  ;;  %v5388_v1 = vcombine.high %v2015_v51, %v2019_v58 }
 0x308   :  { %v5390_v2 = vcombine.high %v2016_v59, %v2020_v60  ;;  %v5389_v41 = vcombine.low %v2016_v59, %v2020_v60  ;;  %v2063_v59 = vld [vmem:[#allocation11 + $0x1d0] sm:$0xff] }
 0x309   :  { %v2067_v60 = vld [vmem:[#allocation11 + $0x1f0] sm:$0xff] }
 0x30a   :  { %4480 = vmatpush1.bf16.msra.mxu1 %v5719_v6  ;;  %4639 = vmatpush1.bf16.msra.mxu0 %v5721_v7  ;;  %v2027_v6 = vld [vmem:[#allocation11 + $0xb0] sm:$0xff]  ;;  %v2024_v7 = vld [vmem:[#allocation11 + $0x98] sm:$0xff] }
 0x30b   :  { %4481 = vmatprep.subr.bf16.mxu1 %v5728_v12  ;;  %4640 = vmatprep.subr.bf16.mxu0 %v5730_v57  ;;  %v2028_v12 = vld [vmem:[#allocation11 + $0xb8] sm:$0xff]  ;;  %v5387_v57 = vcombine.low %v2015_v51, %v2019_v58  ;;  %v5396_v8 = vcombine.high %v2023_v5, %v2027_v6  ;;  %v5428_v51 = vcombine.high %v2055_v33, %v2059_v34 }
 0x30c   :  { %v5398_v9 = vcombine.high %v2024_v7, %v2028_v12  ;;  %v5397_v14 = vcombine.low %v2024_v7, %v2028_v12  ;;  %v2071_v7 = vld [vmem:[#allocation11 + $0x210] sm:$0xff] }
 0x30d   :  { %v2075_v12 = vld [vmem:[#allocation11 + $0x230] sm:$0xff] }
 0x30e   :  { %4482 = vmatpush1.bf16.msra.mxu1 %v5727_v11  ;;  %4641 = vmatpush1.bf16.msra.mxu0 %v5729_v45  ;;  %v2035_v11 = vld [vmem:[#allocation11 + $0xf0] sm:$0xff]  ;;  %v2032_v45 = vld [vmem:[#allocation11 + $0xd8] sm:$0xff] }
 0x30f   :  { %4483 = vmatprep.subr.bf16.mxu1 %v5736_v52  ;;  %4642 = vmatprep.subr.bf16.mxu0 %v5738_v19  ;;  %v2036_v52 = vld [vmem:[#allocation11 + $0xf8] sm:$0xff]  ;;  %v5395_v19 = vcombine.low %v2023_v5, %v2027_v6  ;;  %v5404_v16 = vcombine.high %v2031_v10, %v2035_v11  ;;  %v5436_v5 = vcombine.high %v2063_v59, %v2067_v60 }
 0x310   :  { %v5406_v49 = vcombine.high %v2032_v45, %v2036_v52  ;;  %v5405_v15 = vcombine.low %v2032_v45, %v2036_v52  ;;  %v2079_v45 = vld [vmem:[#allocation11 + $0x250] sm:$0xff] }
 0x311   :  { %v2083_v52 = vld [vmem:[#allocation11 + $0x270] sm:$0xff] }
 0x312   :  { %4484 = vmatpush1.bf16.msra.mxu1 %v5735_v53  ;;  %4643 = vmatpush1.bf16.msra.mxu0 %v5737_v62  ;;  %v2043_v53 = vld [vmem:[#allocation11 + $0x130] sm:$0xff]  ;;  %v2040_v62 = vld [vmem:[#allocation11 + $0x118] sm:$0xff] }
 0x313   :  { %4485 = vmatprep.subr.bf16.mxu1 %v5744_v4  ;;  %4644 = vmatprep.subr.bf16.mxu0 %v5746_v56  ;;  %v2044_v4 = vld [vmem:[#allocation11 + $0x138] sm:$0xff]  ;;  %v5403_v56 = vcombine.low %v2031_v10, %v2035_v11  ;;  %v5412_v21 = vcombine.high %v2039_v3, %v2043_v53  ;;  %v5444_v10 = vcombine.high %v2071_v7, %v2075_v12 }
 0x314   :  { %v5414_v22 = vcombine.high %v2040_v62, %v2044_v4  ;;  %v5413_v31 = vcombine.low %v2040_v62, %v2044_v4  ;;  %v2087_v62 = vld [vmem:[#allocation11 + $0x290] sm:$0xff] }
 0x315   :  { %v2091_v4 = vld [vmem:[#allocation11 + $0x2b0] sm:$0xff] }
 0x316   :  { %4486 = vmatpush1.bf16.msra.mxu1 %v5743_v20  ;;  %4645 = vmatpush1.bf16.msra.mxu0 %v5745_v27  ;;  %v2051_v20 = vld [vmem:[#allocation11 + $0x170] sm:$0xff]  ;;  %v2048_v27 = vld [vmem:[#allocation11 + $0x158] sm:$0xff] }
 0x317   :  { %4487 = vmatprep.subr.bf16.mxu1 %v5752_v28  ;;  %4646 = vmatprep.subr.bf16.mxu0 %v5754_v29  ;;  %v2052_v28 = vld [vmem:[#allocation11 + $0x178] sm:$0xff]  ;;  %v5411_v29 = vcombine.low %v2039_v3, %v2043_v53  ;;  %v5420_v32 = vcombine.high %v2047_v23, %v2051_v20  ;;  %v5452_v3 = vcombine.high %v2079_v45, %v2083_v52 }
 0x31a   :  { %4488 = vmatpush1.bf16.msra.mxu1 %v5751_v35  ;;  %4647 = vmatpush1.bf16.msra.mxu0 %v5753_v36  ;;  %v2056_v35 = vld [vmem:[#allocation11 + $0x198] sm:$0xff] }
 0x31b   :  { %4669 = vmatprep.subr.bf16.mxu1 %v5380_v37  ;;  %4828 = vmatprep.subr.bf16.mxu0 %v5382_v38  ;;  %v2060_v36 = vld [vmem:[#allocation11 + $0x1b8] sm:$0xff]  ;;  %v5419_v37 = vcombine.low %v2047_v23, %v2051_v20  ;;  %v5421_v38 = vcombine.low %v2048_v27, %v2052_v28  ;;  %v5460_v23 = vcombine.high %v2087_v62, %v2091_v4 }
 0x31c   :  { %v5430_v58 = vcombine.high %v2056_v35, %v2060_v36 }
 0x31d   :  { %4490 = vmatmul.mubr.bf16.vlgmr.msra.gmra.mrb[24].mxu1 %v6751_v25  ;;  %4649 = vmatmul.mubr.bf16.vlgmr.msra.gmra.mrb[24].mxu0 %v6751_v25 }
 0x31e   :  { %4499 = vmatprep.mubr.bf16.mxu1 %v6779_v18  ;;  %4658 = vmatprep.mubr.bf16.mxu0 %v6779_v18 }
 0x31f   :  { %4670 = vmatpush1.bf16.msra.mxu1 %v5379_v61  ;;  %4829 = vmatpush1.bf16.msra.mxu0 %v5381_v0  ;;  %v2064_v61 = vld [vmem:[#allocation11 + $0x1d8] sm:$0xff] }
 0x320   :  { %4671 = vmatprep.subr.bf16.mxu1 %v5388_v1  ;;  %4830 = vmatprep.subr.bf16.mxu0 %v5390_v2  ;;  %v2068_v0 = vld [vmem:[#allocation11 + $0x1f8] sm:$0xff]  ;;  %v5427_v1 = vcombine.low %v2055_v33, %v2059_v34  ;;  %v5429_v2 = vcombine.low %v2056_v35, %v2060_v36  ;;  %v2103_v35 = vld [vmem:[#allocation11 + $0x310] sm:$0xff] }
 0x321   :  { %v5438_v6 = vcombine.high %v2064_v61, %v2068_v0  ;;  %v2107_v36 = vld [vmem:[#allocation11 + $0x330] sm:$0xff] }
 0x323   :  { %4672 = vmatpush1.bf16.msra.mxu1 %v5387_v57  ;;  %4831 = vmatpush1.bf16.msra.mxu0 %v5389_v41  ;;  %v2072_v57 = vld [vmem:[#allocation11 + $0x218] sm:$0xff] }
 0x324   :  { %4673 = vmatprep.subr.bf16.mxu1 %v5396_v8  ;;  %4832 = vmatprep.subr.bf16.mxu0 %v5398_v9  ;;  %v2076_v41 = vld [vmem:[#allocation11 + $0x238] sm:$0xff]  ;;  %v5435_v8 = vcombine.low %v2063_v59, %v2067_v60  ;;  %v5437_v9 = vcombine.low %v2064_v61, %v2068_v0  ;;  %v5476_v59 = vcombine.high %v2103_v35, %v2107_v36  ;;  %v2111_v61 = vld [vmem:[#allocation11 + $0x350] sm:$0xff] }
 0x325   :  { %4500 = vmatmul.mubr.bf16.gmra.mrb[28].mxu1 %v6775_v55  ;;  %4659 = vmatmul.mubr.bf16.gmra.mrb[28].mxu0 %v6775_v55  ;;  %v5446_v11 = vcombine.high %v2072_v57, %v2076_v41  ;;  %v2115_v0 = vld [vmem:[#allocation11 + $0x370] sm:$0xff] }
 0x326   :  { %4701 = vmatprep.mubr.bf16.mxu1 %v6707_v63  ;;  %4860 = vmatprep.mubr.bf16.mxu0 %v6707_v63  ;;  %v5422_v63 = vcombine.high %v2048_v27, %v2052_v28  ;;  %v2095_v27 = vld [vmem:[#allocation11 + $0x2d0] sm:$0xff] }
 0x327   :  { %4674 = vmatpush1.bf16.msra.mxu1 %v5395_v19  ;;  %4833 = vmatpush1.bf16.msra.mxu0 %v5397_v14  ;;  %v2080_v19 = vld [vmem:[#allocation11 + $0x258] sm:$0xff]  ;;  %v2099_v28 = vld [vmem:[#allocation11 + $0x2f0] sm:$0xff] }
 0x328   :  { %4675 = vmatprep.subr.bf16.mxu1 %v5404_v16  ;;  %4834 = vmatprep.subr.bf16.mxu0 %v5406_v49  ;;  %v2084_v14 = vld [vmem:[#allocation11 + $0x278] sm:$0xff]  ;;  %v5443_v16 = vcombine.low %v2071_v7, %v2075_v12  ;;  %v5445_v49 = vcombine.low %v2072_v57, %v2076_v41  ;;  %v5468_v33 = vcombine.high %v2095_v27, %v2099_v28  ;;  %v2119_v57 = vld [vmem:[#allocation11 + $0x390] sm:$0xff] }
 0x329   :  { %v5454_v53 = vcombine.high %v2080_v19, %v2084_v14  ;;  %v5484_v7 = vcombine.high %v2111_v61, %v2115_v0  ;;  %v2123_v41 = vld [vmem:[#allocation11 + $0x3b0] sm:$0xff] }
 0x32b   :  { %4676 = vmatpush1.bf16.msra.mxu1 %v5403_v56  ;;  %4835 = vmatpush1.bf16.msra.mxu0 %v5405_v15  ;;  %v2088_v56 = vld [vmem:[#allocation11 + $0x298] sm:$0xff] }
 0x32c   :  { %4677 = vmatprep.subr.bf16.mxu1 %v5412_v21  ;;  %4836 = vmatprep.subr.bf16.mxu0 %v5414_v22  ;;  %v2092_v15 = vld [vmem:[#allocation11 + $0x2b8] sm:$0xff]  ;;  %v5451_v21 = vcombine.low %v2079_v45, %v2083_v52  ;;  %v5453_v22 = vcombine.low %v2080_v19, %v2084_v14  ;;  %v5492_v45 = vcombine.high %v2119_v57, %v2123_v41  ;;  %v2127_v19 = vld [vmem:[#allocation11 + $0x3d0] sm:$0xff] }
 0x32d   :  { %v5462_v20 = vcombine.high %v2088_v56, %v2092_v15  ;;  %v2131_v14 = vld [vmem:[#allocation11 + $0x3f0] sm:$0xff] }
 0x32f   :  { %4678 = vmatpush1.bf16.msra.mxu1 %v5411_v29  ;;  %4837 = vmatpush1.bf16.msra.mxu0 %v5413_v31  ;;  %v2096_v29 = vld [vmem:[#allocation11 + $0x2d8] sm:$0xff] }
 0x330   :  { %4679 = vmatprep.subr.bf16.mxu1 %v5420_v32  ;;  %4838 = vmatprep.subr.bf16.mxu0 %v5422_v63  ;;  %v2100_v31 = vld [vmem:[#allocation11 + $0x2f8] sm:$0xff]  ;;  %v5459_v32 = vcombine.low %v2087_v62, %v2091_v4  ;;  %v5461_v63 = vcombine.low %v2088_v56, %v2092_v15  ;;  %v5500_v62 = vcombine.high %v2127_v19, %v2131_v14  ;;  %v2135_v56 = vld [vmem:[#allocation11 + $0x410] sm:$0xff] }
 0x331   :  { %v5470_v34 = vcombine.high %v2096_v29, %v2100_v31  ;;  %v2139_v15 = vld [vmem:[#allocation11 + $0x430] sm:$0xff] }
 0x333   :  { %4680 = vmatpush1.bf16.msra.mxu1 %v5419_v37  ;;  %4839 = vmatpush1.bf16.msra.mxu0 %v5421_v38  ;;  %v2104_v37 = vld [vmem:[#allocation11 + $0x318] sm:$0xff] }
 0x334   :  { %4681 = vmatprep.subr.bf16.mxu1 %v5428_v51  ;;  %4840 = vmatprep.subr.bf16.mxu0 %v5430_v58  ;;  %v2108_v38 = vld [vmem:[#allocation11 + $0x338] sm:$0xff]  ;;  %v5467_v51 = vcombine.low %v2095_v27, %v2099_v28  ;;  %v5469_v58 = vcombine.low %v2096_v29, %v2100_v31  ;;  %v5508_v27 = vcombine.high %v2135_v56, %v2139_v15  ;;  %v2143_v29 = vld [vmem:[#allocation11 + $0x450] sm:$0xff] }
 0x335   :  { %v5478_v60 = vcombine.high %v2104_v37, %v2108_v38  ;;  %v2147_v31 = vld [vmem:[#allocation11 + $0x470] sm:$0xff] }
 0x337   :  { %4682 = vmatpush1.bf16.msra.mxu1 %v5427_v1  ;;  %4841 = vmatpush1.bf16.msra.mxu0 %v5429_v2  ;;  %v2112_v1 = vld [vmem:[#allocation11 + $0x358] sm:$0xff] }
 0x338   :  { %4683 = vmatprep.subr.bf16.mxu1 %v5436_v5  ;;  %4842 = vmatprep.subr.bf16.mxu0 %v5438_v6  ;;  %v2116_v2 = vld [vmem:[#allocation11 + $0x378] sm:$0xff]  ;;  %v5475_v5 = vcombine.low %v2103_v35, %v2107_v36  ;;  %v5477_v6 = vcombine.low %v2104_v37, %v2108_v38  ;;  %v5516_v35 = vcombine.high %v2143_v29, %v2147_v31  ;;  %v2151_v37 = vld [vmem:[#allocation11 + $0x490] sm:$0xff] }
 0x339   :  { %v5486_v12 = vcombine.high %v2112_v1, %v2116_v2  ;;  %v2155_v38 = vld [vmem:[#allocation11 + $0x4b0] sm:$0xff] }
 0x33b   :  { %4684 = vmatpush1.bf16.msra.mxu1 %v5435_v8  ;;  %4843 = vmatpush1.bf16.msra.mxu0 %v5437_v9  ;;  %v2120_v8 = vld [vmem:[#allocation11 + $0x398] sm:$0xff] }
 0x33c   :  { %4685 = vmatprep.subr.bf16.mxu1 %v5444_v10  ;;  %4844 = vmatprep.subr.bf16.mxu0 %v5446_v11  ;;  %v2124_v9 = vld [vmem:[#allocation11 + $0x3b8] sm:$0xff]  ;;  %v5483_v10 = vcombine.low %v2111_v61, %v2115_v0  ;;  %v5485_v11 = vcombine.low %v2112_v1, %v2116_v2  ;;  %v5524_v61 = vcombine.high %v2151_v37, %v2155_v38  ;;  %v2159_v1 = vld [vmem:[#allocation11 + $0x4d0] sm:$0xff] }
 0x33d   :  { %v5494_v52 = vcombine.high %v2120_v8, %v2124_v9  ;;  %v2163_v2 = vld [vmem:[#allocation11 + $0x4f0] sm:$0xff] }
 0x33f   :  { %4686 = vmatpush1.bf16.msra.mxu1 %v5443_v16  ;;  %4845 = vmatpush1.bf16.msra.mxu0 %v5445_v49  ;;  %v2128_v16 = vld [vmem:[#allocation11 + $0x3d8] sm:$0xff] }
 0x340   :  { %4687 = vmatprep.subr.bf16.mxu1 %v5452_v3  ;;  %4846 = vmatprep.subr.bf16.mxu0 %v5454_v53  ;;  %v2132_v49 = vld [vmem:[#allocation11 + $0x3f8] sm:$0xff]  ;;  %v5491_v3 = vcombine.low %v2119_v57, %v2123_v41  ;;  %v5493_v53 = vcombine.low %v2120_v8, %v2124_v9  ;;  %v2167_v41 = vld [vmem:[#allocation11 + $0x510] sm:$0xff] }
 0x341   :  { %v5502_v4 = vcombine.high %v2128_v16, %v2132_v49  ;;  %v2168_v8 = vld [vmem:[#allocation11 + $0x518] sm:$0xff] }
 0x342   :  { %v2172_v9 = vld [vmem:[#allocation11 + $0x538] sm:$0xff] }
 0x343   :  { %4688 = vmatpush1.bf16.msra.mxu1 %v5451_v21  ;;  %4847 = vmatpush1.bf16.msra.mxu0 %v5453_v22  ;;  %v2136_v21 = vld [vmem:[#allocation11 + $0x418] sm:$0xff] }
 0x344   :  { %4689 = vmatprep.subr.bf16.mxu1 %v5460_v23  ;;  %4848 = vmatprep.subr.bf16.mxu0 %v5462_v20  ;;  %v2140_v22 = vld [vmem:[#allocation11 + $0x438] sm:$0xff]  ;;  %v5499_v23 = vcombine.low %v2127_v19, %v2131_v14  ;;  %v5501_v20 = vcombine.low %v2128_v16, %v2132_v49  ;;  %v2175_v19 = vld [vmem:[#allocation11 + $0x550] sm:$0xff] }
 0x345   :  { %v5510_v28 = vcombine.high %v2136_v21, %v2140_v22  ;;  %v2179_v14 = vld [vmem:[#allocation11 + $0x570] sm:$0xff]  ;;  %v2176_v16 = vld [vmem:[#allocation11 + $0x558] sm:$0xff] }
 0x346   :  { %v2180_v49 = vld [vmem:[#allocation11 + $0x578] sm:$0xff] }
 0x347   :  { %4690 = vmatpush1.bf16.msra.mxu1 %v5459_v32  ;;  %4849 = vmatpush1.bf16.msra.mxu0 %v5461_v63  ;;  %v2144_v32 = vld [vmem:[#allocation11 + $0x458] sm:$0xff] }
 0x348   :  { %4691 = vmatprep.subr.bf16.mxu1 %v5468_v33  ;;  %4850 = vmatprep.subr.bf16.mxu0 %v5470_v34  ;;  %v2148_v63 = vld [vmem:[#allocation11 + $0x478] sm:$0xff]  ;;  %v5507_v33 = vcombine.low %v2135_v56, %v2139_v15  ;;  %v5509_v34 = vcombine.low %v2136_v21, %v2140_v22  ;;  %v2187_v56 = vld [vmem:[#allocation11 + $0x5b0] sm:$0xff]  ;;  %v5547_v21 = vcombine.low %v2175_v19, %v2179_v14 }
 0x349   :  { %v5518_v36 = vcombine.high %v2144_v32, %v2148_v63  ;;  %v2188_v15 = vld [vmem:[#allocation11 + $0x5b8] sm:$0xff]  ;;  %v5549_v22 = vcombine.low %v2176_v16, %v2180_v49 }
 0x34b   :  { %4692 = vmatpush1.bf16.msra.mxu1 %v5467_v51  ;;  %4851 = vmatpush1.bf16.msra.mxu0 %v5469_v58  ;;  %v2152_v51 = vld [vmem:[#allocation11 + $0x498] sm:$0xff] }
 0x34c   :  { %4693 = vmatprep.subr.bf16.mxu1 %v5476_v59  ;;  %4852 = vmatprep.subr.bf16.mxu0 %v5478_v60  ;;  %v2156_v58 = vld [vmem:[#allocation11 + $0x4b8] sm:$0xff]  ;;  %v5515_v59 = vcombine.low %v2143_v29, %v2147_v31  ;;  %v5517_v60 = vcombine.low %v2144_v32, %v2148_v63 }
 0x34d   :  { %v5526_v0 = vcombine.high %v2152_v51, %v2156_v58  ;;  %v2192_v29 = vld [vmem:[#allocation11 + $0x5d8] sm:$0xff] }
 0x34e   :  { %v2196_v31 = vld [vmem:[#allocation11 + $0x5f8] sm:$0xff] }
 0x34f   :  { %4694 = vmatpush1.bf16.msra.mxu1 %v5475_v5  ;;  %4853 = vmatpush1.bf16.msra.mxu0 %v5477_v6  ;;  %v2160_v5 = vld [vmem:[#allocation11 + $0x4d8] sm:$0xff] }
 0x350   :  { %4695 = vmatprep.subr.bf16.mxu1 %v5484_v7  ;;  %4854 = vmatprep.subr.bf16.mxu0 %v5486_v12  ;;  %v2164_v6 = vld [vmem:[#allocation11 + $0x4f8] sm:$0xff]  ;;  %v5525_v7 = vcombine.low %v2152_v51, %v2156_v58  ;;  %v5532_v12 = vcombine.high %v2159_v1, %v2163_v2  ;;  %v5565_v58 = vcombine.low %v2192_v29, %v2196_v31 }
 0x351   :  { %v5534_v57 = vcombine.high %v2160_v5, %v2164_v6 }
 0x353   :  { %4696 = vmatpush1.bf16.msra.mxu1 %v5483_v10  ;;  %4855 = vmatpush1.bf16.msra.mxu0 %v5485_v11  ;;  %v5531_v10 = vcombine.low %v2159_v1, %v2163_v2  ;;  %v5533_v11 = vcombine.low %v2160_v5, %v2164_v6  ;;  %v2208_v1 = vld [vmem:[#allocation11 + $0x658] sm:$0xff] }
 0x354   :  { %4697 = vmatprep.subr.bf16.mxu1 %v5492_v45  ;;  %4856 = vmatprep.subr.bf16.mxu0 %v5494_v52  ;;  %v5542_v52 = vcombine.high %v2168_v8, %v2172_v9  ;;  %v2212_v2 = vld [vmem:[#allocation11 + $0x678] sm:$0xff] }
 0x357   :  { %4698 = vmatpush1.bf16.msra.mxu1 %v5491_v3  ;;  %4857 = vmatpush1.bf16.msra.mxu0 %v5493_v53  ;;  %v5541_v3 = vcombine.low %v2168_v8, %v2172_v9  ;;  %v5548_v53 = vcombine.high %v2175_v19, %v2179_v14  ;;  %v5581_v9 = vcombine.low %v2208_v1, %v2212_v2  ;;  %v2224_v19 = vld [vmem:[#allocation11 + $0x6d8] sm:$0xff] }
 0x358   :  { %4699 = vmatprep.subr.bf16.mxu1 %v5500_v62  ;;  %4858 = vmatprep.subr.bf16.mxu0 %v5502_v4  ;;  %v5550_v62 = vcombine.high %v2176_v16, %v2180_v49  ;;  %v2183_v4 = vld [vmem:[#allocation11 + $0x590] sm:$0xff]  ;;  %v2228_v14 = vld [vmem:[#allocation11 + $0x6f8] sm:$0xff] }
 0x359   :  { %v5555_v32 = vcombine.low %v2183_v4, %v2187_v56 }
 0x35b   :  { %4700 = vmatpush1.bf16.msra.mxu1 %v5499_v23  ;;  %4859 = vmatpush1.bf16.msra.mxu0 %v5501_v20  ;;  %v5556_v23 = vcombine.high %v2183_v4, %v2187_v56  ;;  %v2232_v4 = vld [vmem:[#allocation11 + $0x718] sm:$0xff] }
 0x35c   :  { %4722 = vmatprep.subr.bf16.mxu1 %v5508_v27  ;;  %4881 = vmatprep.subr.bf16.mxu0 %v5510_v28  ;;  %v2191_v27 = vld [vmem:[#allocation11 + $0x5d0] sm:$0xff]  ;;  %v2236_v56 = vld [vmem:[#allocation11 + $0x738] sm:$0xff] }
 0x35d   :  { %v2195_v28 = vld [vmem:[#allocation11 + $0x5f0] sm:$0xff] }
 0x35e   :  { %4702 = vmatmul.mubr.bf16.vlgmr.msra.gmra.mrb[32].mxu1 %v6699_v54  ;;  %4861 = vmatmul.mubr.bf16.vlgmr.msra.gmra.mrb[32].mxu0 %v6699_v54  ;;  %v5523_v54 = vcombine.low %v2151_v37, %v2155_v38  ;;  %v2200_v37 = vld [vmem:[#allocation11 + $0x618] sm:$0xff]  ;;  %v5563_v51 = vcombine.low %v2191_v27, %v2195_v28 }
 0x35f   :  { %4711 = vmatprep.mubr.bf16.mxu1 %v6719_v30  ;;  %4723 = vmatpush1.bf16.msra.mxu1 %v5507_v33  ;;  %v5564_v33 = vcombine.high %v2191_v27, %v2195_v28  ;;  %v2204_v38 = vld [vmem:[#allocation11 + $0x638] sm:$0xff] }
 0x360   :  { %4870 = vmatprep.mubr.bf16.mxu0 %v6719_v30  ;;  %4882 = vmatpush1.bf16.msra.mxu0 %v5509_v34  ;;  %v2171_v30 = vld [vmem:[#allocation11 + $0x530] sm:$0xff]  ;;  %v5566_v34 = vcombine.high %v2192_v29, %v2196_v31  ;;  %v5573_v6 = vcombine.low %v2200_v37, %v2204_v38  ;;  %v2240_v27 = vld [vmem:[#allocation11 + $0x758] sm:$0xff]  ;;  %v5605_v31 = vcombine.low %v2232_v4, %v2236_v56 }
 0x361   :  { %4724 = vmatprep.subr.bf16.mxu1 %v5516_v35  ;;  %4883 = vmatprep.subr.bf16.mxu0 %v5518_v36  ;;  %v5540_v45 = vcombine.high %v2167_v41, %v2171_v30  ;;  %v2199_v35 = vld [vmem:[#allocation11 + $0x610] sm:$0xff]  ;;  %v2244_v28 = vld [vmem:[#allocation11 + $0x778] sm:$0xff] }
 0x362   :  { %v2203_v36 = vld [vmem:[#allocation11 + $0x630] sm:$0xff] }
 0x363   :  { %4725 = vmatpush1.bf16.msra.mxu1 %v5515_v59  ;;  %v5572_v59 = vcombine.high %v2199_v35, %v2203_v36  ;;  %v5571_v5 = vcombine.low %v2199_v35, %v2203_v36  ;;  %v2248_v35 = vld [vmem:[#allocation11 + $0x798] sm:$0xff] }
 0x364   :  { %4884 = vmatpush1.bf16.msra.mxu0 %v5517_v60  ;;  %4726 = vmatprep.subr.bf16.mxu1 %v5524_v61  ;;  %v5574_v60 = vcombine.high %v2200_v37, %v2204_v38  ;;  %v2207_v61 = vld [vmem:[#allocation11 + $0x650] sm:$0xff]  ;;  %v2252_v36 = vld [vmem:[#allocation11 + $0x7b8] sm:$0xff]  ;;  %v5613_v38 = vcombine.low %v2240_v27, %v2244_v28 }
 0x365   :  { %4885 = vmatprep.subr.bf16.mxu0 %v5526_v0  ;;  %v2211_v0 = vld [vmem:[#allocation11 + $0x670] sm:$0xff] }
 0x366   :  { %4712 = vmatmul.mubr.bf16.gmra.mrb[36].mxu1 %v6717_v50  ;;  %4871 = vmatmul.mubr.bf16.gmra.mrb[36].mxu0 %v6717_v50  ;;  %v5539_v50 = vcombine.low %v2167_v41, %v2171_v30  ;;  %v2216_v41 = vld [vmem:[#allocation11 + $0x698] sm:$0xff]  ;;  %v5579_v8 = vcombine.low %v2207_v61, %v2211_v0 }
 0x367   :  { %4727 = vmatpush1.bf16.msra.mxu1 %v5523_v54  ;;  %4754 = vmatprep.mubr.bf16.mxu1 %v6753_v26  ;;  %v5580_v54 = vcombine.high %v2207_v61, %v2211_v0  ;;  %v2220_v30 = vld [vmem:[#allocation11 + $0x6b8] sm:$0xff] }
 0x368   :  { %4886 = vmatpush1.bf16.msra.mxu0 %v5525_v7  ;;  %4913 = vmatprep.mubr.bf16.mxu0 %v6753_v26  ;;  %v2184_v26 = vld [vmem:[#allocation11 + $0x598] sm:$0xff]  ;;  %v5582_v7 = vcombine.high %v2208_v1, %v2212_v2  ;;  %v5589_v49 = vcombine.low %v2216_v41, %v2220_v30  ;;  %v5621_v2 = vcombine.low %v2248_v35, %v2252_v36 }
 0x369   :  { %4728 = vmatprep.subr.bf16.mxu1 %v5532_v12  ;;  %4887 = vmatprep.subr.bf16.mxu0 %v5534_v57  ;;  %v5558_v20 = vcombine.high %v2184_v26, %v2188_v15  ;;  %v5557_v63 = vcombine.low %v2184_v26, %v2188_v15  ;;  %v2215_v12 = vld [vmem:[#allocation11 + $0x690] sm:$0xff]  ;;  %v5597_v15 = vcombine.low %v2224_v19, %v2228_v14  ;;  %v2256_v61 = vld [vmem:[#allocation11 + $0x7d8] sm:$0xff] }
 0x36a   :  { %v2219_v57 = vld [vmem:[#allocation11 + $0x6b0] sm:$0xff]  ;;  %v2260_v0 = vld [vmem:[#allocation11 + $0x7f8] sm:$0xff] }
 0x36b   :  { %4729 = vmatpush1.bf16.msra.mxu1 %v5531_v10  ;;  %v5588_v10 = vcombine.high %v2215_v12, %v2219_v57  ;;  %v5587_v16 = vcombine.low %v2215_v12, %v2219_v57  ;;  %v2264_v12 = vld [vmem:[#allocation11 + $0x818] sm:$0xff] }
 0x36c   :  { %4888 = vmatpush1.bf16.msra.mxu0 %v5533_v11  ;;  %4730 = vmatprep.subr.bf16.mxu1 %v5540_v45  ;;  %v5590_v11 = vcombine.high %v2216_v41, %v2220_v30  ;;  %v2223_v45 = vld [vmem:[#allocation11 + $0x6d0] sm:$0xff]  ;;  %v2268_v57 = vld [vmem:[#allocation11 + $0x838] sm:$0xff]  ;;  %v5629_v30 = vcombine.low %v2256_v61, %v2260_v0 }
 0x36d   :  { %4889 = vmatprep.subr.bf16.mxu0 %v5542_v52  ;;  %v2227_v52 = vld [vmem:[#allocation11 + $0x6f0] sm:$0xff] }
 0x36e   :  { %v5595_v26 = vcombine.low %v2223_v45, %v2227_v52 }
 0x36f   :  { %4731 = vmatpush1.bf16.msra.mxu1 %v5539_v50  ;;  %v5596_v50 = vcombine.high %v2223_v45, %v2227_v52  ;;  %v2272_v45 = vld [vmem:[#allocation11 + $0x858] sm:$0xff] }
 0x370   :  { %4890 = vmatpush1.bf16.msra.mxu0 %v5541_v3  ;;  %4732 = vmatprep.subr.bf16.mxu1 %v5548_v53  ;;  %v5598_v3 = vcombine.high %v2224_v19, %v2228_v14  ;;  %v2231_v53 = vld [vmem:[#allocation11 + $0x710] sm:$0xff]  ;;  %v2276_v52 = vld [vmem:[#allocation11 + $0x878] sm:$0xff]  ;;  %v5637_v14 = vcombine.low %v2264_v12, %v2268_v57 }
 0x371   :  { %4891 = vmatprep.subr.bf16.mxu0 %v5550_v62  ;;  %v2235_v62 = vld [vmem:[#allocation11 + $0x730] sm:$0xff] }
 0x372   :  { %v5603_v29 = vcombine.low %v2231_v53, %v2235_v62 }
 0x373   :  { %4733 = vmatpush1.bf16.msra.mxu1 %v5547_v21  ;;  %v5604_v21 = vcombine.high %v2231_v53, %v2235_v62  ;;  %v2280_v53 = vld [vmem:[#allocation11 + $0x898] sm:$0xff] }
 0x374   :  { %4892 = vmatpush1.bf16.msra.mxu0 %v5549_v22  ;;  %4734 = vmatprep.subr.bf16.mxu1 %v5556_v23  ;;  %v5606_v22 = vcombine.high %v2232_v4, %v2236_v56  ;;  %v2239_v23 = vld [vmem:[#allocation11 + $0x750] sm:$0xff]  ;;  %v2284_v62 = vld [vmem:[#allocation11 + $0x8b8] sm:$0xff]  ;;  %v5645_v56 = vcombine.low %v2272_v45, %v2276_v52 }
 0x375   :  { %4893 = vmatprep.subr.bf16.mxu0 %v5558_v20  ;;  %v2243_v20 = vld [vmem:[#allocation11 + $0x770] sm:$0xff] }
 0x376   :  { %v5611_v37 = vcombine.low %v2239_v23, %v2243_v20 }
 0x377   :  { %4735 = vmatpush1.bf16.msra.mxu1 %v5555_v32  ;;  %v5612_v32 = vcombine.high %v2239_v23, %v2243_v20  ;;  %v2288_v23 = vld [vmem:[#allocation11 + $0x8d8] sm:$0xff] }
 0x378   :  { %4894 = vmatpush1.bf16.msra.mxu0 %v5557_v63  ;;  %4736 = vmatprep.subr.bf16.mxu1 %v5564_v33  ;;  %v5614_v63 = vcombine.high %v2240_v27, %v2244_v28  ;;  %v2247_v33 = vld [vmem:[#allocation11 + $0x790] sm:$0xff]  ;;  %v2292_v20 = vld [vmem:[#allocation11 + $0x8f8] sm:$0xff]  ;;  %v5653_v27 = vcombine.low %v2280_v53, %v2284_v62 }
 0x379   :  { %4895 = vmatprep.subr.bf16.mxu0 %v5566_v34  ;;  %v2251_v34 = vld [vmem:[#allocation11 + $0x7b0] sm:$0xff] }
 0x37a   :  { %v5619_v1 = vcombine.low %v2247_v33, %v2251_v34 }
 0x37b   :  { %4737 = vmatpush1.bf16.msra.mxu1 %v5563_v51  ;;  %v5620_v51 = vcombine.high %v2247_v33, %v2251_v34  ;;  %v5661_v34 = vcombine.low %v2288_v23, %v2292_v20 }
 0x37c   :  { %4896 = vmatpush1.bf16.msra.mxu0 %v5565_v58  ;;  %4738 = vmatprep.subr.bf16.mxu1 %v5572_v59  ;;  %v5622_v58 = vcombine.high %v2248_v35, %v2252_v36  ;;  %v2255_v59 = vld [vmem:[#allocation11 + $0x7d0] sm:$0xff] }
 0x37d   :  { %4897 = vmatprep.subr.bf16.mxu0 %v5574_v60  ;;  %v2259_v60 = vld [vmem:[#allocation11 + $0x7f0] sm:$0xff] }
 0x37e   :  { %v5627_v41 = vcombine.low %v2255_v59, %v2259_v60 }
 0x37f   :  { %4739 = vmatpush1.bf16.msra.mxu1 %v5571_v5  ;;  %v5628_v5 = vcombine.high %v2255_v59, %v2259_v60 }
 0x380   :  { %4898 = vmatpush1.bf16.msra.mxu0 %v5573_v6  ;;  %4740 = vmatprep.subr.bf16.mxu1 %v5580_v54  ;;  %v5630_v6 = vcombine.high %v2256_v61, %v2260_v0  ;;  %v2263_v54 = vld [vmem:[#allocation11 + $0x810] sm:$0xff] }
 0x381   :  { %4899 = vmatprep.subr.bf16.mxu0 %v5582_v7  ;;  %v2267_v7 = vld [vmem:[#allocation11 + $0x830] sm:$0xff] }
 0x382   :  { %v5635_v19 = vcombine.low %v2263_v54, %v2267_v7  ;;  %v2315_v0 = vld [vmem:[#allocation11 + $0x9b0] sm:$0xff] }
 0x383   :  { %4741 = vmatpush1.bf16.msra.mxu1 %v5579_v8  ;;  %v5636_v8 = vcombine.high %v2263_v54, %v2267_v7 }
 0x384   :  { %4900 = vmatpush1.bf16.msra.mxu0 %v5581_v9  ;;  %4742 = vmatprep.subr.bf16.mxu1 %v5588_v10  ;;  %v5638_v9 = vcombine.high %v2264_v12, %v2268_v57  ;;  %v2271_v10 = vld [vmem:[#allocation11 + $0x850] sm:$0xff] }
 0x385   :  { %4901 = vmatprep.subr.bf16.mxu0 %v5590_v11  ;;  %v2275_v11 = vld [vmem:[#allocation11 + $0x870] sm:$0xff] }
 0x386   :  { %v5643_v4 = vcombine.low %v2271_v10, %v2275_v11  ;;  %v2319_v12 = vld [vmem:[#allocation11 + $0x9d0] sm:$0xff] }
 0x387   :  { %4743 = vmatpush1.bf16.msra.mxu1 %v5587_v16  ;;  %v5644_v16 = vcombine.high %v2271_v10, %v2275_v11  ;;  %v2323_v57 = vld [vmem:[#allocation11 + $0x9f0] sm:$0xff] }
 0x388   :  { %4902 = vmatpush1.bf16.msra.mxu0 %v5589_v49  ;;  %4744 = vmatprep.subr.bf16.mxu1 %v5596_v50  ;;  %v5646_v49 = vcombine.high %v2272_v45, %v2276_v52  ;;  %v2279_v50 = vld [vmem:[#allocation11 + $0x890] sm:$0xff]  ;;  %v5692_v10 = vcombine.high %v2319_v12, %v2323_v57 }
 0x389   :  { %4903 = vmatprep.subr.bf16.mxu0 %v5598_v3  ;;  %v2283_v3 = vld [vmem:[#allocation11 + $0x8b0] sm:$0xff] }
 0x38a   :  { %v2327_v45 = vld [vmem:[#allocation11 + $0xa10] sm:$0xff] }
 0x38b   :  { %4745 = vmatpush1.bf16.msra.mxu1 %v5595_v26  ;;  %v5652_v26 = vcombine.high %v2279_v50, %v2283_v3  ;;  %v2331_v52 = vld [vmem:[#allocation11 + $0xa30] sm:$0xff] }
 0x38c   :  { %4904 = vmatpush1.bf16.msra.mxu0 %v5597_v15  ;;  %4746 = vmatprep.subr.bf16.mxu1 %v5604_v21  ;;  %v5654_v15 = vcombine.high %v2280_v53, %v2284_v62  ;;  %v2287_v21 = vld [vmem:[#allocation11 + $0x8d0] sm:$0xff] }
 0x38d   :  { %4905 = vmatprep.subr.bf16.mxu0 %v5606_v22  ;;  %v2291_v22 = vld [vmem:[#allocation11 + $0x8f0] sm:$0xff] }
 0x38e   :  { %v5660_v28 = vcombine.high %v2287_v21, %v2291_v22  ;;  %v5659_v33 = vcombine.low %v2287_v21, %v2291_v22  ;;  %v2335_v53 = vld [vmem:[#allocation11 + $0xa50] sm:$0xff] }
 0x38f   :  { %4747 = vmatpush1.bf16.msra.mxu1 %v5603_v29  ;;  %v2295_v29 = vld [vmem:[#allocation11 + $0x910] sm:$0xff] }
 0x390   :  { %4906 = vmatpush1.bf16.msra.mxu0 %v5605_v31  ;;  %4748 = vmatprep.subr.bf16.mxu1 %v5612_v32  ;;  %v2299_v31 = vld [vmem:[#allocation11 + $0x930] sm:$0xff]  ;;  %v2296_v32 = vld [vmem:[#allocation11 + $0x918] sm:$0xff] }
 0x391   :  { %4907 = vmatprep.subr.bf16.mxu0 %v5614_v63  ;;  %v2300_v63 = vld [vmem:[#allocation11 + $0x938] sm:$0xff]  ;;  %v5668_v35 = vcombine.high %v2295_v29, %v2299_v31  ;;  %v2339_v62 = vld [vmem:[#allocation11 + $0xa70] sm:$0xff] }
 0x392   :  { %v5670_v36 = vcombine.high %v2296_v32, %v2300_v63  ;;  %v5669_v59 = vcombine.low %v2296_v32, %v2300_v63  ;;  %v5708_v21 = vcombine.high %v2335_v53, %v2339_v62  ;;  %v2351_v32 = vld [vmem:[#allocation11 + $0xad0] sm:$0xff] }
 0x393   :  { %4749 = vmatpush1.bf16.msra.mxu1 %v5611_v37  ;;  %v2303_v37 = vld [vmem:[#allocation11 + $0x950] sm:$0xff] }
 0x394   :  { %4908 = vmatpush1.bf16.msra.mxu0 %v5613_v38  ;;  %4750 = vmatprep.subr.bf16.mxu1 %v5620_v51  ;;  %v2307_v38 = vld [vmem:[#allocation11 + $0x970] sm:$0xff]  ;;  %v2304_v51 = vld [vmem:[#allocation11 + $0x958] sm:$0xff] }
 0x395   :  { %4909 = vmatprep.subr.bf16.mxu0 %v5622_v58  ;;  %v2308_v58 = vld [vmem:[#allocation11 + $0x978] sm:$0xff]  ;;  %v5676_v60 = vcombine.high %v2303_v37, %v2307_v38  ;;  %v2355_v63 = vld [vmem:[#allocation11 + $0xaf0] sm:$0xff] }
 0x396   :  { %v5678_v61 = vcombine.high %v2304_v51, %v2308_v58 }
 0x397   :  { %4751 = vmatpush1.bf16.msra.mxu1 %v5619_v1  ;;  %v2312_v1 = vld [vmem:[#allocation11 + $0x998] sm:$0xff] }
 0x398   :  { %4910 = vmatpush1.bf16.msra.mxu0 %v5621_v2  ;;  %4752 = vmatprep.subr.bf16.mxu1 %v5628_v5  ;;  %v2316_v2 = vld [vmem:[#allocation11 + $0x9b8] sm:$0xff]  ;;  %v5675_v5 = vcombine.low %v2303_v37, %v2307_v38  ;;  %v5724_v37 = vcombine.high %v2351_v32, %v2355_v63 }
 0x399   :  { %4911 = vmatprep.subr.bf16.mxu0 %v5630_v6  ;;  %v5677_v6 = vcombine.low %v2304_v51, %v2308_v58  ;;  %v5686_v7 = vcombine.high %v2312_v1, %v2316_v2  ;;  %v2359_v51 = vld [vmem:[#allocation11 + $0xb10] sm:$0xff] }
 0x39a   :  { %v2363_v58 = vld [vmem:[#allocation11 + $0xb30] sm:$0xff] }
 0x39b   :  { %4753 = vmatpush1.bf16.msra.mxu1 %v5627_v41  ;;  %v2320_v41 = vld [vmem:[#allocation11 + $0x9d8] sm:$0xff] }
 0x39c   :  { %4912 = vmatpush1.bf16.msra.mxu0 %v5629_v30  ;;  %4775 = vmatprep.subr.bf16.mxu1 %v5636_v8  ;;  %v2324_v30 = vld [vmem:[#allocation11 + $0x9f8] sm:$0xff] }
 0x39d   :  { %4934 = vmatprep.subr.bf16.mxu0 %v5638_v9  ;;  %v5685_v9 = vcombine.low %v2312_v1, %v2316_v2  ;;  %v5694_v11 = vcombine.high %v2320_v41, %v2324_v30  ;;  %v2367_v1 = vld [vmem:[#allocation11 + $0xb50] sm:$0xff] }
 0x39e   :  { %4755 = vmatmul.mubr.bf16.vlgmr.msra.gmra.mrb[32].mxu1 %v6749_v24  ;;  %v2371_v2 = vld [vmem:[#allocation11 + $0xb70] sm:$0xff] }
 0x39f   :  { %4914 = vmatmul.mubr.bf16.vlgmr.msra.gmra.mrb[32].mxu0 %v6749_v24  ;;  %4764 = vmatprep.mubr.bf16.mxu1 %v6777_v17  ;;  %v5651_v24 = vcombine.low %v2279_v50, %v2283_v3  ;;  %v5700_v50 = vcombine.high %v2327_v45, %v2331_v52 }
 0x3a0   :  { %4776 = vmatpush1.bf16.msra.mxu1 %v5635_v19  ;;  %4923 = vmatprep.mubr.bf16.mxu0 %v6777_v17  ;;  %v5662_v17 = vcombine.high %v2288_v23, %v2292_v20  ;;  %v2328_v19 = vld [vmem:[#allocation11 + $0xa18] sm:$0xff]  ;;  %v2343_v23 = vld [vmem:[#allocation11 + $0xa90] sm:$0xff] }
 0x3a1   :  { %4935 = vmatpush1.bf16.msra.mxu0 %v5637_v14  ;;  %4777 = vmatprep.subr.bf16.mxu1 %v5644_v16  ;;  %v2332_v14 = vld [vmem:[#allocation11 + $0xa38] sm:$0xff]  ;;  %v5691_v16 = vcombine.low %v2319_v12, %v2323_v57  ;;  %v2347_v20 = vld [vmem:[#allocation11 + $0xab0] sm:$0xff]  ;;  %v5740_v12 = vcombine.high %v2367_v1, %v2371_v2 }
 0x3a2   :  { %4936 = vmatprep.subr.bf16.mxu0 %v5646_v49  ;;  %v5693_v49 = vcombine.low %v2320_v41, %v2324_v30  ;;  %v5702_v3 = vcombine.high %v2328_v19, %v2332_v14  ;;  %v2375_v41 = vld [vmem:[#allocation11 + $0xb90] sm:$0xff] }
 0x3a3   :  { %v2379_v30 = vld [vmem:[#allocation11 + $0xbb0] sm:$0xff] }
 0x3a4   :  { %4778 = vmatpush1.bf16.msra.mxu1 %v5643_v4  ;;  %v2336_v4 = vld [vmem:[#allocation11 + $0xa58] sm:$0xff] }
 0x3a5   :  { %4937 = vmatpush1.bf16.msra.mxu0 %v5645_v56  ;;  %4779 = vmatprep.subr.bf16.mxu1 %v5652_v26  ;;  %v2340_v56 = vld [vmem:[#allocation11 + $0xa78] sm:$0xff]  ;;  %v5699_v26 = vcombine.low %v2327_v45, %v2331_v52  ;;  %v5748_v45 = vcombine.high %v2375_v41, %v2379_v30 }
 0x3a6   :  { %4765 = vmatmul.mubr.bf16.gmra.mrb[36].mxu1 %v6773_v48  ;;  %4938 = vmatprep.subr.bf16.mxu0 %v5654_v15  ;;  %v5701_v15 = vcombine.low %v2328_v19, %v2332_v14  ;;  %v5710_v22 = vcombine.high %v2336_v4, %v2340_v56  ;;  %v2383_v19 = vld [vmem:[#allocation11 + $0xbd0] sm:$0xff] }
 0x3a7   :  { %4924 = vmatmul.mubr.bf16.gmra.mrb[36].mxu0 %v6773_v48  ;;  %4807 = vmatprep.mubr.bf16.mxu1 %v6755_v13  ;;  %v5667_v48 = vcombine.low %v2295_v29, %v2299_v31  ;;  %v5716_v29 = vcombine.high %v2343_v23, %v2347_v20  ;;  %v2387_v14 = vld [vmem:[#allocation11 + $0xbf0] sm:$0xff] }
 0x3a8   :  { %4780 = vmatpush1.bf16.msra.mxu1 %v5651_v24  ;;  %4966 = vmatprep.mubr.bf16.mxu0 %v6755_v13  ;;  %v2311_v13 = vld [vmem:[#allocation11 + $0x990] sm:$0xff]  ;;  %v2344_v24 = vld [vmem:[#allocation11 + $0xa98] sm:$0xff] }
 0x3a9   :  { %4939 = vmatpush1.bf16.msra.mxu0 %v5653_v27  ;;  %4781 = vmatprep.subr.bf16.mxu1 %v5660_v28  ;;  %v5684_v54 = vcombine.high %v2311_v13, %v2315_v0  ;;  %v5683_v8 = vcombine.low %v2311_v13, %v2315_v0  ;;  %v2348_v27 = vld [vmem:[#allocation11 + $0xab8] sm:$0xff]  ;;  %v5707_v28 = vcombine.low %v2335_v53, %v2339_v62 }
 0x3aa   :  { %4940 = vmatprep.subr.bf16.mxu0 %v5662_v17  ;;  %v5709_v17 = vcombine.low %v2336_v4, %v2340_v56  ;;  %v5718_v31 = vcombine.high %v2344_v24, %v2348_v27  ;;  %v5732_v13 = vcombine.high %v2359_v51, %v2363_v58  ;;  %v5756_v53 = vcombine.high %v2383_v19, %v2387_v14 }
 0x3ab   :  { %v5755_v4 = vcombine.low %v2383_v19, %v2387_v14 }
 0x3ac   :  { %4782 = vmatpush1.bf16.msra.mxu1 %v5659_v33  ;;  %v2352_v33 = vld [vmem:[#allocation11 + $0xad8] sm:$0xff] }
 0x3ad   :  { %4941 = vmatpush1.bf16.msra.mxu0 %v5661_v34  ;;  %4783 = vmatprep.subr.bf16.mxu1 %v5668_v35  ;;  %v2356_v34 = vld [vmem:[#allocation11 + $0xaf8] sm:$0xff]  ;;  %v5715_v35 = vcombine.low %v2343_v23, %v2347_v20 }
 0x3ae   :  { %4942 = vmatprep.subr.bf16.mxu0 %v5670_v36  ;;  %v5717_v36 = vcombine.low %v2344_v24, %v2348_v27  ;;  %v5726_v38 = vcombine.high %v2352_v33, %v2356_v34 }
 0x3b0   :  { %4784 = vmatpush1.bf16.msra.mxu1 %v5667_v48  ;;  %v2360_v48 = vld [vmem:[#allocation11 + $0xb18] sm:$0xff] }
 0x3b1   :  { %4943 = vmatpush1.bf16.msra.mxu0 %v5669_v59  ;;  %4785 = vmatprep.subr.bf16.mxu1 %v5676_v60  ;;  %v2364_v59 = vld [vmem:[#allocation11 + $0xb38] sm:$0xff]  ;;  %v5723_v60 = vcombine.low %v2351_v32, %v2355_v63 }
 0x3b2   :  { %4944 = vmatprep.subr.bf16.mxu0 %v5678_v61  ;;  %v5725_v61 = vcombine.low %v2352_v33, %v2356_v34  ;;  %v5734_v0 = vcombine.high %v2360_v48, %v2364_v59 }
 0x3b4   :  { %4786 = vmatpush1.bf16.msra.mxu1 %v5675_v5  ;;  %v2368_v5 = vld [vmem:[#allocation11 + $0xb58] sm:$0xff] }
 0x3b5   :  { %4945 = vmatpush1.bf16.msra.mxu0 %v5677_v6  ;;  %4787 = vmatprep.subr.bf16.mxu1 %v5684_v54  ;;  %v2372_v6 = vld [vmem:[#allocation11 + $0xb78] sm:$0xff]  ;;  %v5731_v54 = vcombine.low %v2359_v51, %v2363_v58 }
 0x3b6   :  { %4946 = vmatprep.subr.bf16.mxu0 %v5686_v7  ;;  %v5733_v7 = vcombine.low %v2360_v48, %v2364_v59  ;;  %v5742_v57 = vcombine.high %v2368_v5, %v2372_v6 }
 0x3b8   :  { %4788 = vmatpush1.bf16.msra.mxu1 %v5683_v8  ;;  %v2376_v8 = vld [vmem:[#allocation11 + $0xb98] sm:$0xff] }
 0x3b9   :  { %4947 = vmatpush1.bf16.msra.mxu0 %v5685_v9  ;;  %4789 = vmatprep.subr.bf16.mxu1 %v5692_v10  ;;  %v2380_v9 = vld [vmem:[#allocation11 + $0xbb8] sm:$0xff]  ;;  %v5739_v10 = vcombine.low %v2367_v1, %v2371_v2 }
 0x3ba   :  { %4948 = vmatprep.subr.bf16.mxu0 %v5694_v11  ;;  %v5741_v11 = vcombine.low %v2368_v5, %v2372_v6  ;;  %v5750_v52 = vcombine.high %v2376_v8, %v2380_v9 }
 0x3bc   :  { %4790 = vmatpush1.bf16.msra.mxu1 %v5691_v16  ;;  %v2384_v16 = vld [vmem:[#allocation11 + $0xbd8] sm:$0xff] }
 0x3bd   :  { %4949 = vmatpush1.bf16.msra.mxu0 %v5693_v49  ;;  %4791 = vmatprep.subr.bf16.mxu1 %v5700_v50  ;;  %v2388_v49 = vld [vmem:[#allocation11 + $0xbf8] sm:$0xff]  ;;  %v5747_v50 = vcombine.low %v2375_v41, %v2379_v30 }
 0x3be   :  { %4950 = vmatprep.subr.bf16.mxu0 %v5702_v3  ;;  %v5749_v3 = vcombine.low %v2376_v8, %v2380_v9  ;;  %v5758_v62 = vcombine.high %v2384_v16, %v2388_v49  ;;  %v5757_v56 = vcombine.low %v2384_v16, %v2388_v49 }
 0x3c0   :  { %4792 = vmatpush1.bf16.msra.mxu1 %v5699_v26  ;;  %v6817_v26 = vld [vmem:[#allocation13] sm:$0xff] }
 0x3c1   :  { %4951 = vmatpush1.bf16.msra.mxu0 %v5701_v15  ;;  %4793 = vmatprep.subr.bf16.mxu1 %v5708_v21  ;;  %v2394_v15 = vrot.slane %v6817_v26, %v6625_v43  ;;  %v2402_v21 = vrot.slane %v6817_v26, %v6628_v44 }
 0x3c2   :  { %4952 = vmatprep.subr.bf16.mxu0 %v5710_v22  ;;  %v2398_v22 = vrot.slane %v6817_v26, %v6631_v46 }
 0x3c4   :  { %4794 = vmatpush1.bf16.msra.mxu1 %v5707_v28 }
 0x3c5   :  { %4953 = vmatpush1.bf16.msra.mxu0 %v5709_v17  ;;  %4795 = vmatprep.subr.bf16.mxu1 %v5716_v29 }
 0x3c6   :  { %4954 = vmatprep.subr.bf16.mxu0 %v5718_v31 }
 0x3c8   :  { %4796 = vmatpush1.bf16.msra.mxu1 %v5715_v35 }
 0x3c9   :  { %4955 = vmatpush1.bf16.msra.mxu0 %v5717_v36  ;;  %4797 = vmatprep.subr.bf16.mxu1 %v5724_v37 }
 0x3ca   :  { %4956 = vmatprep.subr.bf16.mxu0 %v5726_v38 }
 0x3cc   :  { %4798 = vmatpush1.bf16.msra.mxu1 %v5723_v60 }
 0x3cd   :  { %4957 = vmatpush1.bf16.msra.mxu0 %v5725_v61  ;;  %4799 = vmatprep.subr.bf16.mxu1 %v5732_v13 }
 0x3ce   :  { %4958 = vmatprep.subr.bf16.mxu0 %v5734_v0 }
 0x3d0   :  { %4800 = vmatpush1.bf16.msra.mxu1 %v5731_v54 }
 0x3d1   :  { %4959 = vmatpush1.bf16.msra.mxu0 %v5733_v7  ;;  %4801 = vmatprep.subr.bf16.mxu1 %v5740_v12 }
 0x3d2   :  { %4960 = vmatprep.subr.bf16.mxu0 %v5742_v57 }
 0x3d4   :  { %4802 = vmatpush1.bf16.msra.mxu1 %v5739_v10 }
 0x3d5   :  { %4961 = vmatpush1.bf16.msra.mxu0 %v5741_v11  ;;  %4803 = vmatprep.subr.bf16.mxu1 %v5748_v45 }
 0x3d6   :  { %4962 = vmatprep.subr.bf16.mxu0 %v5750_v52 }
 0x3d8   :  { %4804 = vmatpush1.bf16.msra.mxu1 %v5747_v50 }
 0x3d9   :  { %4963 = vmatpush1.bf16.msra.mxu0 %v5749_v3  ;;  %4805 = vmatprep.subr.bf16.mxu1 %v5756_v53 }
 0x3da   :  { %4964 = vmatprep.subr.bf16.mxu0 %v5758_v62 }
 0x3dc   :  { %4806 = vmatpush1.bf16.msra.mxu1 %v5755_v4 }
 0x3dd   :  { %4965 = vmatpush1.bf16.msra.mxu0 %v5757_v56 }
 0x3df   :  { %4808 = vmatmul.mubr.bf16.vlgmr.msra.gmra.mrb[32].mxu1 %v6751_v25 }
 0x3e0   :  { %4967 = vmatmul.mubr.bf16.vlgmr.msra.gmra.mrb[32].mxu0 %v6751_v25  ;;  %4817 = vmatprep.mubr.bf16.mxu1 %v6779_v18  ;;  %v2406_v25 = vrot.slane %v6817_v26, %v6634_v47 }
 0x3e1   :  { %4976 = vmatprep.mubr.bf16.mxu0 %v6779_v18 }
 0x3e7   :  { %4818 = vmatmul.mubr.bf16.gmra.mrb[36].mxu1 %v6775_v55 }
 0x3e8   :  { %4977 = vmatmul.mubr.bf16.gmra.mrb[36].mxu0 %v6775_v55 }
 0x3f0   :  { %v4491_v23 = vpop.f32.mrb[24].mxu1  ;;  %v4650_v18 = vpop.f32.mrb[24].mxu0 }
 0x3f1   :  { %v5823_v20 = vadd.f32 %v4491_v23, %v2394_v15  ;;  %v5831_v24 = vadd.f32 %v4650_v18, %v2402_v21  ;;  %v4493_v27 = vpop.f32.mrb[25].mxu1  ;;  %v4652_v55 = vpop.f32.mrb[25].mxu0  ;;  %v2414_v23 = vrot.slane %v6817_v26, %v683_v40 }
 0x3f2   :  { %v5824_v28 = vadd.f32 %v4493_v27, %v2398_v22  ;;  %v5832_v17 = vadd.f32 %v4652_v55, %v2406_v25  ;;  %v4495_v29 = vpop.f32.mrb[26].mxu1  ;;  %v4654_v31 = vpop.f32.mrb[26].mxu0 }
 0x3f3   :  { %v4987_v43 = vmax.f32 %v5823_v20, 0.0  ;;  %v4989_v32 = vmax.f32 %v5831_v24, 0.0  ;;  %v5825_v63 = vadd.f32 %v4495_v29, %v2394_v15  ;;  %v5833_v44 = vadd.f32 %v4654_v31, %v2402_v21  ;;  %v4497_v33 = vpop.f32.mrb[27].mxu1  ;;  %v4656_v34 = vpop.f32.mrb[27].mxu0 }
 0x3f4   :  { %v4988_v46 = vmax.f32 %v5824_v28, 0.0  ;;  %v4990_v35 = vmax.f32 %v5832_v17, 0.0  ;;  %v5826_v36 = vadd.f32 %v4497_v33, %v2398_v22  ;;  %v5834_v47 = vadd.f32 %v4656_v34, %v2406_v25 }
 0x3f5   :  { %v4995_v37 = vmax.f32 %v5825_v63, 0.0  ;;  %v4997_v38 = vmax.f32 %v5833_v44, 0.0 }
 0x3f6   :  { %v5775_v51 = vpack.c.bf16 %v4988_v46, %v4987_v43  ;;  %v5776_v58 = vpack.c.bf16 %v4990_v35, %v4989_v32  ;;  %v4996_v48 = vmax.f32 %v5826_v36, 0.0  ;;  %v4998_v59 = vmax.f32 %v5834_v47, 0.0 }
 0x3f8   :  { %5115 = vst [vmem:[#allocation14] sm:$0xff] %v5775_v51  ;;  %5116 = vst [vmem:[#allocation14 + $0x8] sm:$0xff] %v5776_v58  ;;  %v5779_v60 = vpack.c.bf16 %v4996_v48, %v4995_v37  ;;  %v5780_v61 = vpack.c.bf16 %v4998_v59, %v4997_v38  ;;  %v4501_v13 = vpop.f32.mrb[28].mxu1  ;;  %v4660_v0 = vpop.f32.mrb[28].mxu0 }
 0x3f9   :  { %v5827_v1 = vadd.f32 %v4501_v13, %v2394_v15  ;;  %v5835_v2 = vadd.f32 %v4660_v0, %v2402_v21  ;;  %v4503_v5 = vpop.f32.mrb[29].mxu1  ;;  %v4662_v6 = vpop.f32.mrb[29].mxu0 }
 0x3fa   :  { %5119 = vst [vmem:[#allocation14 + $0x20] sm:$0xff] %v5779_v60  ;;  %5120 = vst [vmem:[#allocation14 + $0x28] sm:$0xff] %v5780_v61  ;;  %v5828_v54 = vadd.f32 %v4503_v5, %v2398_v22  ;;  %v5836_v7 = vadd.f32 %v4662_v6, %v2406_v25  ;;  %v4505_v12 = vpop.f32.mrb[30].mxu1  ;;  %v4664_v57 = vpop.f32.mrb[30].mxu0 }
 0x3fb   :  { %v5003_v41 = vmax.f32 %v5827_v1, 0.0  ;;  %v5005_v30 = vmax.f32 %v5835_v2, 0.0  ;;  %v5829_v8 = vadd.f32 %v4505_v12, %v2394_v15  ;;  %v5837_v9 = vadd.f32 %v4664_v57, %v2402_v21  ;;  %v4507_v10 = vpop.f32.mrb[31].mxu1  ;;  %v4666_v11 = vpop.f32.mrb[31].mxu0 }
 0x3fc   :  { %v5004_v45 = vmax.f32 %v5828_v54, 0.0  ;;  %v5006_v52 = vmax.f32 %v5836_v7, 0.0  ;;  %v5830_v19 = vadd.f32 %v4507_v10, %v2398_v22  ;;  %v5838_v14 = vadd.f32 %v4666_v11, %v2406_v25 }
 0x3fd   :  { %v5011_v16 = vmax.f32 %v5829_v8, 0.0  ;;  %v5013_v49 = vmax.f32 %v5837_v9, 0.0  ;;  %v2417_v15 = vsub.s32 6, %v6622_v42  ;;  %v2421_v21 = vsub.s32 7, %v6622_v42 }
 0x3fe   :  { %v5783_v50 = vpack.c.bf16 %v5004_v45, %v5003_v41  ;;  %v5784_v3 = vpack.c.bf16 %v5006_v52, %v5005_v30  ;;  %v5012_v53 = vmax.f32 %v5830_v19, 0.0  ;;  %v5014_v62 = vmax.f32 %v5838_v14, 0.0 }
 0x3ff   :  { %v2410_v22 = vrot.slane %v6817_v26, %v679_v39  ;;  %v2418_v25 = vrot.slane %v6817_v26, %v2417_v15  ;;  %v2422_v18 = vrot.slane %v6817_v26, %v2421_v21 }
 0x400   :  { %5123 = vst [vmem:[#allocation14 + $0x40] sm:$0xff] %v5783_v50  ;;  %5124 = vst [vmem:[#allocation14 + $0x48] sm:$0xff] %v5784_v3  ;;  %v5787_v4 = vpack.c.bf16 %v5012_v53, %v5011_v16  ;;  %v5788_v56 = vpack.c.bf16 %v5014_v62, %v5013_v49 }
 0x402   :  { %5127 = vst [vmem:[#allocation14 + $0x60] sm:$0xff] %v5787_v4  ;;  %5128 = vst [vmem:[#allocation14 + $0x68] sm:$0xff] %v5788_v56 }
 0x4b2   :  { %v4809_v20 = vpop.f32.mrb[32].mxu1 }
 0x4b3   :  { %v5839_v24 = vadd.f32 %v4809_v20, %v2410_v22  ;;  %v4968_v27 = vpop.f32.mrb[32].mxu0  ;;  %v4811_v55 = vpop.f32.mrb[33].mxu1 }
 0x4b4   :  { %v5847_v28 = vadd.f32 %v4968_v27, %v2418_v25  ;;  %v5840_v17 = vadd.f32 %v4811_v55, %v2414_v23  ;;  %v4970_v29 = vpop.f32.mrb[33].mxu0  ;;  %v4813_v31 = vpop.f32.mrb[34].mxu1 }
 0x4b5   :  { %v4991_v43 = vmax.f32 %v5839_v24, 0.0  ;;  %v5848_v32 = vadd.f32 %v4970_v29, %v2422_v18  ;;  %v5841_v63 = vadd.f32 %v4813_v31, %v2410_v22  ;;  %v4972_v39 = vpop.f32.mrb[34].mxu0  ;;  %v4815_v44 = vpop.f32.mrb[35].mxu1 }
 0x4b6   :  { %v4993_v33 = vmax.f32 %v5847_v28, 0.0  ;;  %v4992_v34 = vmax.f32 %v5840_v17, 0.0  ;;  %v5849_v42 = vadd.f32 %v4972_v39, %v2418_v25  ;;  %v5842_v46 = vadd.f32 %v4815_v44, %v2414_v23  ;;  %v4974_v40 = vpop.f32.mrb[35].mxu0 }
 0x4b7   :  { %v4994_v35 = vmax.f32 %v5848_v32, 0.0  ;;  %v4999_v26 = vmax.f32 %v5841_v63, 0.0  ;;  %v5850_v36 = vadd.f32 %v4974_v40, %v2422_v18 }
 0x4b8   :  { %v5777_v47 = vpack.c.bf16 %v4992_v34, %v4991_v43  ;;  %v5001_v37 = vmax.f32 %v5849_v42, 0.0  ;;  %v5000_v38 = vmax.f32 %v5842_v46, 0.0 }
 0x4b9   :  { %v5778_v51 = vpack.c.bf16 %v4994_v35, %v4993_v33  ;;  %v5002_v58 = vmax.f32 %v5850_v36, 0.0 }
 0x4ba   :  { %5117 = vst [vmem:[#allocation14 + $0x10] sm:$0xff] %v5777_v47  ;;  %v5781_v48 = vpack.c.bf16 %v5000_v38, %v4999_v26  ;;  %v4819_v59 = vpop.f32.mrb[36].mxu1 }
 0x4bb   :  { %5118 = vst [vmem:[#allocation14 + $0x18] sm:$0xff] %v5778_v51  ;;  %v5782_v60 = vpack.c.bf16 %v5002_v58, %v5001_v37  ;;  %v5843_v61 = vadd.f32 %v4819_v59, %v2410_v22  ;;  %v4978_v13 = vpop.f32.mrb[36].mxu0  ;;  %v4821_v0 = vpop.f32.mrb[37].mxu1 }
 0x4bc   :  { %5121 = vst [vmem:[#allocation14 + $0x30] sm:$0xff] %v5781_v48  ;;  %v5851_v1 = vadd.f32 %v4978_v13, %v2418_v25  ;;  %v5844_v2 = vadd.f32 %v4821_v0, %v2414_v23  ;;  %v4980_v5 = vpop.f32.mrb[37].mxu0  ;;  %v4823_v6 = vpop.f32.mrb[38].mxu1 }
 0x4bd   :  { %5122 = vst [vmem:[#allocation14 + $0x38] sm:$0xff] %v5782_v60  ;;  %v5007_v54 = vmax.f32 %v5843_v61, 0.0  ;;  %v5852_v7 = vadd.f32 %v4980_v5, %v2422_v18  ;;  %v5845_v12 = vadd.f32 %v4823_v6, %v2410_v22  ;;  %v4982_v57 = vpop.f32.mrb[38].mxu0  ;;  %v4825_v41 = vpop.f32.mrb[39].mxu1 }
 0x4be   :  { %v5009_v30 = vmax.f32 %v5851_v1, 0.0  ;;  %v5008_v8 = vmax.f32 %v5844_v2, 0.0  ;;  %v5853_v9 = vadd.f32 %v4982_v57, %v2418_v25  ;;  %v5846_v10 = vadd.f32 %v4825_v41, %v2414_v23  ;;  %v4984_v11 = vpop.f32.mrb[39].mxu0 }
 0x4bf   :  { %v5010_v45 = vmax.f32 %v5852_v7, 0.0  ;;  %v5015_v52 = vmax.f32 %v5845_v12, 0.0  ;;  %v5854_v19 = vadd.f32 %v4984_v11, %v2422_v18 }
 0x4c0   :  { %v5785_v14 = vpack.c.bf16 %v5008_v8, %v5007_v54  ;;  %v5017_v16 = vmax.f32 %v5853_v9, 0.0  ;;  %v5016_v49 = vmax.f32 %v5846_v10, 0.0 }
 0x4c1   :  { %v5786_v50 = vpack.c.bf16 %v5010_v45, %v5009_v30  ;;  %v5018_v3 = vmax.f32 %v5854_v19, 0.0 }
 0x4c2   :  { %5125 = vst [vmem:[#allocation14 + $0x50] sm:$0xff] %v5785_v14  ;;  %v5789_v53 = vpack.c.bf16 %v5016_v49, %v5015_v52 }
 0x4c3   :  { %5126 = vst [vmem:[#allocation14 + $0x58] sm:$0xff] %v5786_v50  ;;  %v5790_v62 = vpack.c.bf16 %v5018_v3, %v5017_v16 }
 0x4c4   :  { %5129 = vst [vmem:[#allocation14 + $0x70] sm:$0xff] %v5789_v53 }
 0x4c5   :  { %5130 = vst [vmem:[#allocation14 + $0x78] sm:$0xff] %v5790_v62 }
 0x4c6   :  { %6453 = shalt.err (!%p6450_p4)
}
 0x4c7   :  { %s6454_s20 = scalar_lea.hbm %s6859_s7, 2048 }
 0x4c8   :  { %p6455_p5 = scmp.ne.s32.totalorder %s6859_s7, %s6454_s20  ;;  %p6458_p6 = scmp.lt.u32.totalorder %s6454_s20, %s6859_s7 }
 0x4ca   :  { %p6460_p7 = pnand %p6458_p6, %p6455_p5 }
 0x4cc   :  { %6463 = shalt.err (!%p6460_p7)
}
 0x4cd   :  { %5142 = dma.vmem_to_hbm [thread:$0]  %s5137_s17, 2048, %s6859_s7, [#allocation4], %s6481_s3, %s6481_s3, %s6482_s15  }
 0x4ce   :  { %6472 = dma.done.wait [#allocation4], 2048  }
 0x4cf   :  { %6473 = vsyncadd [#allocation4], 4294965248 }
 0x4d0   :  { %5146 = vsyncpa [#allocation3], 1 }
 0x4d1   :  { %5147 = vsyncpa [#allocation6], 1 }
 0x4d2   :  { %5148 = vsyncpa [#allocation9], 1 }
 0x4d3   :  { %5149 = vsyncpa [#allocation12], 1 }
 0x4d4   :  { %5150 = vsyncpa [#allocation4], 1 }

</bundles_post_ra>
